<compile_context>
chip_gen: v5e
topology: v5e:2x2
jax: 0.10.0
libtpu: 0.0.40
codegen_flags: <defaults>
</compile_context>

<pallas_src>
import functools

import jax
import jax.numpy as jnp
from jax.experimental import pallas as pl
from jax.experimental.pallas import tpu as pltpu


# ----------------------------------------------------------------------------
# Banded-weight construction (wrapper side, runs once under jit).
# Folds the W-axis 'same' convolution into a single matmul:
#   out[r, w*Co+co] = sum_{dx,ci, wi=w+dx-pad in [0,in_w)} x[r, wi*Ci+ci] * k[dy,dx,ci,co]
# ----------------------------------------------------------------------------
def _banded_weight(w_kkio, in_w, out_w, pad):
    """w_kkio: (K, K, Ci, Co) -> (K, in_w*Ci, out_w*Co) block-banded matrices."""
    K = w_kkio.shape[0]
    Ci, Co = w_kkio.shape[2], w_kkio.shape[3]
    dx = jnp.arange(K)[:, None, None]
    wi = jnp.arange(in_w)[None, :, None]
    wo = jnp.arange(out_w)[None, None, :]
    sel = (wi == wo + dx - pad).astype(w_kkio.dtype)          # (K, in_w, out_w)
    band = jnp.einsum("xiw,yxab->yiawb", sel, w_kkio)          # (K, in_w, Ci, out_w, Co)
    return band.reshape(K, in_w * Ci, out_w * Co)


# ----------------------------------------------------------------------------
# Conv-RNN over time with fused BatchNorm statistics.  grid = (B,) parallel;
# time runs as an in-kernel unrolled fori_loop carrying h in a bf16 scratch.
# ----------------------------------------------------------------------------
def conv_rnn_last_and_stats(x_bthwc, w_band, bias_row):
    """x_bthwc: (B, T, H, W*Cin) bf16, w_band: (K, W*(Cin+Ck), W*Ck) bf16,
    bias_row: (1, W*Ck) f32.

    Returns:
      h_last: (B, H, W*Ck) f32 -- hidden state at the final time step
      stats : (B, 2, W*Ck) f32 -- per-(w,channel) [sum, sum_sq] over (t, h)
    """
    B, T, H, WCin = x_bthwc.shape
    K, KW, WCk = w_band.shape
    assert KW == WCin + WCk
    pad = K // 2
    Hp = H + 2 * pad

    def kernel(x_ref, w_ref, b_ref, h_last_ref, stats_ref, xh_scr):
        # Zero once per batch: covers h_{-1} = 0 and the zero H-border rows
        # ('same' padding in H).  W-padding is folded into the banded weight.
        xh_scr[...] = jnp.zeros_like(xh_scr)
        bias = b_ref[...]                                     # (1, W*Ck) f32

        def step(t, carry):
            s1, s2 = carry
            # Current input frame into the x-plane columns [0 : W*Cin].
            xh_scr[pad:pad + H, 0:WCin] = x_ref[t]            # bf16, lane-aligned
            # K accumulating matmuls over dy-shifted row slices (no im2col).
            acc = jnp.zeros((H, WCk), jnp.float32)
            for dy in range(K):                               # static, unrolled
                acc += jnp.dot(xh_scr[dy:dy + H, :], w_ref[dy],
                               preferred_element_type=jnp.float32)
            h_new = jnp.tanh(acc + bias)                      # (H, W*Ck) f32
            # Carry hidden state (h-plane columns [W*Cin :]) for the next step.
            xh_scr[pad:pad + H, WCin:WCin + WCk] = h_new.astype(jnp.bfloat16)
            # Last-frame output (final write wins; block is VMEM-resident).
            h_last_ref[...] = h_new
            # Fused BatchNorm statistics, accumulated in vregs (f32).
            s1 = s1 + jnp.sum(h_new, axis=0, keepdims=True)
            s2 = s2 + jnp.sum(h_new * h_new, axis=0, keepdims=True)
            return s1, s2

        init = (jnp.zeros((1, WCk), jnp.float32), jnp.zeros((1, WCk), jnp.float32))
        s1, s2 = jax.lax.fori_loop(0, T, step, init, unroll=True)
        stats_ref[...] = jnp.concatenate([s1, s2], axis=0)    # single store

    grid_spec = pltpu.PrefetchScalarGridSpec(
        num_scalar_prefetch=0,
        grid=(B,),
        in_specs=[
            pl.BlockSpec((None, T, H, WCin), lambda b: (b, 0, 0, 0)),
            pl.BlockSpec((K, KW, WCk), lambda b: (0, 0, 0)),
            pl.BlockSpec((1, WCk), lambda b: (0, 0)),
        ],
        out_specs=(
            pl.BlockSpec((None, H, WCk), lambda b: (b, 0, 0)),
            pl.BlockSpec((None, 2, WCk), lambda b: (b, 0, 0)),
        ),
        scratch_shapes=[pltpu.VMEM((Hp, WCin + WCk), jnp.bfloat16)],
    )

    return pl.pallas_call(
        kernel,
        out_shape=(
            jax.ShapeDtypeStruct((B, H, WCk), jnp.float32),
            jax.ShapeDtypeStruct((B, 2, WCk), jnp.float32),
        ),
        grid_spec=grid_spec,
        compiler_params=pltpu.CompilerParams(
            dimension_semantics=("parallel",),
            vmem_limit_bytes=32 * 1024 * 1024,
        ),
    )(x_bthwc, w_band, bias_row)


# ----------------------------------------------------------------------------
# Head kernel: BatchNorm affine (folded) -> Conv2d (banded matmul) -> Sigmoid.
# Lane-dense in (B, H, W*C1) and out (B, Ho, Wo*Cf).
# ----------------------------------------------------------------------------
def bn_conv_sigmoid_head(x_bhwc, scale_row, shift_row, w_band, bias_row, padding):
    B, H, WC1 = x_bhwc.shape
    K, KW, WoCf = w_band.shape
    assert KW == WC1
    p = padding
    Hp = H + 2 * p
    Ho = Hp - K + 1

    def kernel(x_ref, sc_ref, sh_ref, w_ref, b_ref, o_ref, pad_scr):
        # Zero only the H-border rows; the interior is fully overwritten below.
        if p > 0:
            zrow = jnp.zeros((p, WC1), jnp.bfloat16)
            pad_scr[0:p, :] = zrow
            pad_scr[p + H:Hp, :] = zrow
        y = x_ref[...] * sc_ref[...] + sh_ref[...]            # BN affine, f32
        pad_scr[p:p + H, :] = y.astype(jnp.bfloat16)          # MXU operand only

        acc = jnp.zeros((Ho, WoCf), jnp.float32)
        for dy in range(K):
            acc += jnp.dot(pad_scr[dy:dy + Ho, :], w_ref[dy],
                           preferred_element_type=jnp.float32)
        o_ref[...] = jax.nn.sigmoid(acc + b_ref[...])

    grid_spec = pltpu.PrefetchScalarGridSpec(
        num_scalar_prefetch=0,
        grid=(B,),
        in_specs=[
            pl.BlockSpec((None, H, WC1), lambda b: (b, 0, 0)),
            pl.BlockSpec((1, WC1), lambda b: (0, 0)),
            pl.BlockSpec((1, WC1), lambda b: (0, 0)),
            pl.BlockSpec((K, WC1, WoCf), lambda b: (0, 0, 0)),
            pl.BlockSpec((1, WoCf), lambda b: (0, 0)),
        ],
        out_specs=pl.BlockSpec((None, Ho, WoCf), lambda b: (b, 0, 0)),
        scratch_shapes=[pltpu.VMEM((Hp, WC1), jnp.bfloat16)],
    )

    return pl.pallas_call(
        kernel,
        out_shape=jax.ShapeDtypeStruct((B, Ho, WoCf), jnp.float32),
        grid_spec=grid_spec,
        compiler_params=pltpu.CompilerParams(
            dimension_semantics=("parallel",),
            vmem_limit_bytes=32 * 1024 * 1024,
        ),
    )(x_bhwc, scale_row, shift_row, w_band, bias_row)


# ----------------------------------------------------------------------------
# Latent2NextFrame forward
# ----------------------------------------------------------------------------
@functools.partial(jax.jit, static_argnames=("padding",))
def latent2nextframe_forward(x_bcthw, params, padding=1):
    B, Cin, T, H, W = x_bcthw.shape
    Krnn = params["wx"].shape[0]
    Ck = params["wx"].shape[-1]
    pad = Krnn // 2

    # (B, C, T, H, W) -> lane-dense (B, T, H, W*C); bf16 (MXU operand only).
    x = jnp.transpose(x_bcthw, (0, 2, 3, 4, 1)).reshape(B, T, H, W * Cin)
    x = x.astype(jnp.bfloat16)

    # Fused [x ; h] banded weights + W-tiled bias (built once).
    band_x = _banded_weight(params["wx"], W, W, pad)          # (K, W*Cin, W*Ck)
    band_h = _banded_weight(params["wh"], W, W, pad)          # (K, W*Ck,  W*Ck)
    w_rnn = jnp.concatenate([band_x, band_h], axis=1).astype(jnp.bfloat16)
    b_rnn = jnp.tile(params["b_rnn"], W).reshape(1, W * Ck).astype(jnp.float32)

    h_last, stats = conv_rnn_last_and_stats(x, w_rnn, b_rnn)

    # BatchNorm3d (training-mode batch statistics) folded into a per-channel affine.
    n = B * T * H * W
    s = jnp.sum(stats.reshape(B, 2, W, Ck), axis=(0, 2))      # (2, Ck)
    mean = s[0] / n
    var = s[1] / n - mean * mean                              # biased variance
    inv = jax.lax.rsqrt(var + 1e-5)
    scale = params["gamma"] * inv
    shift = params["beta"] - mean * scale
    scale_row = jnp.tile(scale, W).reshape(1, W * Ck).astype(jnp.float32)
    shift_row = jnp.tile(shift, W).reshape(1, W * Ck).astype(jnp.float32)
    # TODO(synk): running_mean / running_var buffer updates (module side effect)
    # are not materialized; only the forward output is produced.

    Kout = params["w_out"].shape[0]
    Cf = params["w_out"].shape[-1]
    Wo = W + 2 * padding - Kout + 1
    Ho = H + 2 * padding - Kout + 1
    w_out = _banded_weight(params["w_out"], W, Wo, padding).astype(jnp.bfloat16)
    b_out = jnp.tile(params["b_out"], Wo).reshape(1, Wo * Cf).astype(jnp.float32)

    out = bn_conv_sigmoid_head(h_last, scale_row, shift_row, w_out, b_out, padding)
    return jnp.transpose(out.reshape(B, Ho, Wo, Cf), (0, 3, 1, 2))


# ----------------------------------------------------------------------------
# Pure-JAX f32 reference (for a loose tolerance check of the Pallas path).
# ----------------------------------------------------------------------------
def _reference_forward(x_bcthw, params, padding):
    B, C, T, H, W = x_bcthw.shape
    wx, wh = params["wx"], params["wh"]
    K = wx.shape[0]
    Ck = wx.shape[-1]
    pad = K // 2
    x = jnp.transpose(x_bcthw, (0, 2, 3, 4, 1)).astype(jnp.float32)

    def conv2d(inp, w, p):
        return jax.lax.conv_general_dilated(
            inp, w, window_strides=(1, 1), padding=[(p, p), (p, p)],
            dimension_numbers=("NHWC", "HWIO", "NHWC"))

    h = jnp.zeros((B, H, W, Ck), jnp.float32)
    frames = []
    for t in range(T):
        pre = conv2d(x[:, t], wx, pad) + conv2d(h, wh, pad) + params["b_rnn"]
        h = jnp.tanh(pre)
        frames.append(h)
    seq = jnp.stack(frames, axis=1)                           # (B, T, H, W, Ck)
    mean = jnp.mean(seq, axis=(0, 1, 2, 3))
    var = jnp.mean((seq - mean) ** 2, axis=(0, 1, 2, 3))
    y = (h - mean) * jax.lax.rsqrt(var + 1e-5) * params["gamma"] + params["beta"]
    out = conv2d(y, params["w_out"], padding) + params["b_out"]
    return jnp.transpose(jax.nn.sigmoid(out), (0, 3, 1, 2))


def init_params(key, num_channels, num_kernels, kernel_size):
    ks = jax.random.split(key, 5)
    k = kernel_size
    s = 0.1
    return {
        # Conv2dRNNCell: H_t = tanh(Conv(x_t, Wx) + Conv(h_{t-1}, Wh) + b), 'same' pad.
        # TODO(synk): Conv2dRNNCell source is not in the reference; the standard
        # conv-RNN cell is assumed here.
        "wx": s * jax.random.normal(ks[0], (k, k, num_kernels, num_kernels), jnp.float32),
        "wh": s * jax.random.normal(ks[1], (k, k, num_kernels, num_kernels), jnp.float32),
        "b_rnn": s * jax.random.normal(ks[2], (num_kernels,), jnp.float32),
        "gamma": jnp.ones((num_kernels,), jnp.float32),
        "beta": jnp.zeros((num_kernels,), jnp.float32),
        "w_out": s * jax.random.normal(ks[3], (k, k, num_kernels, num_channels), jnp.float32),
        "b_out": s * jax.random.normal(ks[4], (num_channels,), jnp.float32),
    }


if __name__ == "__main__":
    # batch=2, num_kernels=8 (input/hidden channels), num_channels=4,
    # seq=8, spatial=16x16, kernel_size=3, padding=1.  (W * num_kernels = 128.)
    B, num_channels, num_kernels = 2, 4, 8
    T, H, W = 8, 16, 16
    kernel_size, padding = 3, 1

    key = jax.random.PRNGKey(0)
    kx, kp = jax.random.split(key)
    x = jax.random.normal(kx, (B, num_kernels, T, H, W), jnp.float32)
    params = init_params(kp, num_channels, num_kernels, kernel_size)

    out = latent2nextframe_forward(x, params, padding=padding)
    jax.block_until_ready(out)
    assert out.shape == (B, num_channels, H, W), out.shape
    assert bool(jnp.all(jnp.isfinite(out)))

    # Loose tolerance vs. an all-f32 reference (kernel uses bf16 MXU operands
    # and a bf16-carried hidden state; values are tanh/sigmoid bounded).
    ref = _reference_forward(x, params, padding)
    err = float(jnp.max(jnp.abs(out - ref)))
    assert err < 5e-2, f"max abs error vs f32 reference: {err}"
    print("KERNEL_OK")
</pallas_src>

<mosaic_0001>
module attributes {stable_mosaic.version = 11 : i64} {
  func.func @kernel(%arg0: i32, %arg1: memref<1x8x16x128xbf16, #tpu.memory_space<vmem>>, %arg2: memref<3x256x128xbf16, #tpu.memory_space<vmem>>, %arg3: memref<1x128xf32, #tpu.memory_space<vmem>>, %arg4: memref<1x16x128xf32, #tpu.memory_space<vmem>>, %arg5: memref<1x2x128xf32, #tpu.memory_space<vmem>>, %arg6: memref<18x256xbf16, #tpu.memory_space<vmem>>) attributes {dimension_semantics = [#tpu.dimension_semantics<parallel>], iteration_bounds = array<i64: 2>, scalar_prefetch = 0 : i64, scratch_operands = 1 : i64, tpu.core_type = #tpu.core_type<tc>, window_params = [{transform_indices = @transform_0, window_bounds = array<i64: 1, 8, 16, 128>}, {pipeline_mode = #tpu.pipeline_mode<synchronous>, transform_indices = @transform_1, window_bounds = array<i64: 3, 256, 128>}, {pipeline_mode = #tpu.pipeline_mode<synchronous>, transform_indices = @transform_2, window_bounds = array<i64: 1, 128>}, {transform_indices = @transform_3, window_bounds = array<i64: 1, 16, 128>}, {transform_indices = @transform_4, window_bounds = array<i64: 1, 2, 128>}]} {
    %cst = arith.constant 0.000000e+00 : bf16
    %0 = vector.broadcast %cst : bf16 to vector<18x256xbf16>
    %c0 = arith.constant 0 : index
    %c0_0 = arith.constant 0 : index
    %1 = vector.load %arg6[%c0, %c0_0] : memref<18x256xbf16, #tpu.memory_space<vmem>>, vector<18x256xbf16>
    tpu.vector_store %arg6[%c0, %c0_0], %0 {strides = array<i32>} : memref<18x256xbf16, #tpu.memory_space<vmem>>, vector<18x256xbf16>,
    %c0_1 = arith.constant 0 : index
    %c0_2 = arith.constant 0 : index
    %2 = vector.load %arg3[%c0_1, %c0_2] : memref<1x128xf32, #tpu.memory_space<vmem>>, vector<1x128xf32>
    %cst_3 = arith.constant 0.000000e+00 : f32
    %3 = vector.broadcast %cst_3 : f32 to vector<1x128xf32>
    %cst_4 = arith.constant 0.000000e+00 : f32
    %4 = vector.broadcast %cst_4 : f32 to vector<1x128xf32>
    %c0_i32 = arith.constant 0 : i32
    %c0_5 = arith.constant 0 : index
    %5 = arith.index_cast %c0_i32 : i32 to index
    %c0_6 = arith.constant 0 : index
    %c0_7 = arith.constant 0 : index
    %6 = vector.load %arg1[%c0_5, %5, %c0_6, %c0_7] : memref<1x8x16x128xbf16, #tpu.memory_space<vmem>>, vector<1x1x16x128xbf16>
    %7 = vector.shape_cast %6 : vector<1x1x16x128xbf16> to vector<16x128xbf16>
    %c1 = arith.constant 1 : index
    %c0_8 = arith.constant 0 : index
    %8 = vector.load %arg6[%c1, %c0_8] : memref<18x256xbf16, #tpu.memory_space<vmem>>, vector<16x128xbf16>
    tpu.vector_store %arg6[%c1, %c0_8], %7 {strides = array<i32>} : memref<18x256xbf16, #tpu.memory_space<vmem>>, vector<16x128xbf16>,
    %cst_9 = arith.constant 0.000000e+00 : f32
    %9 = vector.broadcast %cst_9 : f32 to vector<16x128xf32>
    %c0_10 = arith.constant 0 : index
    %c0_11 = arith.constant 0 : index
    %10 = vector.load %arg6[%c0_10, %c0_11] : memref<18x256xbf16, #tpu.memory_space<vmem>>, vector<16x256xbf16>
    %c0_12 = arith.constant 0 : index
    %c0_13 = arith.constant 0 : index
    %c0_14 = arith.constant 0 : index
    %11 = vector.load %arg2[%c0_12, %c0_13, %c0_14] : memref<3x256x128xbf16, #tpu.memory_space<vmem>>, vector<1x256x128xbf16>
    %12 = vector.shape_cast %11 : vector<1x256x128xbf16> to vector<256x128xbf16>
    %cst_15 = arith.constant dense<0.000000e+00> : vector<16x128xf32>
    %13 = tpu.matmul %10, %12, %cst_15 {dimension_numbers = #tpu.dot_dimension_numbers<[1], [0], [0], [1], [0, 0, 1, 1], [], []>} : vector<16x256xbf16>, vector<256x128xbf16>, vector<16x128xf32> -> vector<16x128xf32>
    %14 = arith.addf %9, %13 : vector<16x128xf32>
    %c1_16 = arith.constant 1 : index
    %c0_17 = arith.constant 0 : index
    %15 = vector.load %arg6[%c1_16, %c0_17] : memref<18x256xbf16, #tpu.memory_space<vmem>>, vector<16x256xbf16>
    %c1_18 = arith.constant 1 : index
    %c0_19 = arith.constant 0 : index
    %c0_20 = arith.constant 0 : index
    %16 = vector.load %arg2[%c1_18, %c0_19, %c0_20] : memref<3x256x128xbf16, #tpu.memory_space<vmem>>, vector<1x256x128xbf16>
    %17 = vector.shape_cast %16 : vector<1x256x128xbf16> to vector<256x128xbf16>
    %cst_21 = arith.constant dense<0.000000e+00> : vector<16x128xf32>
    %18 = tpu.matmul %15, %17, %cst_21 {dimension_numbers = #tpu.dot_dimension_numbers<[1], [0], [0], [1], [0, 0, 1, 1], [], []>} : vector<16x256xbf16>, vector<256x128xbf16>, vector<16x128xf32> -> vector<16x128xf32>
    %19 = arith.addf %14, %18 : vector<16x128xf32>
    %c2 = arith.constant 2 : index
    %c0_22 = arith.constant 0 : index
    %20 = vector.load %arg6[%c2, %c0_22] : memref<18x256xbf16, #tpu.memory_space<vmem>>, vector<16x256xbf16>
    %c2_23 = arith.constant 2 : index
    %c0_24 = arith.constant 0 : index
    %c0_25 = arith.constant 0 : index
    %21 = vector.load %arg2[%c2_23, %c0_24, %c0_25] : memref<3x256x128xbf16, #tpu.memory_space<vmem>>, vector<1x256x128xbf16>
    %22 = vector.shape_cast %21 : vector<1x256x128xbf16> to vector<256x128xbf16>
    %cst_26 = arith.constant dense<0.000000e+00> : vector<16x128xf32>
    %23 = tpu.matmul %20, %22, %cst_26 {dimension_numbers = #tpu.dot_dimension_numbers<[1], [0], [0], [1], [0, 0, 1, 1], [], []>} : vector<16x256xbf16>, vector<256x128xbf16>, vector<16x128xf32> -> vector<16x128xf32>
    %24 = arith.addf %19, %23 : vector<16x128xf32>
    %25 = vector.broadcast %2 : vector<1x128xf32> to vector<16x128xf32>
    %26 = arith.addf %24, %25 : vector<16x128xf32>
    %27 = math.tanh %26 : vector<16x128xf32>
    %28 = arith.truncf %27 : vector<16x128xf32> to vector<16x128xbf16>
    %c1_27 = arith.constant 1 : index
    %c128 = arith.constant 128 : index
    %29 = vector.load %arg6[%c1_27, %c128] : memref<18x256xbf16, #tpu.memory_space<vmem>>, vector<16x128xbf16>
    tpu.vector_store %arg6[%c1_27, %c128], %28 {strides = array<i32>} : memref<18x256xbf16, #tpu.memory_space<vmem>>, vector<16x128xbf16>,
    %c0_28 = arith.constant 0 : index
    %c0_29 = arith.constant 0 : index
    %c0_30 = arith.constant 0 : index
    %30 = vector.load %arg4[%c0_28, %c0_29, %c0_30] : memref<1x16x128xf32, #tpu.memory_space<vmem>>, vector<1x16x128xf32>
    %31 = vector.shape_cast %30 : vector<1x16x128xf32> to vector<16x128xf32>
    %32 = vector.shape_cast %27 : vector<16x128xf32> to vector<1x16x128xf32>
    tpu.vector_store %arg4[%c0_28, %c0_29, %c0_30], %32 {strides = array<i32>} : memref<1x16x128xf32, #tpu.memory_space<vmem>>, vector<1x16x128xf32>,
    %cst_31 = arith.constant dense<0.000000e+00> : vector<128xf32>
    %33 = vector.multi_reduction <add>, %27, %cst_31 [0] : vector<16x128xf32> to vector<128xf32>
    %34 = vector.shape_cast %33 : vector<128xf32> to vector<1x128xf32>
    %35 = arith.addf %3, %34 : vector<1x128xf32>
    %36 = arith.mulf %27, %27 : vector<16x128xf32>
    %cst_32 = arith.constant dense<0.000000e+00> : vector<128xf32>
    %37 = vector.multi_reduction <add>, %36, %cst_32 [0] : vector<16x128xf32> to vector<128xf32>
    %38 = vector.shape_cast %37 : vector<128xf32> to vector<1x128xf32>
    %39 = arith.addf %4, %38 : vector<1x128xf32>
    %c1_i32 = arith.constant 1 : i32
    %c0_33 = arith.constant 0 : index
    %40 = arith.index_cast %c1_i32 : i32 to index
    %c0_34 = arith.constant 0 : index
    %c0_35 = arith.constant 0 : index
    %41 = vector.load %arg1[%c0_33, %40, %c0_34, %c0_35] : memref<1x8x16x128xbf16, #tpu.memory_space<vmem>>, vector<1x1x16x128xbf16>
    %42 = vector.shape_cast %41 : vector<1x1x16x128xbf16> to vector<16x128xbf16>
    %c1_36 = arith.constant 1 : index
    %c0_37 = arith.constant 0 : index
    %43 = vector.load %arg6[%c1_36, %c0_37] : memref<18x256xbf16, #tpu.memory_space<vmem>>, vector<16x128xbf16>
    tpu.vector_store %arg6[%c1_36, %c0_37], %42 {strides = array<i32>} : memref<18x256xbf16, #tpu.memory_space<vmem>>, vector<16x128xbf16>,
    %cst_38 = arith.constant 0.000000e+00 : f32
    %44 = vector.broadcast %cst_38 : f32 to vector<16x128xf32>
    %c0_39 = arith.constant 0 : index
    %c0_40 = arith.constant 0 : index
    %45 = vector.load %arg6[%c0_39, %c0_40] : memref<18x256xbf16, #tpu.memory_space<vmem>>, vector<16x256xbf16>
    %c0_41 = arith.constant 0 : index
    %c0_42 = arith.constant 0 : index
    %c0_43 = arith.constant 0 : index
    %46 = vector.load %arg2[%c0_41, %c0_42, %c0_43] : memref<3x256x128xbf16, #tpu.memory_space<vmem>>, vector<1x256x128xbf16>
    %47 = vector.shape_cast %46 : vector<1x256x128xbf16> to vector<256x128xbf16>
    %cst_44 = arith.constant dense<0.000000e+00> : vector<16x128xf32>
    %48 = tpu.matmul %45, %47, %cst_44 {dimension_numbers = #tpu.dot_dimension_numbers<[1], [0], [0], [1], [0, 0, 1, 1], [], []>} : vector<16x256xbf16>, vector<256x128xbf16>, vector<16x128xf32> -> vector<16x128xf32>
    %49 = arith.addf %44, %48 : vector<16x128xf32>
    %c1_45 = arith.constant 1 : index
    %c0_46 = arith.constant 0 : index
    %50 = vector.load %arg6[%c1_45, %c0_46] : memref<18x256xbf16, #tpu.memory_space<vmem>>, vector<16x256xbf16>
    %c1_47 = arith.constant 1 : index
    %c0_48 = arith.constant 0 : index
    %c0_49 = arith.constant 0 : index
    %51 = vector.load %arg2[%c1_47, %c0_48, %c0_49] : memref<3x256x128xbf16, #tpu.memory_space<vmem>>, vector<1x256x128xbf16>
    %52 = vector.shape_cast %51 : vector<1x256x128xbf16> to vector<256x128xbf16>
    %cst_50 = arith.constant dense<0.000000e+00> : vector<16x128xf32>
    %53 = tpu.matmul %50, %52, %cst_50 {dimension_numbers = #tpu.dot_dimension_numbers<[1], [0], [0], [1], [0, 0, 1, 1], [], []>} : vector<16x256xbf16>, vector<256x128xbf16>, vector<16x128xf32> -> vector<16x128xf32>
    %54 = arith.addf %49, %53 : vector<16x128xf32>
    %c2_51 = arith.constant 2 : index
    %c0_52 = arith.constant 0 : index
    %55 = vector.load %arg6[%c2_51, %c0_52] : memref<18x256xbf16, #tpu.memory_space<vmem>>, vector<16x256xbf16>
    %c2_53 = arith.constant 2 : index
    %c0_54 = arith.constant 0 : index
    %c0_55 = arith.constant 0 : index
    %56 = vector.load %arg2[%c2_53, %c0_54, %c0_55] : memref<3x256x128xbf16, #tpu.memory_space<vmem>>, vector<1x256x128xbf16>
    %57 = vector.shape_cast %56 : vector<1x256x128xbf16> to vector<256x128xbf16>
    %cst_56 = arith.constant dense<0.000000e+00> : vector<16x128xf32>
    %58 = tpu.matmul %55, %57, %cst_56 {dimension_numbers = #tpu.dot_dimension_numbers<[1], [0], [0], [1], [0, 0, 1, 1], [], []>} : vector<16x256xbf16>, vector<256x128xbf16>, vector<16x128xf32> -> vector<16x128xf32>
    %59 = arith.addf %54, %58 : vector<16x128xf32>
    %60 = vector.broadcast %2 : vector<1x128xf32> to vector<16x128xf32>
    %61 = arith.addf %59, %60 : vector<16x128xf32>
    %62 = math.tanh %61 : vector<16x128xf32>
    %63 = arith.truncf %62 : vector<16x128xf32> to vector<16x128xbf16>
    %c1_57 = arith.constant 1 : index
    %c128_58 = arith.constant 128 : index
    %64 = vector.load %arg6[%c1_57, %c128_58] : memref<18x256xbf16, #tpu.memory_space<vmem>>, vector<16x128xbf16>
    tpu.vector_store %arg6[%c1_57, %c128_58], %63 {strides = array<i32>} : memref<18x256xbf16, #tpu.memory_space<vmem>>, vector<16x128xbf16>,
    %c0_59 = arith.constant 0 : index
    %c0_60 = arith.constant 0 : index
    %c0_61 = arith.constant 0 : index
    %65 = vector.load %arg4[%c0_59, %c0_60, %c0_61] : memref<1x16x128xf32, #tpu.memory_space<vmem>>, vector<1x16x128xf32>
    %66 = vector.shape_cast %65 : vector<1x16x128xf32> to vector<16x128xf32>
    %67 = vector.shape_cast %62 : vector<16x128xf32> to vector<1x16x128xf32>
    tpu.vector_store %arg4[%c0_59, %c0_60, %c0_61], %67 {strides = array<i32>} : memref<1x16x128xf32, #tpu.memory_space<vmem>>, vector<1x16x128xf32>,
    %cst_62 = arith.constant dense<0.000000e+00> : vector<128xf32>
    %68 = vector.multi_reduction <add>, %62, %cst_62 [0] : vector<16x128xf32> to vector<128xf32>
    %69 = vector.shape_cast %68 : vector<128xf32> to vector<1x128xf32>
    %70 = arith.addf %35, %69 : vector<1x128xf32>
    %71 = arith.mulf %62, %62 : vector<16x128xf32>
    %cst_63 = arith.constant dense<0.000000e+00> : vector<128xf32>
    %72 = vector.multi_reduction <add>, %71, %cst_63 [0] : vector<16x128xf32> to vector<128xf32>
    %73 = vector.shape_cast %72 : vector<128xf32> to vector<1x128xf32>
    %74 = arith.addf %39, %73 : vector<1x128xf32>
    %c2_i32 = arith.constant 2 : i32
    %c0_64 = arith.constant 0 : index
    %75 = arith.index_cast %c2_i32 : i32 to index
    %c0_65 = arith.constant 0 : index
    %c0_66 = arith.constant 0 : index
    %76 = vector.load %arg1[%c0_64, %75, %c0_65, %c0_66] : memref<1x8x16x128xbf16, #tpu.memory_space<vmem>>, vector<1x1x16x128xbf16>
    %77 = vector.shape_cast %76 : vector<1x1x16x128xbf16> to vector<16x128xbf16>
    %c1_67 = arith.constant 1 : index
    %c0_68 = arith.constant 0 : index
    %78 = vector.load %arg6[%c1_67, %c0_68] : memref<18x256xbf16, #tpu.memory_space<vmem>>, vector<16x128xbf16>
    tpu.vector_store %arg6[%c1_67, %c0_68], %77 {strides = array<i32>} : memref<18x256xbf16, #tpu.memory_space<vmem>>, vector<16x128xbf16>,
    %cst_69 = arith.constant 0.000000e+00 : f32
    %79 = vector.broadcast %cst_69 : f32 to vector<16x128xf32>
    %c0_70 = arith.constant 0 : index
    %c0_71 = arith.constant 0 : index
    %80 = vector.load %arg6[%c0_70, %c0_71] : memref<18x256xbf16, #tpu.memory_space<vmem>>, vector<16x256xbf16>
    %c0_72 = arith.constant 0 : index
    %c0_73 = arith.constant 0 : index
    %c0_74 = arith.constant 0 : index
    %81 = vector.load %arg2[%c0_72, %c0_73, %c0_74] : memref<3x256x128xbf16, #tpu.memory_space<vmem>>, vector<1x256x128xbf16>
    %82 = vector.shape_cast %81 : vector<1x256x128xbf16> to vector<256x128xbf16>
    %cst_75 = arith.constant dense<0.000000e+00> : vector<16x128xf32>
    %83 = tpu.matmul %80, %82, %cst_75 {dimension_numbers = #tpu.dot_dimension_numbers<[1], [0], [0], [1], [0, 0, 1, 1], [], []>} : vector<16x256xbf16>, vector<256x128xbf16>, vector<16x128xf32> -> vector<16x128xf32>
    %84 = arith.addf %79, %83 : vector<16x128xf32>
    %c1_76 = arith.constant 1 : index
    %c0_77 = arith.constant 0 : index
    %85 = vector.load %arg6[%c1_76, %c0_77] : memref<18x256xbf16, #tpu.memory_space<vmem>>, vector<16x256xbf16>
    %c1_78 = arith.constant 1 : index
    %c0_79 = arith.constant 0 : index
    %c0_80 = arith.constant 0 : index
    %86 = vector.load %arg2[%c1_78, %c0_79, %c0_80] : memref<3x256x128xbf16, #tpu.memory_space<vmem>>, vector<1x256x128xbf16>
    %87 = vector.shape_cast %86 : vector<1x256x128xbf16> to vector<256x128xbf16>
    %cst_81 = arith.constant dense<0.000000e+00> : vector<16x128xf32>
    %88 = tpu.matmul %85, %87, %cst_81 {dimension_numbers = #tpu.dot_dimension_numbers<[1], [0], [0], [1], [0, 0, 1, 1], [], []>} : vector<16x256xbf16>, vector<256x128xbf16>, vector<16x128xf32> -> vector<16x128xf32>
    %89 = arith.addf %84, %88 : vector<16x128xf32>
    %c2_82 = arith.constant 2 : index
    %c0_83 = arith.constant 0 : index
    %90 = vector.load %arg6[%c2_82, %c0_83] : memref<18x256xbf16, #tpu.memory_space<vmem>>, vector<16x256xbf16>
    %c2_84 = arith.constant 2 : index
    %c0_85 = arith.constant 0 : index
    %c0_86 = arith.constant 0 : index
    %91 = vector.load %arg2[%c2_84, %c0_85, %c0_86] : memref<3x256x128xbf16, #tpu.memory_space<vmem>>, vector<1x256x128xbf16>
    %92 = vector.shape_cast %91 : vector<1x256x128xbf16> to vector<256x128xbf16>
    %cst_87 = arith.constant dense<0.000000e+00> : vector<16x128xf32>
    %93 = tpu.matmul %90, %92, %cst_87 {dimension_numbers = #tpu.dot_dimension_numbers<[1], [0], [0], [1], [0, 0, 1, 1], [], []>} : vector<16x256xbf16>, vector<256x128xbf16>, vector<16x128xf32> -> vector<16x128xf32>
    %94 = arith.addf %89, %93 : vector<16x128xf32>
    %95 = vector.broadcast %2 : vector<1x128xf32> to vector<16x128xf32>
    %96 = arith.addf %94, %95 : vector<16x128xf32>
    %97 = math.tanh %96 : vector<16x128xf32>
    %98 = arith.truncf %97 : vector<16x128xf32> to vector<16x128xbf16>
    %c1_88 = arith.constant 1 : index
    %c128_89 = arith.constant 128 : index
    %99 = vector.load %arg6[%c1_88, %c128_89] : memref<18x256xbf16, #tpu.memory_space<vmem>>, vector<16x128xbf16>
    tpu.vector_store %arg6[%c1_88, %c128_89], %98 {strides = array<i32>} : memref<18x256xbf16, #tpu.memory_space<vmem>>, vector<16x128xbf16>,
    %c0_90 = arith.constant 0 : index
    %c0_91 = arith.constant 0 : index
    %c0_92 = arith.constant 0 : index
    %100 = vector.load %arg4[%c0_90, %c0_91, %c0_92] : memref<1x16x128xf32, #tpu.memory_space<vmem>>, vector<1x16x128xf32>
    %101 = vector.shape_cast %100 : vector<1x16x128xf32> to vector<16x128xf32>
    %102 = vector.shape_cast %97 : vector<16x128xf32> to vector<1x16x128xf32>
    tpu.vector_store %arg4[%c0_90, %c0_91, %c0_92], %102 {strides = array<i32>} : memref<1x16x128xf32, #tpu.memory_space<vmem>>, vector<1x16x128xf32>,
    %cst_93 = arith.constant dense<0.000000e+00> : vector<128xf32>
    %103 = vector.multi_reduction <add>, %97, %cst_93 [0] : vector<16x128xf32> to vector<128xf32>
    %104 = vector.shape_cast %103 : vector<128xf32> to vector<1x128xf32>
    %105 = arith.addf %70, %104 : vector<1x128xf32>
    %106 = arith.mulf %97, %97 : vector<16x128xf32>
    %cst_94 = arith.constant dense<0.000000e+00> : vector<128xf32>
    %107 = vector.multi_reduction <add>, %106, %cst_94 [0] : vector<16x128xf32> to vector<128xf32>
    %108 = vector.shape_cast %107 : vector<128xf32> to vector<1x128xf32>
    %109 = arith.addf %74, %108 : vector<1x128xf32>
    %c3_i32 = arith.constant 3 : i32
    %c0_95 = arith.constant 0 : index
    %110 = arith.index_cast %c3_i32 : i32 to index
    %c0_96 = arith.constant 0 : index
    %c0_97 = arith.constant 0 : index
    %111 = vector.load %arg1[%c0_95, %110, %c0_96, %c0_97] : memref<1x8x16x128xbf16, #tpu.memory_space<vmem>>, vector<1x1x16x128xbf16>
    %112 = vector.shape_cast %111 : vector<1x1x16x128xbf16> to vector<16x128xbf16>
    %c1_98 = arith.constant 1 : index
    %c0_99 = arith.constant 0 : index
    %113 = vector.load %arg6[%c1_98, %c0_99] : memref<18x256xbf16, #tpu.memory_space<vmem>>, vector<16x128xbf16>
    tpu.vector_store %arg6[%c1_98, %c0_99], %112 {strides = array<i32>} : memref<18x256xbf16, #tpu.memory_space<vmem>>, vector<16x128xbf16>,
    %cst_100 = arith.constant 0.000000e+00 : f32
    %114 = vector.broadcast %cst_100 : f32 to vector<16x128xf32>
    %c0_101 = arith.constant 0 : index
    %c0_102 = arith.constant 0 : index
    %115 = vector.load %arg6[%c0_101, %c0_102] : memref<18x256xbf16, #tpu.memory_space<vmem>>, vector<16x256xbf16>
    %c0_103 = arith.constant 0 : index
    %c0_104 = arith.constant 0 : index
    %c0_105 = arith.constant 0 : index
    %116 = vector.load %arg2[%c0_103, %c0_104, %c0_105] : memref<3x256x128xbf16, #tpu.memory_space<vmem>>, vector<1x256x128xbf16>
    %117 = vector.shape_cast %116 : vector<1x256x128xbf16> to vector<256x128xbf16>
    %cst_106 = arith.constant dense<0.000000e+00> : vector<16x128xf32>
    %118 = tpu.matmul %115, %117, %cst_106 {dimension_numbers = #tpu.dot_dimension_numbers<[1], [0], [0], [1], [0, 0, 1, 1], [], []>} : vector<16x256xbf16>, vector<256x128xbf16>, vector<16x128xf32> -> vector<16x128xf32>
    %119 = arith.addf %114, %118 : vector<16x128xf32>
    %c1_107 = arith.constant 1 : index
    %c0_108 = arith.constant 0 : index
    %120 = vector.load %arg6[%c1_107, %c0_108] : memref<18x256xbf16, #tpu.memory_space<vmem>>, vector<16x256xbf16>
    %c1_109 = arith.constant 1 : index
    %c0_110 = arith.constant 0 : index
    %c0_111 = arith.constant 0 : index
    %121 = vector.load %arg2[%c1_109, %c0_110, %c0_111] : memref<3x256x128xbf16, #tpu.memory_space<vmem>>, vector<1x256x128xbf16>
    %122 = vector.shape_cast %121 : vector<1x256x128xbf16> to vector<256x128xbf16>
    %cst_112 = arith.constant dense<0.000000e+00> : vector<16x128xf32>
    %123 = tpu.matmul %120, %122, %cst_112 {dimension_numbers = #tpu.dot_dimension_numbers<[1], [0], [0], [1], [0, 0, 1, 1], [], []>} : vector<16x256xbf16>, vector<256x128xbf16>, vector<16x128xf32> -> vector<16x128xf32>
    %124 = arith.addf %119, %123 : vector<16x128xf32>
    %c2_113 = arith.constant 2 : index
    %c0_114 = arith.constant 0 : index
    %125 = vector.load %arg6[%c2_113, %c0_114] : memref<18x256xbf16, #tpu.memory_space<vmem>>, vector<16x256xbf16>
    %c2_115 = arith.constant 2 : index
    %c0_116 = arith.constant 0 : index
    %c0_117 = arith.constant 0 : index
    %126 = vector.load %arg2[%c2_115, %c0_116, %c0_117] : memref<3x256x128xbf16, #tpu.memory_space<vmem>>, vector<1x256x128xbf16>
    %127 = vector.shape_cast %126 : vector<1x256x128xbf16> to vector<256x128xbf16>
    %cst_118 = arith.constant dense<0.000000e+00> : vector<16x128xf32>
    %128 = tpu.matmul %125, %127, %cst_118 {dimension_numbers = #tpu.dot_dimension_numbers<[1], [0], [0], [1], [0, 0, 1, 1], [], []>} : vector<16x256xbf16>, vector<256x128xbf16>, vector<16x128xf32> -> vector<16x128xf32>
    %129 = arith.addf %124, %128 : vector<16x128xf32>
    %130 = vector.broadcast %2 : vector<1x128xf32> to vector<16x128xf32>
    %131 = arith.addf %129, %130 : vector<16x128xf32>
    %132 = math.tanh %131 : vector<16x128xf32>
    %133 = arith.truncf %132 : vector<16x128xf32> to vector<16x128xbf16>
    %c1_119 = arith.constant 1 : index
    %c128_120 = arith.constant 128 : index
    %134 = vector.load %arg6[%c1_119, %c128_120] : memref<18x256xbf16, #tpu.memory_space<vmem>>, vector<16x128xbf16>
    tpu.vector_store %arg6[%c1_119, %c128_120], %133 {strides = array<i32>} : memref<18x256xbf16, #tpu.memory_space<vmem>>, vector<16x128xbf16>,
    %c0_121 = arith.constant 0 : index
    %c0_122 = arith.constant 0 : index
    %c0_123 = arith.constant 0 : index
    %135 = vector.load %arg4[%c0_121, %c0_122, %c0_123] : memref<1x16x128xf32, #tpu.memory_space<vmem>>, vector<1x16x128xf32>
    %136 = vector.shape_cast %135 : vector<1x16x128xf32> to vector<16x128xf32>
    %137 = vector.shape_cast %132 : vector<16x128xf32> to vector<1x16x128xf32>
    tpu.vector_store %arg4[%c0_121, %c0_122, %c0_123], %137 {strides = array<i32>} : memref<1x16x128xf32, #tpu.memory_space<vmem>>, vector<1x16x128xf32>,
    %cst_124 = arith.constant dense<0.000000e+00> : vector<128xf32>
    %138 = vector.multi_reduction <add>, %132, %cst_124 [0] : vector<16x128xf32> to vector<128xf32>
    %139 = vector.shape_cast %138 : vector<128xf32> to vector<1x128xf32>
    %140 = arith.addf %105, %139 : vector<1x128xf32>
    %141 = arith.mulf %132, %132 : vector<16x128xf32>
    %cst_125 = arith.constant dense<0.000000e+00> : vector<128xf32>
    %142 = vector.multi_reduction <add>, %141, %cst_125 [0] : vector<16x128xf32> to vector<128xf32>
    %143 = vector.shape_cast %142 : vector<128xf32> to vector<1x128xf32>
    %144 = arith.addf %109, %143 : vector<1x128xf32>
    %c4_i32 = arith.constant 4 : i32
    %c0_126 = arith.constant 0 : index
    %145 = arith.index_cast %c4_i32 : i32 to index
    %c0_127 = arith.constant 0 : index
    %c0_128 = arith.constant 0 : index
    %146 = vector.load %arg1[%c0_126, %145, %c0_127, %c0_128] : memref<1x8x16x128xbf16, #tpu.memory_space<vmem>>, vector<1x1x16x128xbf16>
    %147 = vector.shape_cast %146 : vector<1x1x16x128xbf16> to vector<16x128xbf16>
    %c1_129 = arith.constant 1 : index
    %c0_130 = arith.constant 0 : index
    %148 = vector.load %arg6[%c1_129, %c0_130] : memref<18x256xbf16, #tpu.memory_space<vmem>>, vector<16x128xbf16>
    tpu.vector_store %arg6[%c1_129, %c0_130], %147 {strides = array<i32>} : memref<18x256xbf16, #tpu.memory_space<vmem>>, vector<16x128xbf16>,
    %cst_131 = arith.constant 0.000000e+00 : f32
    %149 = vector.broadcast %cst_131 : f32 to vector<16x128xf32>
    %c0_132 = arith.constant 0 : index
    %c0_133 = arith.constant 0 : index
    %150 = vector.load %arg6[%c0_132, %c0_133] : memref<18x256xbf16, #tpu.memory_space<vmem>>, vector<16x256xbf16>
    %c0_134 = arith.constant 0 : index
    %c0_135 = arith.constant 0 : index
    %c0_136 = arith.constant 0 : index
    %151 = vector.load %arg2[%c0_134, %c0_135, %c0_136] : memref<3x256x128xbf16, #tpu.memory_space<vmem>>, vector<1x256x128xbf16>
    %152 = vector.shape_cast %151 : vector<1x256x128xbf16> to vector<256x128xbf16>
    %cst_137 = arith.constant dense<0.000000e+00> : vector<16x128xf32>
    %153 = tpu.matmul %150, %152, %cst_137 {dimension_numbers = #tpu.dot_dimension_numbers<[1], [0], [0], [1], [0, 0, 1, 1], [], []>} : vector<16x256xbf16>, vector<256x128xbf16>, vector<16x128xf32> -> vector<16x128xf32>
    %154 = arith.addf %149, %153 : vector<16x128xf32>
    %c1_138 = arith.constant 1 : index
    %c0_139 = arith.constant 0 : index
    %155 = vector.load %arg6[%c1_138, %c0_139] : memref<18x256xbf16, #tpu.memory_space<vmem>>, vector<16x256xbf16>
    %c1_140 = arith.constant 1 : index
    %c0_141 = arith.constant 0 : index
    %c0_142 = arith.constant 0 : index
    %156 = vector.load %arg2[%c1_140, %c0_141, %c0_142] : memref<3x256x128xbf16, #tpu.memory_space<vmem>>, vector<1x256x128xbf16>
    %157 = vector.shape_cast %156 : vector<1x256x128xbf16> to vector<256x128xbf16>
    %cst_143 = arith.constant dense<0.000000e+00> : vector<16x128xf32>
    %158 = tpu.matmul %155, %157, %cst_143 {dimension_numbers = #tpu.dot_dimension_numbers<[1], [0], [0], [1], [0, 0, 1, 1], [], []>} : vector<16x256xbf16>, vector<256x128xbf16>, vector<16x128xf32> -> vector<16x128xf32>
    %159 = arith.addf %154, %158 : vector<16x128xf32>
    %c2_144 = arith.constant 2 : index
    %c0_145 = arith.constant 0 : index
    %160 = vector.load %arg6[%c2_144, %c0_145] : memref<18x256xbf16, #tpu.memory_space<vmem>>, vector<16x256xbf16>
    %c2_146 = arith.constant 2 : index
    %c0_147 = arith.constant 0 : index
    %c0_148 = arith.constant 0 : index
    %161 = vector.load %arg2[%c2_146, %c0_147, %c0_148] : memref<3x256x128xbf16, #tpu.memory_space<vmem>>, vector<1x256x128xbf16>
    %162 = vector.shape_cast %161 : vector<1x256x128xbf16> to vector<256x128xbf16>
    %cst_149 = arith.constant dense<0.000000e+00> : vector<16x128xf32>
    %163 = tpu.matmul %160, %162, %cst_149 {dimension_numbers = #tpu.dot_dimension_numbers<[1], [0], [0], [1], [0, 0, 1, 1], [], []>} : vector<16x256xbf16>, vector<256x128xbf16>, vector<16x128xf32> -> vector<16x128xf32>
    %164 = arith.addf %159, %163 : vector<16x128xf32>
    %165 = vector.broadcast %2 : vector<1x128xf32> to vector<16x128xf32>
    %166 = arith.addf %164, %165 : vector<16x128xf32>
    %167 = math.tanh %166 : vector<16x128xf32>
    %168 = arith.truncf %167 : vector<16x128xf32> to vector<16x128xbf16>
    %c1_150 = arith.constant 1 : index
    %c128_151 = arith.constant 128 : index
    %169 = vector.load %arg6[%c1_150, %c128_151] : memref<18x256xbf16, #tpu.memory_space<vmem>>, vector<16x128xbf16>
    tpu.vector_store %arg6[%c1_150, %c128_151], %168 {strides = array<i32>} : memref<18x256xbf16, #tpu.memory_space<vmem>>, vector<16x128xbf16>,
    %c0_152 = arith.constant 0 : index
    %c0_153 = arith.constant 0 : index
    %c0_154 = arith.constant 0 : index
    %170 = vector.load %arg4[%c0_152, %c0_153, %c0_154] : memref<1x16x128xf32, #tpu.memory_space<vmem>>, vector<1x16x128xf32>
    %171 = vector.shape_cast %170 : vector<1x16x128xf32> to vector<16x128xf32>
    %172 = vector.shape_cast %167 : vector<16x128xf32> to vector<1x16x128xf32>
    tpu.vector_store %arg4[%c0_152, %c0_153, %c0_154], %172 {strides = array<i32>} : memref<1x16x128xf32, #tpu.memory_space<vmem>>, vector<1x16x128xf32>,
    %cst_155 = arith.constant dense<0.000000e+00> : vector<128xf32>
    %173 = vector.multi_reduction <add>, %167, %cst_155 [0] : vector<16x128xf32> to vector<128xf32>
    %174 = vector.shape_cast %173 : vector<128xf32> to vector<1x128xf32>
    %175 = arith.addf %140, %174 : vector<1x128xf32>
    %176 = arith.mulf %167, %167 : vector<16x128xf32>
    %cst_156 = arith.constant dense<0.000000e+00> : vector<128xf32>
    %177 = vector.multi_reduction <add>, %176, %cst_156 [0] : vector<16x128xf32> to vector<128xf32>
    %178 = vector.shape_cast %177 : vector<128xf32> to vector<1x128xf32>
    %179 = arith.addf %144, %178 : vector<1x128xf32>
    %c5_i32 = arith.constant 5 : i32
    %c0_157 = arith.constant 0 : index
    %180 = arith.index_cast %c5_i32 : i32 to index
    %c0_158 = arith.constant 0 : index
    %c0_159 = arith.constant 0 : index
    %181 = vector.load %arg1[%c0_157, %180, %c0_158, %c0_159] : memref<1x8x16x128xbf16, #tpu.memory_space<vmem>>, vector<1x1x16x128xbf16>
    %182 = vector.shape_cast %181 : vector<1x1x16x128xbf16> to vector<16x128xbf16>
    %c1_160 = arith.constant 1 : index
    %c0_161 = arith.constant 0 : index
    %183 = vector.load %arg6[%c1_160, %c0_161] : memref<18x256xbf16, #tpu.memory_space<vmem>>, vector<16x128xbf16>
    tpu.vector_store %arg6[%c1_160, %c0_161], %182 {strides = array<i32>} : memref<18x256xbf16, #tpu.memory_space<vmem>>, vector<16x128xbf16>,
    %cst_162 = arith.constant 0.000000e+00 : f32
    %184 = vector.broadcast %cst_162 : f32 to vector<16x128xf32>
    %c0_163 = arith.constant 0 : index
    %c0_164 = arith.constant 0 : index
    %185 = vector.load %arg6[%c0_163, %c0_164] : memref<18x256xbf16, #tpu.memory_space<vmem>>, vector<16x256xbf16>
    %c0_165 = arith.constant 0 : index
    %c0_166 = arith.constant 0 : index
    %c0_167 = arith.constant 0 : index
    %186 = vector.load %arg2[%c0_165, %c0_166, %c0_167] : memref<3x256x128xbf16, #tpu.memory_space<vmem>>, vector<1x256x128xbf16>
    %187 = vector.shape_cast %186 : vector<1x256x128xbf16> to vector<256x128xbf16>
    %cst_168 = arith.constant dense<0.000000e+00> : vector<16x128xf32>
    %188 = tpu.matmul %185, %187, %cst_168 {dimension_numbers = #tpu.dot_dimension_numbers<[1], [0], [0], [1], [0, 0, 1, 1], [], []>} : vector<16x256xbf16>, vector<256x128xbf16>, vector<16x128xf32> -> vector<16x128xf32>
    %189 = arith.addf %184, %188 : vector<16x128xf32>
    %c1_169 = arith.constant 1 : index
    %c0_170 = arith.constant 0 : index
    %190 = vector.load %arg6[%c1_169, %c0_170] : memref<18x256xbf16, #tpu.memory_space<vmem>>, vector<16x256xbf16>
    %c1_171 = arith.constant 1 : index
    %c0_172 = arith.constant 0 : index
    %c0_173 = arith.constant 0 : index
    %191 = vector.load %arg2[%c1_171, %c0_172, %c0_173] : memref<3x256x128xbf16, #tpu.memory_space<vmem>>, vector<1x256x128xbf16>
    %192 = vector.shape_cast %191 : vector<1x256x128xbf16> to vector<256x128xbf16>
    %cst_174 = arith.constant dense<0.000000e+00> : vector<16x128xf32>
    %193 = tpu.matmul %190, %192, %cst_174 {dimension_numbers = #tpu.dot_dimension_numbers<[1], [0], [0], [1], [0, 0, 1, 1], [], []>} : vector<16x256xbf16>, vector<256x128xbf16>, vector<16x128xf32> -> vector<16x128xf32>
    %194 = arith.addf %189, %193 : vector<16x128xf32>
    %c2_175 = arith.constant 2 : index
    %c0_176 = arith.constant 0 : index
    %195 = vector.load %arg6[%c2_175, %c0_176] : memref<18x256xbf16, #tpu.memory_space<vmem>>, vector<16x256xbf16>
    %c2_177 = arith.constant 2 : index
    %c0_178 = arith.constant 0 : index
    %c0_179 = arith.constant 0 : index
    %196 = vector.load %arg2[%c2_177, %c0_178, %c0_179] : memref<3x256x128xbf16, #tpu.memory_space<vmem>>, vector<1x256x128xbf16>
    %197 = vector.shape_cast %196 : vector<1x256x128xbf16> to vector<256x128xbf16>
    %cst_180 = arith.constant dense<0.000000e+00> : vector<16x128xf32>
    %198 = tpu.matmul %195, %197, %cst_180 {dimension_numbers = #tpu.dot_dimension_numbers<[1], [0], [0], [1], [0, 0, 1, 1], [], []>} : vector<16x256xbf16>, vector<256x128xbf16>, vector<16x128xf32> -> vector<16x128xf32>
    %199 = arith.addf %194, %198 : vector<16x128xf32>
    %200 = vector.broadcast %2 : vector<1x128xf32> to vector<16x128xf32>
    %201 = arith.addf %199, %200 : vector<16x128xf32>
    %202 = math.tanh %201 : vector<16x128xf32>
    %203 = arith.truncf %202 : vector<16x128xf32> to vector<16x128xbf16>
    %c1_181 = arith.constant 1 : index
    %c128_182 = arith.constant 128 : index
    %204 = vector.load %arg6[%c1_181, %c128_182] : memref<18x256xbf16, #tpu.memory_space<vmem>>, vector<16x128xbf16>
    tpu.vector_store %arg6[%c1_181, %c128_182], %203 {strides = array<i32>} : memref<18x256xbf16, #tpu.memory_space<vmem>>, vector<16x128xbf16>,
    %c0_183 = arith.constant 0 : index
    %c0_184 = arith.constant 0 : index
    %c0_185 = arith.constant 0 : index
    %205 = vector.load %arg4[%c0_183, %c0_184, %c0_185] : memref<1x16x128xf32, #tpu.memory_space<vmem>>, vector<1x16x128xf32>
    %206 = vector.shape_cast %205 : vector<1x16x128xf32> to vector<16x128xf32>
    %207 = vector.shape_cast %202 : vector<16x128xf32> to vector<1x16x128xf32>
    tpu.vector_store %arg4[%c0_183, %c0_184, %c0_185], %207 {strides = array<i32>} : memref<1x16x128xf32, #tpu.memory_space<vmem>>, vector<1x16x128xf32>,
    %cst_186 = arith.constant dense<0.000000e+00> : vector<128xf32>
    %208 = vector.multi_reduction <add>, %202, %cst_186 [0] : vector<16x128xf32> to vector<128xf32>
    %209 = vector.shape_cast %208 : vector<128xf32> to vector<1x128xf32>
    %210 = arith.addf %175, %209 : vector<1x128xf32>
    %211 = arith.mulf %202, %202 : vector<16x128xf32>
    %cst_187 = arith.constant dense<0.000000e+00> : vector<128xf32>
    %212 = vector.multi_reduction <add>, %211, %cst_187 [0] : vector<16x128xf32> to vector<128xf32>
    %213 = vector.shape_cast %212 : vector<128xf32> to vector<1x128xf32>
    %214 = arith.addf %179, %213 : vector<1x128xf32>
    %c6_i32 = arith.constant 6 : i32
    %c0_188 = arith.constant 0 : index
    %215 = arith.index_cast %c6_i32 : i32 to index
    %c0_189 = arith.constant 0 : index
    %c0_190 = arith.constant 0 : index
    %216 = vector.load %arg1[%c0_188, %215, %c0_189, %c0_190] : memref<1x8x16x128xbf16, #tpu.memory_space<vmem>>, vector<1x1x16x128xbf16>
    %217 = vector.shape_cast %216 : vector<1x1x16x128xbf16> to vector<16x128xbf16>
    %c1_191 = arith.constant 1 : index
    %c0_192 = arith.constant 0 : index
    %218 = vector.load %arg6[%c1_191, %c0_192] : memref<18x256xbf16, #tpu.memory_space<vmem>>, vector<16x128xbf16>
    tpu.vector_store %arg6[%c1_191, %c0_192], %217 {strides = array<i32>} : memref<18x256xbf16, #tpu.memory_space<vmem>>, vector<16x128xbf16>,
    %cst_193 = arith.constant 0.000000e+00 : f32
    %219 = vector.broadcast %cst_193 : f32 to vector<16x128xf32>
    %c0_194 = arith.constant 0 : index
    %c0_195 = arith.constant 0 : index
    %220 = vector.load %arg6[%c0_194, %c0_195] : memref<18x256xbf16, #tpu.memory_space<vmem>>, vector<16x256xbf16>
    %c0_196 = arith.constant 0 : index
    %c0_197 = arith.constant 0 : index
    %c0_198 = arith.constant 0 : index
    %221 = vector.load %arg2[%c0_196, %c0_197, %c0_198] : memref<3x256x128xbf16, #tpu.memory_space<vmem>>, vector<1x256x128xbf16>
    %222 = vector.shape_cast %221 : vector<1x256x128xbf16> to vector<256x128xbf16>
    %cst_199 = arith.constant dense<0.000000e+00> : vector<16x128xf32>
    %223 = tpu.matmul %220, %222, %cst_199 {dimension_numbers = #tpu.dot_dimension_numbers<[1], [0], [0], [1], [0, 0, 1, 1], [], []>} : vector<16x256xbf16>, vector<256x128xbf16>, vector<16x128xf32> -> vector<16x128xf32>
    %224 = arith.addf %219, %223 : vector<16x128xf32>
    %c1_200 = arith.constant 1 : index
    %c0_201 = arith.constant 0 : index
    %225 = vector.load %arg6[%c1_200, %c0_201] : memref<18x256xbf16, #tpu.memory_space<vmem>>, vector<16x256xbf16>
    %c1_202 = arith.constant 1 : index
    %c0_203 = arith.constant 0 : index
    %c0_204 = arith.constant 0 : index
    %226 = vector.load %arg2[%c1_202, %c0_203, %c0_204] : memref<3x256x128xbf16, #tpu.memory_space<vmem>>, vector<1x256x128xbf16>
    %227 = vector.shape_cast %226 : vector<1x256x128xbf16> to vector<256x128xbf16>
    %cst_205 = arith.constant dense<0.000000e+00> : vector<16x128xf32>
    %228 = tpu.matmul %225, %227, %cst_205 {dimension_numbers = #tpu.dot_dimension_numbers<[1], [0], [0], [1], [0, 0, 1, 1], [], []>} : vector<16x256xbf16>, vector<256x128xbf16>, vector<16x128xf32> -> vector<16x128xf32>
    %229 = arith.addf %224, %228 : vector<16x128xf32>
    %c2_206 = arith.constant 2 : index
    %c0_207 = arith.constant 0 : index
    %230 = vector.load %arg6[%c2_206, %c0_207] : memref<18x256xbf16, #tpu.memory_space<vmem>>, vector<16x256xbf16>
    %c2_208 = arith.constant 2 : index
    %c0_209 = arith.constant 0 : index
    %c0_210 = arith.constant 0 : index
    %231 = vector.load %arg2[%c2_208, %c0_209, %c0_210] : memref<3x256x128xbf16, #tpu.memory_space<vmem>>, vector<1x256x128xbf16>
    %232 = vector.shape_cast %231 : vector<1x256x128xbf16> to vector<256x128xbf16>
    %cst_211 = arith.constant dense<0.000000e+00> : vector<16x128xf32>
    %233 = tpu.matmul %230, %232, %cst_211 {dimension_numbers = #tpu.dot_dimension_numbers<[1], [0], [0], [1], [0, 0, 1, 1], [], []>} : vector<16x256xbf16>, vector<256x128xbf16>, vector<16x128xf32> -> vector<16x128xf32>
    %234 = arith.addf %229, %233 : vector<16x128xf32>
    %235 = vector.broadcast %2 : vector<1x128xf32> to vector<16x128xf32>
    %236 = arith.addf %234, %235 : vector<16x128xf32>
    %237 = math.tanh %236 : vector<16x128xf32>
    %238 = arith.truncf %237 : vector<16x128xf32> to vector<16x128xbf16>
    %c1_212 = arith.constant 1 : index
    %c128_213 = arith.constant 128 : index
    %239 = vector.load %arg6[%c1_212, %c128_213] : memref<18x256xbf16, #tpu.memory_space<vmem>>, vector<16x128xbf16>
    tpu.vector_store %arg6[%c1_212, %c128_213], %238 {strides = array<i32>} : memref<18x256xbf16, #tpu.memory_space<vmem>>, vector<16x128xbf16>,
    %c0_214 = arith.constant 0 : index
    %c0_215 = arith.constant 0 : index
    %c0_216 = arith.constant 0 : index
    %240 = vector.load %arg4[%c0_214, %c0_215, %c0_216] : memref<1x16x128xf32, #tpu.memory_space<vmem>>, vector<1x16x128xf32>
    %241 = vector.shape_cast %240 : vector<1x16x128xf32> to vector<16x128xf32>
    %242 = vector.shape_cast %237 : vector<16x128xf32> to vector<1x16x128xf32>
    tpu.vector_store %arg4[%c0_214, %c0_215, %c0_216], %242 {strides = array<i32>} : memref<1x16x128xf32, #tpu.memory_space<vmem>>, vector<1x16x128xf32>,
    %cst_217 = arith.constant dense<0.000000e+00> : vector<128xf32>
    %243 = vector.multi_reduction <add>, %237, %cst_217 [0] : vector<16x128xf32> to vector<128xf32>
    %244 = vector.shape_cast %243 : vector<128xf32> to vector<1x128xf32>
    %245 = arith.addf %210, %244 : vector<1x128xf32>
    %246 = arith.mulf %237, %237 : vector<16x128xf32>
    %cst_218 = arith.constant dense<0.000000e+00> : vector<128xf32>
    %247 = vector.multi_reduction <add>, %246, %cst_218 [0] : vector<16x128xf32> to vector<128xf32>
    %248 = vector.shape_cast %247 : vector<128xf32> to vector<1x128xf32>
    %249 = arith.addf %214, %248 : vector<1x128xf32>
    %c7_i32 = arith.constant 7 : i32
    %c0_219 = arith.constant 0 : index
    %250 = arith.index_cast %c7_i32 : i32 to index
    %c0_220 = arith.constant 0 : index
    %c0_221 = arith.constant 0 : index
    %251 = vector.load %arg1[%c0_219, %250, %c0_220, %c0_221] : memref<1x8x16x128xbf16, #tpu.memory_space<vmem>>, vector<1x1x16x128xbf16>
    %252 = vector.shape_cast %251 : vector<1x1x16x128xbf16> to vector<16x128xbf16>
    %c1_222 = arith.constant 1 : index
    %c0_223 = arith.constant 0 : index
    %253 = vector.load %arg6[%c1_222, %c0_223] : memref<18x256xbf16, #tpu.memory_space<vmem>>, vector<16x128xbf16>
    tpu.vector_store %arg6[%c1_222, %c0_223], %252 {strides = array<i32>} : memref<18x256xbf16, #tpu.memory_space<vmem>>, vector<16x128xbf16>,
    %cst_224 = arith.constant 0.000000e+00 : f32
    %254 = vector.broadcast %cst_224 : f32 to vector<16x128xf32>
    %c0_225 = arith.constant 0 : index
    %c0_226 = arith.constant 0 : index
    %255 = vector.load %arg6[%c0_225, %c0_226] : memref<18x256xbf16, #tpu.memory_space<vmem>>, vector<16x256xbf16>
    %c0_227 = arith.constant 0 : index
    %c0_228 = arith.constant 0 : index
    %c0_229 = arith.constant 0 : index
    %256 = vector.load %arg2[%c0_227, %c0_228, %c0_229] : memref<3x256x128xbf16, #tpu.memory_space<vmem>>, vector<1x256x128xbf16>
    %257 = vector.shape_cast %256 : vector<1x256x128xbf16> to vector<256x128xbf16>
    %cst_230 = arith.constant dense<0.000000e+00> : vector<16x128xf32>
    %258 = tpu.matmul %255, %257, %cst_230 {dimension_numbers = #tpu.dot_dimension_numbers<[1], [0], [0], [1], [0, 0, 1, 1], [], []>} : vector<16x256xbf16>, vector<256x128xbf16>, vector<16x128xf32> -> vector<16x128xf32>
    %259 = arith.addf %254, %258 : vector<16x128xf32>
    %c1_231 = arith.constant 1 : index
    %c0_232 = arith.constant 0 : index
    %260 = vector.load %arg6[%c1_231, %c0_232] : memref<18x256xbf16, #tpu.memory_space<vmem>>, vector<16x256xbf16>
    %c1_233 = arith.constant 1 : index
    %c0_234 = arith.constant 0 : index
    %c0_235 = arith.constant 0 : index
    %261 = vector.load %arg2[%c1_233, %c0_234, %c0_235] : memref<3x256x128xbf16, #tpu.memory_space<vmem>>, vector<1x256x128xbf16>
    %262 = vector.shape_cast %261 : vector<1x256x128xbf16> to vector<256x128xbf16>
    %cst_236 = arith.constant dense<0.000000e+00> : vector<16x128xf32>
    %263 = tpu.matmul %260, %262, %cst_236 {dimension_numbers = #tpu.dot_dimension_numbers<[1], [0], [0], [1], [0, 0, 1, 1], [], []>} : vector<16x256xbf16>, vector<256x128xbf16>, vector<16x128xf32> -> vector<16x128xf32>
    %264 = arith.addf %259, %263 : vector<16x128xf32>
    %c2_237 = arith.constant 2 : index
    %c0_238 = arith.constant 0 : index
    %265 = vector.load %arg6[%c2_237, %c0_238] : memref<18x256xbf16, #tpu.memory_space<vmem>>, vector<16x256xbf16>
    %c2_239 = arith.constant 2 : index
    %c0_240 = arith.constant 0 : index
    %c0_241 = arith.constant 0 : index
    %266 = vector.load %arg2[%c2_239, %c0_240, %c0_241] : memref<3x256x128xbf16, #tpu.memory_space<vmem>>, vector<1x256x128xbf16>
    %267 = vector.shape_cast %266 : vector<1x256x128xbf16> to vector<256x128xbf16>
    %cst_242 = arith.constant dense<0.000000e+00> : vector<16x128xf32>
    %268 = tpu.matmul %265, %267, %cst_242 {dimension_numbers = #tpu.dot_dimension_numbers<[1], [0], [0], [1], [0, 0, 1, 1], [], []>} : vector<16x256xbf16>, vector<256x128xbf16>, vector<16x128xf32> -> vector<16x128xf32>
    %269 = arith.addf %264, %268 : vector<16x128xf32>
    %270 = vector.broadcast %2 : vector<1x128xf32> to vector<16x128xf32>
    %271 = arith.addf %269, %270 : vector<16x128xf32>
    %272 = math.tanh %271 : vector<16x128xf32>
    %273 = arith.truncf %272 : vector<16x128xf32> to vector<16x128xbf16>
    %c1_243 = arith.constant 1 : index
    %c128_244 = arith.constant 128 : index
    %274 = vector.load %arg6[%c1_243, %c128_244] : memref<18x256xbf16, #tpu.memory_space<vmem>>, vector<16x128xbf16>
    tpu.vector_store %arg6[%c1_243, %c128_244], %273 {strides = array<i32>} : memref<18x256xbf16, #tpu.memory_space<vmem>>, vector<16x128xbf16>,
    %c0_245 = arith.constant 0 : index
    %c0_246 = arith.constant 0 : index
    %c0_247 = arith.constant 0 : index
    %275 = vector.load %arg4[%c0_245, %c0_246, %c0_247] : memref<1x16x128xf32, #tpu.memory_space<vmem>>, vector<1x16x128xf32>
    %276 = vector.shape_cast %275 : vector<1x16x128xf32> to vector<16x128xf32>
    %277 = vector.shape_cast %272 : vector<16x128xf32> to vector<1x16x128xf32>
    tpu.vector_store %arg4[%c0_245, %c0_246, %c0_247], %277 {strides = array<i32>} : memref<1x16x128xf32, #tpu.memory_space<vmem>>, vector<1x16x128xf32>,
    %cst_248 = arith.constant dense<0.000000e+00> : vector<128xf32>
    %278 = vector.multi_reduction <add>, %272, %cst_248 [0] : vector<16x128xf32> to vector<128xf32>
    %279 = vector.shape_cast %278 : vector<128xf32> to vector<1x128xf32>
    %280 = arith.addf %245, %279 : vector<1x128xf32>
    %281 = arith.mulf %272, %272 : vector<16x128xf32>
    %cst_249 = arith.constant dense<0.000000e+00> : vector<128xf32>
    %282 = vector.multi_reduction <add>, %281, %cst_249 [0] : vector<16x128xf32> to vector<128xf32>
    %283 = vector.shape_cast %282 : vector<128xf32> to vector<1x128xf32>
    %284 = arith.addf %249, %283 : vector<1x128xf32>
    %c8_i32 = arith.constant 8 : i32
    %285 = tpu.concatenate %280, %284 in 0 : vector<1x128xf32>, vector<1x128xf32> -> vector<2x128xf32>
    %c0_250 = arith.constant 0 : index
    %c0_251 = arith.constant 0 : index
    %c0_252 = arith.constant 0 : index
    %286 = vector.load %arg5[%c0_250, %c0_251, %c0_252] : memref<1x2x128xf32, #tpu.memory_space<vmem>>, vector<1x2x128xf32>
    %287 = vector.shape_cast %286 : vector<1x2x128xf32> to vector<2x128xf32>
    %288 = vector.shape_cast %285 : vector<2x128xf32> to vector<1x2x128xf32>
    tpu.vector_store %arg5[%c0_250, %c0_251, %c0_252], %288 {strides = array<i32>} : memref<1x2x128xf32, #tpu.memory_space<vmem>>, vector<1x2x128xf32>,
    return
  }
  func.func @transform_0(%arg0: i32) -> (i32, i32, i32, i32) {
    %c0_i32 = arith.constant 0 : i32
    %c0_i32_0 = arith.constant 0 : i32
    %c0_i32_1 = arith.constant 0 : i32
    %c0_i32_2 = arith.constant 0 : i32
    return %arg0, %c0_i32, %c0_i32_0, %c0_i32_1 : i32, i32, i32, i32
  }
  func.func @transform_1(%arg0: i32) -> (i32, i32, i32) {
    %c0_i32 = arith.constant 0 : i32
    %c0_i32_0 = arith.constant 0 : i32
    %c0_i32_1 = arith.constant 0 : i32
    %c0_i32_2 = arith.constant 0 : i32
    return %c0_i32, %c0_i32_0, %c0_i32_1 : i32, i32, i32
  }
  func.func @transform_2(%arg0: i32) -> (i32, i32) {
    %c0_i32 = arith.constant 0 : i32
    %c0_i32_0 = arith.constant 0 : i32
    %c0_i32_1 = arith.constant 0 : i32
    return %c0_i32, %c0_i32_0 : i32, i32
  }
  func.func @transform_3(%arg0: i32) -> (i32, i32, i32) {
    %c0_i32 = arith.constant 0 : i32
    %c0_i32_0 = arith.constant 0 : i32
    %c0_i32_1 = arith.constant 0 : i32
    return %arg0, %c0_i32, %c0_i32_0 : i32, i32, i32
  }
  func.func @transform_4(%arg0: i32) -> (i32, i32, i32) {
    %c0_i32 = arith.constant 0 : i32
    %c0_i32_0 = arith.constant 0 : i32
    %c0_i32_1 = arith.constant 0 : i32
    return %arg0, %c0_i32, %c0_i32_0 : i32, i32, i32
  }
}

module attributes {stable_mosaic.version = 11 : i64} {
  func.func @kernel(%arg0: i32, %arg1: memref<1x16x128xf32, #tpu.memory_space<vmem>>, %arg2: memref<1x128xf32, #tpu.memory_space<vmem>>, %arg3: memref<1x128xf32, #tpu.memory_space<vmem>>, %arg4: memref<3x128x64xbf16, #tpu.memory_space<vmem>>, %arg5: memref<1x64xf32, #tpu.memory_space<vmem>>, %arg6: memref<1x16x64xf32, #tpu.memory_space<vmem>>, %arg7: memref<18x128xbf16, #tpu.memory_space<vmem>>) attributes {dimension_semantics = [#tpu.dimension_semantics<parallel>], iteration_bounds = array<i64: 2>, scalar_prefetch = 0 : i64, scratch_operands = 1 : i64, tpu.core_type = #tpu.core_type<tc>, window_params = [{transform_indices = @transform_0, window_bounds = array<i64: 1, 16, 128>}, {pipeline_mode = #tpu.pipeline_mode<synchronous>, transform_indices = @transform_1, window_bounds = array<i64: 1, 128>}, {pipeline_mode = #tpu.pipeline_mode<synchronous>, transform_indices = @transform_2, window_bounds = array<i64: 1, 128>}, {pipeline_mode = #tpu.pipeline_mode<synchronous>, transform_indices = @transform_3, window_bounds = array<i64: 3, 128, 64>}, {pipeline_mode = #tpu.pipeline_mode<synchronous>, transform_indices = @transform_4, window_bounds = array<i64: 1, 64>}, {transform_indices = @transform_5, window_bounds = array<i64: 1, 16, 64>}]} {
    %cst = arith.constant 0.000000e+00 : bf16
    %0 = vector.broadcast %cst : bf16 to vector<1x128xbf16>
    %c0 = arith.constant 0 : index
    %c0_0 = arith.constant 0 : index
    %1 = vector.load %arg7[%c0, %c0_0] : memref<18x128xbf16, #tpu.memory_space<vmem>>, vector<1x128xbf16>
    tpu.vector_store %arg7[%c0, %c0_0], %0 {strides = array<i32>} : memref<18x128xbf16, #tpu.memory_space<vmem>>, vector<1x128xbf16>,
    %c17 = arith.constant 17 : index
    %c0_1 = arith.constant 0 : index
    %2 = vector.load %arg7[%c17, %c0_1] : memref<18x128xbf16, #tpu.memory_space<vmem>>, vector<1x128xbf16>
    tpu.vector_store %arg7[%c17, %c0_1], %0 {strides = array<i32>} : memref<18x128xbf16, #tpu.memory_space<vmem>>, vector<1x128xbf16>,
    %c0_2 = arith.constant 0 : index
    %c0_3 = arith.constant 0 : index
    %c0_4 = arith.constant 0 : index
    %3 = vector.load %arg1[%c0_2, %c0_3, %c0_4] : memref<1x16x128xf32, #tpu.memory_space<vmem>>, vector<1x16x128xf32>
    %4 = vector.shape_cast %3 : vector<1x16x128xf32> to vector<16x128xf32>
    %c0_5 = arith.constant 0 : index
    %c0_6 = arith.constant 0 : index
    %5 = vector.load %arg2[%c0_5, %c0_6] : memref<1x128xf32, #tpu.memory_space<vmem>>, vector<1x128xf32>
    %6 = vector.broadcast %5 : vector<1x128xf32> to vector<16x128xf32>
    %7 = arith.mulf %4, %6 : vector<16x128xf32>
    %c0_7 = arith.constant 0 : index
    %c0_8 = arith.constant 0 : index
    %8 = vector.load %arg3[%c0_7, %c0_8] : memref<1x128xf32, #tpu.memory_space<vmem>>, vector<1x128xf32>
    %9 = vector.broadcast %8 : vector<1x128xf32> to vector<16x128xf32>
    %10 = arith.addf %7, %9 : vector<16x128xf32>
    %11 = arith.truncf %10 : vector<16x128xf32> to vector<16x128xbf16>
    %c1 = arith.constant 1 : index
    %c0_9 = arith.constant 0 : index
    %12 = vector.load %arg7[%c1, %c0_9] : memref<18x128xbf16, #tpu.memory_space<vmem>>, vector<16x128xbf16>
    tpu.vector_store %arg7[%c1, %c0_9], %11 {strides = array<i32>} : memref<18x128xbf16, #tpu.memory_space<vmem>>, vector<16x128xbf16>,
    %cst_10 = arith.constant 0.000000e+00 : f32
    %13 = vector.broadcast %cst_10 : f32 to vector<16x64xf32>
    %c0_11 = arith.constant 0 : index
    %c0_12 = arith.constant 0 : index
    %14 = vector.load %arg7[%c0_11, %c0_12] : memref<18x128xbf16, #tpu.memory_space<vmem>>, vector<16x128xbf16>
    %c0_13 = arith.constant 0 : index
    %c0_14 = arith.constant 0 : index
    %c0_15 = arith.constant 0 : index
    %15 = vector.load %arg4[%c0_13, %c0_14, %c0_15] : memref<3x128x64xbf16, #tpu.memory_space<vmem>>, vector<1x128x64xbf16>
    %16 = vector.shape_cast %15 : vector<1x128x64xbf16> to vector<128x64xbf16>
    %cst_16 = arith.constant dense<0.000000e+00> : vector<16x64xf32>
    %17 = tpu.matmul %14, %16, %cst_16 {dimension_numbers = #tpu.dot_dimension_numbers<[1], [0], [0], [1], [0, 0, 1, 1], [], []>} : vector<16x128xbf16>, vector<128x64xbf16>, vector<16x64xf32> -> vector<16x64xf32>
    %18 = arith.addf %13, %17 : vector<16x64xf32>
    %c1_17 = arith.constant 1 : index
    %c0_18 = arith.constant 0 : index
    %19 = vector.load %arg7[%c1_17, %c0_18] : memref<18x128xbf16, #tpu.memory_space<vmem>>, vector<16x128xbf16>
    %c1_19 = arith.constant 1 : index
    %c0_20 = arith.constant 0 : index
    %c0_21 = arith.constant 0 : index
    %20 = vector.load %arg4[%c1_19, %c0_20, %c0_21] : memref<3x128x64xbf16, #tpu.memory_space<vmem>>, vector<1x128x64xbf16>
    %21 = vector.shape_cast %20 : vector<1x128x64xbf16> to vector<128x64xbf16>
    %cst_22 = arith.constant dense<0.000000e+00> : vector<16x64xf32>
    %22 = tpu.matmul %19, %21, %cst_22 {dimension_numbers = #tpu.dot_dimension_numbers<[1], [0], [0], [1], [0, 0, 1, 1], [], []>} : vector<16x128xbf16>, vector<128x64xbf16>, vector<16x64xf32> -> vector<16x64xf32>
    %23 = arith.addf %18, %22 : vector<16x64xf32>
    %c2 = arith.constant 2 : index
    %c0_23 = arith.constant 0 : index
    %24 = vector.load %arg7[%c2, %c0_23] : memref<18x128xbf16, #tpu.memory_space<vmem>>, vector<16x128xbf16>
    %c2_24 = arith.constant 2 : index
    %c0_25 = arith.constant 0 : index
    %c0_26 = arith.constant 0 : index
    %25 = vector.load %arg4[%c2_24, %c0_25, %c0_26] : memref<3x128x64xbf16, #tpu.memory_space<vmem>>, vector<1x128x64xbf16>
    %26 = vector.shape_cast %25 : vector<1x128x64xbf16> to vector<128x64xbf16>
    %cst_27 = arith.constant dense<0.000000e+00> : vector<16x64xf32>
    %27 = tpu.matmul %24, %26, %cst_27 {dimension_numbers = #tpu.dot_dimension_numbers<[1], [0], [0], [1], [0, 0, 1, 1], [], []>} : vector<16x128xbf16>, vector<128x64xbf16>, vector<16x64xf32> -> vector<16x64xf32>
    %28 = arith.addf %23, %27 : vector<16x64xf32>
    %c0_28 = arith.constant 0 : index
    %c0_29 = arith.constant 0 : index
    %29 = vector.load %arg5[%c0_28, %c0_29] : memref<1x64xf32, #tpu.memory_space<vmem>>, vector<1x64xf32>
    %30 = vector.broadcast %29 : vector<1x64xf32> to vector<16x64xf32>
    %31 = arith.addf %28, %30 : vector<16x64xf32>
    %32 = arith.negf %31 : vector<16x64xf32>
    %33 = math.exp %32 : vector<16x64xf32>
    %cst_30 = arith.constant 1.000000e+00 : f32
    %34 = vector.broadcast %cst_30 : f32 to vector<16x64xf32>
    %35 = arith.addf %34, %33 : vector<16x64xf32>
    %36 = arith.divf %34, %35 : vector<16x64xf32>
    %c0_31 = arith.constant 0 : index
    %c0_32 = arith.constant 0 : index
    %c0_33 = arith.constant 0 : index
    %37 = vector.load %arg6[%c0_31, %c0_32, %c0_33] : memref<1x16x64xf32, #tpu.memory_space<vmem>>, vector<1x16x64xf32>
    %38 = vector.shape_cast %37 : vector<1x16x64xf32> to vector<16x64xf32>
    %39 = vector.shape_cast %36 : vector<16x64xf32> to vector<1x16x64xf32>
    tpu.vector_store %arg6[%c0_31, %c0_32, %c0_33], %39 {strides = array<i32>} : memref<1x16x64xf32, #tpu.memory_space<vmem>>, vector<1x16x64xf32>,
    return
  }
  func.func @transform_0(%arg0: i32) -> (i32, i32, i32) {
    %c0_i32 = arith.constant 0 : i32
    %c0_i32_0 = arith.constant 0 : i32
    %c0_i32_1 = arith.constant 0 : i32
    return %arg0, %c0_i32, %c0_i32_0 : i32, i32, i32
  }
  func.func @transform_1(%arg0: i32) -> (i32, i32) {
    %c0_i32 = arith.constant 0 : i32
    %c0_i32_0 = arith.constant 0 : i32
    %c0_i32_1 = arith.constant 0 : i32
    return %c0_i32, %c0_i32_0 : i32, i32
  }
  func.func @transform_2(%arg0: i32) -> (i32, i32) {
    %c0_i32 = arith.constant 0 : i32
    %c0_i32_0 = arith.constant 0 : i32
    %c0_i32_1 = arith.constant 0 : i32
    return %c0_i32, %c0_i32_0 : i32, i32
  }
  func.func @transform_3(%arg0: i32) -> (i32, i32, i32) {
    %c0_i32 = arith.constant 0 : i32
    %c0_i32_0 = arith.constant 0 : i32
    %c0_i32_1 = arith.constant 0 : i32
    %c0_i32_2 = arith.constant 0 : i32
    return %c0_i32, %c0_i32_0, %c0_i32_1 : i32, i32, i32
  }
  func.func @transform_4(%arg0: i32) -> (i32, i32) {
    %c0_i32 = arith.constant 0 : i32
    %c0_i32_0 = arith.constant 0 : i32
    %c0_i32_1 = arith.constant 0 : i32
    return %c0_i32, %c0_i32_0 : i32, i32
  }
  func.func @transform_5(%arg0: i32) -> (i32, i32, i32) {
    %c0_i32 = arith.constant 0 : i32
    %c0_i32_0 = arith.constant 0 : i32
    %c0_i32_1 = arith.constant 0 : i32
    return %arg0, %c0_i32, %c0_i32_0 : i32, i32, i32
  }
}

</mosaic_0001>

<bundles_post_ra>
// kernel: tile.23
= control target key start
LH: loop header
LB: loop body
LE: loop exit
PB: predicated region body
PF: predicated region fallthrough
CT: control target
= control target key end

     0   :  { %s28_s0 = inlined_call_operand.vmem [shape: f32[8], index: 0, kind: input, shape index: {}]   ;;  %s29_s1 = inlined_call_operand.vmem [shape: f32[16,8], index: 1, kind: output, shape index: {}]  }
   0x1   :  { %v4_v0 = vld [vmem:[%s28_s0] ss:$0 sm:$0xff] }
   0x2   :  { %5 = vst [vmem:[%s29_s1] sm:$0xff] %v4_v0 }
   0x3   :  { %8 = vst [vmem:[%s29_s1 + $0x8] sm:$0xff] %v4_v0 }

// kernel: tile.24
= control target key start
LH: loop header
LB: loop body
LE: loop exit
PB: predicated region body
PF: predicated region fallthrough
CT: control target
= control target key end

     0   :  { %s131_s10 = smov 120   ;;  %s132_s11 = smov 104   ;;  %vm3_vm0 = vcmask 64512   ;;  %vm9_vm1 = vcmask 1048512   ;;  %vm15_vm2 = vcmask 982912   ;;  %vm21_vm3 = vcmask 917312   ;;  %s207_s0 = inlined_call_operand.vmem [shape: f32[16,8], index: 0, kind: input, shape index: {}]   ;;  %s208_s1 = inlined_call_operand.vmem [shape: f32[1,128], index: 1, kind: output, shape index: {}]  }
   0x1   :  { %v101_v0 = vld [vmem:[%s207_s0 + $0xf] sm:$0x1]   ;;  %v103_v1 = vld [vmem:[%s207_s0 + $0xd] sm:$0x1]   ;;  %v105_v2 = vld [vmem:[%s207_s0 + $0xb] sm:$0x1]  }
   0x2   :  { %7 = vrot.lane.b32.xlu0 %v101_v0, %s131_s10  ;;  %19 = vrot.lane.b32.xlu1 %v103_v1, %s132_s11  ;;  %s133_s14 = smov 88   ;;  %v102_v3 = vld [vmem:[%s207_s0 + $0xe] sm:$0x1]   ;;  %v104_v4 = vld [vmem:[%s207_s0 + $0xc] sm:$0x1]   ;;  %s134_s19 = smov 112  }
   0x3   :  { %31 = vrot.lane.b32.xlu2 %v105_v2, %s133_s14  ;;  %s135_s20 = smov 96   ;;  %v106_v5 = vld [vmem:[%s207_s0 + $0xa] sm:$0x1]   ;;  %s136_s23 = smov 80   ;;  %v107_v6 = vld [vmem:[%s207_s0 + $0x9] sm:$0x1]  }
   0x4   :  { %v108_v7 = vld [vmem:[%s207_s0 + $0x8] sm:$0x1]   ;;  %s137_s28 = smov 72   ;;  %s138_s29 = smov 64   ;;  %v109_v8 = vld [vmem:[%s207_s0 + $0x7] sm:$0x1]  }
   0x5   :  { %s139_s3 = smov 56   ;;  %v110_v9 = vld [vmem:[%s207_s0 + $0x6] sm:$0x1]   ;;  %v111_v10 = vld [vmem:[%s207_s0 + $0x5] sm:$0x1]   ;;  %s140_s8 = smov 48  }
   0x6   :  { %s141_s9 = smov 40   ;;  %v112_v11 = vld [vmem:[%s207_s0 + $0x4] sm:$0x1]   ;;  %s142_s12 = smov 32   ;;  %v113_v12 = vld [vmem:[%s207_s0 + $0x3] sm:$0x1]  }
   0x7   :  { %v114_v13 = vld [vmem:[%s207_s0 + $0x2] sm:$0x1]   ;;  %s143_s17 = smov 24   ;;  %s144_s18 = smov 16   ;;  %v115_v14 = vld [vmem:[%s207_s0 + $0x1] sm:$0x1]  }
   0x8   :  { %s145_s21 = smov 8   ;;  %v2_v15 = vld [vmem:[%s207_s0] sm:$0x1]   ;;  %vm27_vm4 = vcmask 851712   ;;  %vm33_vm5 = vcmask 786112   ;;  %vm39_vm6 = vcmask 720512  }
   0x9   :  { %4 = vst.msk [vmem:[#allocation0] sm:$0x1] %vm3_vm0, %v2_v15   ;;  %vm45_vm7 = vcmask 654912   ;;  %vm51_vm8 = vcmask 589312   ;;  %vm57_vm9 = vcmask 523712   ;;  %vm63_vm10 = vcmask 458112  }
   0xa   :  { %13 = vrot.lane.b32.xlu0 %v102_v3, %s134_s19  ;;  %25 = vrot.lane.b32.xlu1 %v104_v4, %s135_s20  ;;  %vm69_vm11 = vcmask 392512   ;;  %vm75_vm12 = vcmask 326912   ;;  %vm81_vm13 = vcmask 261312   ;;  %vm87_vm14 = vcmask 195712  }
   0xb   :  { %37 = vrot.lane.b32.xlu2 %v106_v5, %s136_s23  ;;  %vm93_vm15 = vcmask 130112  }
  0x12   :  { %43 = vrot.lane.b32.xlu0 %v107_v6, %s137_s28  ;;  %49 = vrot.lane.b32.xlu1 %v108_v7, %s138_s29 }
  0x13   :  { %55 = vrot.lane.b32.xlu2 %v109_v8, %s139_s3 }
  0x1a   :  { %61 = vrot.lane.b32.xlu0 %v110_v9, %s140_s8  ;;  %67 = vrot.lane.b32.xlu1 %v111_v10, %s141_s9 }
  0x1b   :  { %73 = vrot.lane.b32.xlu2 %v112_v11, %s142_s12 }
  0x22   :  { %79 = vrot.lane.b32.xlu0 %v113_v12, %s143_s17  ;;  %85 = vrot.lane.b32.xlu1 %v114_v13, %s144_s18 }
  0x23   :  { %91 = vrot.lane.b32.xlu2 %v115_v14, %s145_s21 }
  0x5d   :  { %v32_v16 = vpop.permute.xlu2 %31  }
  0x65   :  { %v38_v17 = vpop.permute.xlu2 %37  }
  0x6d   :  { %v56_v18 = vpop.permute.xlu2 %55  }
  0x74   :  { %v8_v19 = vpop.permute.xlu0 %7   ;;  %v20_v20 = vpop.permute.xlu1 %19  }
  0x75   :  { %10 = vst.msk [vmem:[#allocation0] sm:$0x1] %vm9_vm1, %v8_v19   ;;  %v74_v21 = vpop.permute.xlu2 %73  }
  0x7c   :  { %v14_v22 = vpop.permute.xlu0 %13   ;;  %v26_v23 = vpop.permute.xlu1 %25  }
  0x7d   :  { %16 = vst.msk [vmem:[#allocation0] sm:$0x1] %vm15_vm2, %v14_v22   ;;  %v92_v24 = vpop.permute.xlu2 %91  }
  0x7e   :  { %22 = vst.msk [vmem:[#allocation0] sm:$0x1] %vm21_vm3, %v20_v20  }
  0x7f   :  { %28 = vst.msk [vmem:[#allocation0] sm:$0x1] %vm27_vm4, %v26_v23  }
  0x80   :  { %34 = vst.msk [vmem:[#allocation0] sm:$0x1] %vm33_vm5, %v32_v16  }
  0x81   :  { %40 = vst.msk [vmem:[#allocation0] sm:$0x1] %vm39_vm6, %v38_v17  }
  0x84   :  { %v44_v25 = vpop.permute.xlu0 %43   ;;  %v50_v26 = vpop.permute.xlu1 %49  }
  0x85   :  { %46 = vst.msk [vmem:[#allocation0] sm:$0x1] %vm45_vm7, %v44_v25  }
  0x86   :  { %52 = vst.msk [vmem:[#allocation0] sm:$0x1] %vm51_vm8, %v50_v26  }
  0x87   :  { %58 = vst.msk [vmem:[#allocation0] sm:$0x1] %vm57_vm9, %v56_v18  }
  0x8c   :  { %v62_v27 = vpop.permute.xlu0 %61   ;;  %v68_v28 = vpop.permute.xlu1 %67  }
  0x8d   :  { %64 = vst.msk [vmem:[#allocation0] sm:$0x1] %vm63_vm10, %v62_v27  }
  0x8e   :  { %70 = vst.msk [vmem:[#allocation0] sm:$0x1] %vm69_vm11, %v68_v28  }
  0x8f   :  { %76 = vst.msk [vmem:[#allocation0] sm:$0x1] %vm75_vm12, %v74_v21  }
  0x94   :  { %v80_v29 = vpop.permute.xlu0 %79   ;;  %v86_v30 = vpop.permute.xlu1 %85  }
  0x95   :  { %82 = vst.msk [vmem:[#allocation0] sm:$0x1] %vm81_vm13, %v80_v29  }
  0x96   :  { %88 = vst.msk [vmem:[#allocation0] sm:$0x1] %vm87_vm14, %v86_v30  }
  0x97   :  { %94 = vst.msk [vmem:[#allocation0] sm:$0x1] %vm93_vm15, %v92_v24  }
  0x9e   :  { %v97_v31 = vld [vmem:[#allocation0] sm:$0x1] }
  0x9f   :  { %100 = vst [vmem:[%s208_s1] sm:$0x1] %v97_v31 }

// kernel: latent2nextframe_forward.2
= control target key start
LH: loop header
LB: loop body
LE: loop exit
PB: predicated region body
PF: predicated region fallthrough
CT: control target
= control target key end

     0   :  { %s7743_s15 = smov 0   ;;  %s9168_s0 = inlined_call_operand.vmem [shape: bf16[2,8,16,128], index: 0, kind: input, shape index: {}]   ;;  %s9169_s1 = inlined_call_operand.vmem [shape: bf16[3,256,128], index: 1, kind: input, shape index: {}]   ;;  %s9170_s2 = inlined_call_operand.vmem [shape: f32[1,128], index: 2, kind: input, shape index: {}]   ;;  %s9171_s3 = inlined_call_operand.vmem [shape: f32[2,16,128], index: 3, kind: output, shape index: {0}]   ;;  %s9172_s4 = inlined_call_operand.vmem [shape: f32[2,2,128], index: 4, kind: output, shape index: {1}]  }
   0x1 LB: > { %s5205_s16 = sadd.s32 4294967295, %s7715_s15   ;;  %p5209_p0 = scmp.ge.s32.totalorder %s7715_s15, 1  ;;  %s7715_s15 = sphi %s7743_s15, %s15_s15  }
   0x2   : > { %p165_p1 = scmp.lt.s32.totalorder %s7715_s15, 3 }
   0x4   : > { %p166_p2 = pnand %p5209_p0, %p165_p1 }
   0x5   : > { %p195_p3 = scmp.lt.s32.totalorder (!%p166_p2), %s5205_s16, 1 }
   0x6   : > { %169 = sbr.rel (%p166_p2) target bundleno = 1604 (0x644), region = 32 }
   0xb   : > { %v7304_v0 = vld [vmem:[%s9169_s1 + $0xb8] sm:$0xff]  ;;  %v7717_v4 = vmov 0   ;;  %v7303_v5 = vld [vmem:[%s9169_s1 + $0xb0] sm:$0xff]  ;;  %s9180_s16 = smov (!%p195_p3, %s5205_s16), 1  ;;  %v7302_v9 = vld [vmem:[%s9169_s1 + $0xa8] sm:$0xff]  ;;  %vm239_vm2 = vcmask 1043456  }
   0xc   : > { %v7312_v1 = vld [vmem:[%s9169_s1 + $0xf8] sm:$0xff]  ;;  %210 = vst [vmem:[#allocation2] sm:$0xff] %v7717_v4  ;;  %455 = vmatpush.bf16.msra.mxu0 %v7304_v0  ;;  %v7311_v6 = vld [vmem:[%s9169_s1 + $0xf0] sm:$0xff]  ;;  %s7279_s7 = sshll.u32 %s9180_s16, 6  ;;  %v7310_v10 = vld [vmem:[%s9169_s1 + $0xe8] sm:$0xff]  ;;  %vm246_vm4 = vcmask 1040384  }
   0xd   : > { %v7288_v2 = vld [vmem:[%s9169_s1 + $0x38] sm:$0xff]  ;;  %469 = vmatpush.bf16.msra.mxu1 %v7312_v1  ;;  %211 = vst [vmem:[#allocation2 + $0x8] sm:$0xff] %v7717_v4  ;;  %v7287_v7 = vld [vmem:[%s9169_s1 + $0x30] sm:$0xff]  ;;  %v7286_v11 = vld [vmem:[%s9169_s1 + $0x28] sm:$0xff]  ;;  %s7793_s20 = scalar_lea.vmem %s9168_s0, %s7279_s7  ;;  %vm216_vm0 = vsmask.f32 256 }
   0xe   : > { %v7296_v3 = vld [vmem:[%s9169_s1 + $0x78] sm:$0xff]  ;;  %581 = vmatpush.bf16.msra.mxu2 %v7288_v2  ;;  %v7295_v8 = vld [vmem:[%s9169_s1 + $0x70] sm:$0xff]  ;;  %212 = vst [vmem:[#allocation2 + $0x10] sm:$0x11] %v7717_v4  ;;  %v7294_v12 = vld [vmem:[%s9169_s1 + $0x68] sm:$0xff]  ;;  %vm648_vm9 = vcmask 1046528  }
   0xf   : > { %595 = vmatpush.bf16.msra.mxu3 %v7296_v3  ;;  %vm217_vm1 = vsmask.f32 4368  ;;  %v7301_v13 = vld [vmem:[%s9169_s1 + $0xa0] sm:$0xff]  ;;  %vm240_vm3 = vsmask.f32 7938  ;;  %v7300_v23 = vld [vmem:[%s9169_s1 + $0x98] sm:$0xff]  ;;  %vm7835_vm7 = vmand %vm246_vm4, %vm216_vm0 }
  0x10   : > { %456 = vmatpush.bf16.msra.mxu0 %v7303_v5  ;;  %v7309_v14 = vld [vmem:[%s9169_s1 + $0xe0] sm:$0xff]  ;;  %v7308_v24 = vld [vmem:[%s9169_s1 + $0xd8] sm:$0xff]  ;;  %vm7817_vm5 = vmor %vm216_vm0, %vm217_vm1  ;;  %vm332_vm8 = vsmask.f32 7424  ;;  %s7280_s30 = sshll.u32 %s9180_s16, 4  ;;  %s5214_s8 = sshll.u32 %s9180_s16, 1 }
  0x11   : > { %470 = vmatpush.bf16.msra.mxu1 %v7311_v6  ;;  %v7285_v15 = vld [vmem:[%s9169_s1 + $0x20] sm:$0xff]  ;;  %v7284_v26 = vld [vmem:[%s9169_s1 + $0x18] sm:$0xff]  ;;  %vm7829_vm6 = vmand %vm239_vm2, %vm240_vm3  ;;  %s204_s7 = scalar_lea.vmem %s9171_s3, %s7280_s30  ;;  %s208_s11 = scalar_lea.vmem %s9172_s4, %s5214_s8 }
  0x12   : > { %582 = vmatpush.bf16.msra.mxu2 %v7287_v7  ;;  %v7293_v16 = vld [vmem:[%s9169_s1 + $0x60] sm:$0xff]  ;;  %v7292_v27 = vld [vmem:[%s9169_s1 + $0x58] sm:$0xff]  ;;  %v7299_v38 = vld [vmem:[%s9169_s1 + $0x90] sm:$0xff] }
  0x13   : > { %596 = vmatpush.bf16.msra.mxu3 %v7295_v8  ;;  %v214_v17 = vld [vmem:[%s7793_s20] sm:$0xf]  ;;  %v215_v18 = vld [vmem:[%s7793_s20 + $0x4] sm:$0xf]  ;;  %v7307_v39 = vld [vmem:[%s9169_s1 + $0xd0] sm:$0xff] }
  0x14   : > { %457 = vmatpush.bf16.msra.mxu0 %v7302_v9  ;;  %v220_v19 = vshrl.u32 %v214_v17, 16  ;;  %v223_v20 = vshll.u32 %v214_v17, 16  ;;  %v228_v21 = vshrl.u32 %v215_v18, 16  ;;  %v231_v22 = vshll.u32 %v215_v18, 16  ;;  %v242_v31 = vld [vmem:[#allocation2] sm:$0xf] }
  0x15   : > { %471 = vmatpush.bf16.msra.mxu1 %v7310_v10  ;;  %v248_v33 = vld [vmem:[#allocation2 + $0x10] sm:$0x1]  ;;  %v7298_v45 = vld [vmem:[%s9169_s1 + $0x88] sm:$0xff]  ;;  %v7297_v49 = vld [vmem:[%s9169_s1 + $0x80] sm:$0xff] }
  0x16   : > { %583 = vmatpush.bf16.msra.mxu2 %v7286_v11  ;;  %v222_v28 = vrot.slane %v220_v19, 7  ;;  %v230_v29 = vrot.slane %v228_v21, 7  ;;  %v7283_v43 = vld [vmem:[%s9169_s1 + $0x10] sm:$0xff]  ;;  %v7306_v46 = vld [vmem:[%s9169_s1 + $0xc8] sm:$0xff]  ;;  %v7305_v50 = vld [vmem:[%s9169_s1 + $0xc0] sm:$0xff] }
  0x17   : > { %597 = vmatpush.bf16.msra.mxu3 %v7294_v12  ;;  %v7291_v44 = vld [vmem:[%s9169_s1 + $0x50] sm:$0xff]  ;;  %v7282_v47 = vld [vmem:[%s9169_s1 + $0x8] sm:$0xff]  ;;  %v7281_v52 = vld [vmem:[%s9169_s1] sm:$0xff] }
  0x18   : > { %458 = vmatpush.bf16.msra.mxu0 %v7301_v13  ;;  %v225_v34 = vor.u32 %v223_v20, %v222_v28  ;;  %v226_v35 = vrot.slane %v222_v28, 4  ;;  %v233_v36 = vor.u32 %v231_v22, %v230_v29  ;;  %v235_v37 = vrot.slane %v230_v29, 4  ;;  %v7290_v48 = vld [vmem:[%s9169_s1 + $0x48] sm:$0xff]  ;;  %v7320_v53 = vld [vmem:[%s9169_s1 + $0x138] sm:$0xff]  ;;  %v7289_v58 = vld [vmem:[%s9169_s1 + $0x40] sm:$0xff] }
  0x19   : > { %472 = vmatpush.bf16.msra.mxu1 %v7309_v14  ;;  %v7328_v57 = vld [vmem:[%s9169_s1 + $0x178] sm:$0xff]  ;;  %v7319_v2 = vld [vmem:[%s9169_s1 + $0x130] sm:$0xff]  ;;  %v7318_v18 = vld [vmem:[%s9169_s1 + $0x128] sm:$0xff] }
  0x1a   : > { %584 = vmatpush.bf16.msra.mxu2 %v7285_v15  ;;  %v234_v40 = vsel %vm7817_vm5, %v226_v35, %v233_v36  ;;  %v243_v41 = vsel %vm7829_vm6, %v225_v34, %v242_v31  ;;  %v249_v42 = vsel %vm7835_vm7, %v235_v37, %v248_v33  ;;  %v7327_v5 = vld [vmem:[%s9169_s1 + $0x170] sm:$0xff]  ;;  %v7326_v19 = vld [vmem:[%s9169_s1 + $0x168] sm:$0xff]  ;;  %v7317_v22 = vld [vmem:[%s9169_s1 + $0x120] sm:$0xff] }
  0x1b   : > { %598 = vmatpush.bf16.msra.mxu3 %v7293_v16  ;;  %244 = vst [vmem:[#allocation2] sm:$0xf] %v243_v41  ;;  %v7315_v28 = vld [vmem:[%s9169_s1 + $0x110] sm:$0xff]  ;;  %v7314_v34 = vld [vmem:[%s9169_s1 + $0x108] sm:$0xff] }
  0x1c   : > { %459 = vmatpush.bf16.msra.mxu0 %v7300_v23  ;;  %245 = vst [vmem:[#allocation2 + $0x8] sm:$0xf] %v234_v40  ;;  %v7325_v23 = vld [vmem:[%s9169_s1 + $0x160] sm:$0xff]  ;;  %v7323_v29 = vld [vmem:[%s9169_s1 + $0x150] sm:$0xff]  ;;  %v7322_v35 = vld [vmem:[%s9169_s1 + $0x148] sm:$0xff] }
  0x1d   : > { %473 = vmatpush.bf16.msra.mxu1 %v7308_v24  ;;  %250 = vst [vmem:[#allocation2 + $0x10] sm:$0x1] %v249_v42  ;;  %v7316_v24 = vld [vmem:[%s9169_s1 + $0x118] sm:$0xff] }
  0x1e   : > { %585 = vmatpush.bf16.msra.mxu2 %v7284_v26  ;;  %v7324_v26 = vld [vmem:[%s9169_s1 + $0x158] sm:$0xff] }
  0x1f   : > { %599 = vmatpush.bf16.msra.mxu3 %v7292_v27 }
  0x20   : > { %460 = vmatpush.bf16.msra.mxu0 %v7299_v38  ;;  %v7313_v38 = vld [vmem:[%s9169_s1 + $0x100] sm:$0xff] }
  0x21   : > { %474 = vmatpush.bf16.msra.mxu1 %v7307_v39  ;;  %v7321_v39 = vld [vmem:[%s9169_s1 + $0x140] sm:$0xff] }
  0x22   : > { %586 = vmatpush.bf16.msra.mxu2 %v7283_v43  ;;  %v251_v51 = vld [vmem:[#allocation2] sm:$0xff] }
  0x23   : > { %600 = vmatpush.bf16.msra.mxu3 %v7291_v44  ;;  %v7881_v54 = vld [vmem:[#allocation2 + $0x8] sm:$0xff]  ;;  %v322_v55 = vunpack.c.l.b16 %v251_v51  ;;  %v323_v56 = vunpack.c.h.b16 %v251_v51  ;;  %v609_v27 = vld [vmem:[#allocation2] sm:$0xee]  ;;  %v7344_v51 = vld [vmem:[%s9169_s1 + $0x78] sm:$0xff] }
  0x24   : > { %461 = vmatpush.bf16.msra.mxu0 %v7298_v45  ;;  %v324_v59 = vunpack.c.l.b16 %v7881_v54  ;;  %v325_v60 = vunpack.c.h.b16 %v7881_v54  ;;  %v285_v61 = vld [vmem:[#allocation2 + $0x10] sm:$0x11]  ;;  %v644_v31 = vunpack.c.l.b16 %v609_v27  ;;  %v645_v33 = vunpack.c.h.b16 %v609_v27 }
  0x25   : > { %475 = vmatpush.bf16.msra.mxu1 %v7306_v46  ;;  %v326_v62 = vunpack.c.l.b16 %v285_v61  ;;  %v327_v63 = vunpack.c.h.b16 %v285_v61  ;;  %v7352_v46 = vld [vmem:[%s9169_s1 + $0xb8] sm:$0xff] }
  0x26   : > { %587 = vmatpush.bf16.msra.mxu2 %v7282_v47  ;;  %v328_v0 = vpack.c.b16 %v324_v59, %v322_v55  ;;  %v329_v1 = vpack.c.b16 %v325_v60, %v323_v56  ;;  %v646_v36 = vpack.c.b16 %v324_v59, %v644_v31  ;;  %v647_v37 = vpack.c.b16 %v325_v60, %v645_v33  ;;  %v7360_v47 = vld [vmem:[%s9169_s1 + $0xf8] sm:$0xff]  ;;  %v7335_v56 = vld [vmem:[%s9169_s1 + $0x30] sm:$0xff]  ;;  %v7349_v59 = vld [vmem:[%s9169_s1 + $0xa0] sm:$0xff] }
  0x27   : > { %601 = vmatpush.bf16.msra.mxu3 %v7290_v48  ;;  %v330_v3 = vpack.c.b16 %v326_v62, %v326_v62  ;;  %v331_v4 = vpack.c.b16 %v327_v63, %v327_v63  ;;  %v7351_v48 = vld [vmem:[%s9169_s1 + $0xb0] sm:$0xff]  ;;  %v7357_v60 = vld [vmem:[%s9169_s1 + $0xe0] sm:$0xff]  ;;  %v7334_v62 = vld [vmem:[%s9169_s1 + $0x28] sm:$0xff] }
  0x28   : > { %462 = vmatpush.bf16.msra.mxu0 %v7297_v49  ;;  %v334_v6 = vshrl.u32 %v328_v0, 16  ;;  %v336_v7 = vshll.u32 %v328_v0, 16  ;;  %v346_v8 = vshrl.u32 %v329_v1, 16  ;;  %v348_v9 = vshll.u32 %v329_v1, 16  ;;  %v7359_v49 = vld [vmem:[%s9169_s1 + $0xf0] sm:$0xff]  ;;  %v7342_v63 = vld [vmem:[%s9169_s1 + $0x68] sm:$0xff] }
  0x29   : > { %476 = vmatpush.bf16.msra.mxu1 %v7305_v50  ;;  %v341_v10 = vshll.u32 %v330_v3, 16  ;;  %v353_v11 = vshll.u32 %v331_v4, 16  ;;  %v649_v40 = vrot.slane %v646_v36, 1  ;;  %v650_v41 = vrot.slane %v330_v3, 1  ;;  %v7336_v50 = vld [vmem:[%s9169_s1 + $0x38] sm:$0xff]  ;;  %v7331_v31 = vld [vmem:[%s9169_s1 + $0x10] sm:$0xff] }
  0x2a   : > { %588 = vmatpush.bf16.msra.mxu2 %v7281_v52  ;;  %v338_v12 = vrot.slane %v336_v7, 1  ;;  %v350_v13 = vrot.slane %v348_v9, 1  ;;  %v652_v42 = vrot.slane %v647_v37, 1  ;;  %v653_v43 = vrot.slane %v331_v4, 1  ;;  %v7350_v52 = vld [vmem:[%s9169_s1 + $0xa8] sm:$0xff]  ;;  %v7356_v3 = vld [vmem:[%s9169_s1 + $0xd8] sm:$0xff] }
  0x2b   : > { %602 = vmatpush.bf16.msra.mxu3 %v7289_v58  ;;  %v343_v14 = vrot.slane %v341_v10, 1  ;;  %v355_v15 = vrot.slane %v353_v11, 1  ;;  %v651_v44 = vsel %vm648_vm9, %v649_v40, %v650_v41  ;;  %v5471_v58 = vld [vmem:[%s7793_s20 + $0x8] sm:$0xf]  ;;  %v7333_v7 = vld [vmem:[%s9169_s1 + $0x20] sm:$0xff]  ;;  %v7339_v33 = vld [vmem:[%s9169_s1 + $0x50] sm:$0xff] }
  0x2c   : > { %753 = vmatpush.bf16.msrb.mxu0 %v7320_v53  ;;  %v339_v16 = vor.u32 %v338_v12, %v334_v6  ;;  %v351_v17 = vor.u32 %v350_v13, %v346_v8  ;;  %v654_v45 = vsel %vm648_vm9, %v652_v42, %v653_v43  ;;  %v7358_v53 = vld [vmem:[%s9169_s1 + $0xe8] sm:$0xff]  ;;  %v843_v61 = vshrl.u32 %v5471_v58, 16  ;;  %v7341_v8 = vld [vmem:[%s9169_s1 + $0x60] sm:$0xff] }
  0x2d   : > { %767 = vmatpush.bf16.msrb.mxu1 %v7328_v57  ;;  %589 = vmatmul.bf16.vlgmr.msra.gmra.mxu2 %v328_v0  ;;  %v7343_v57 = vld [vmem:[%s9169_s1 + $0x70] sm:$0xff]  ;;  %v5472_v12 = vld [vmem:[%s7793_s20 + $0xc] sm:$0xf]  ;;  %v8026_v41 = vld [vmem:[%s9170_s2] ss:$0 sm:$0xff] }
  0x2e   : > { %603 = vmatmul.bf16.vlgmr.msra.gmra.mxu3 %v329_v1  ;;  %v344_v20 = vsel %vm332_vm8, %v339_v16, %v343_v14  ;;  %v356_v21 = vsel %vm332_vm8, %v351_v17, %v355_v15  ;;  %1071 = vmatpush.bf16.msrb.mxu2 %v7352_v46  ;;  %v845_v0 = vrot.slane %v843_v61, 7  ;;  %v846_v1 = vshll.u32 %v5471_v58, 16  ;;  %v7347_v14 = vld [vmem:[%s9169_s1 + $0x90] sm:$0xff]  ;;  %v7332_v17 = vld [vmem:[%s9169_s1 + $0x18] sm:$0xff]  ;;  %v7345_v42 = vld [vmem:[%s9169_s1 + $0x80] sm:$0xff] }
  0x2f   : > { %463 = vmatmul.bf16.vlgmr.msra.gmra.mxu0 %v344_v20  ;;  %477 = vmatmul.bf16.vlgmr.msra.gmra.mxu1 %v356_v21  ;;  %v7355_v15 = vld [vmem:[%s9169_s1 + $0xd0] sm:$0xff]  ;;  %v851_v16 = vshrl.u32 %v5472_v12, 16  ;;  %v854_v20 = vshll.u32 %v5472_v12, 16  ;;  %v7353_v43 = vld [vmem:[%s9169_s1 + $0xc0] sm:$0xff]  ;;  %v7376_v46 = vld [vmem:[%s9169_s1 + $0x178] sm:$0xff] }
  0x30   : > { %754 = vmatpush.bf16.msrb.mxu0 %v7319_v2  ;;  %1085 = vmatpush.bf16.msrb.mxu3 %v7360_v47  ;;  %v7348_v2 = vld [vmem:[%s9169_s1 + $0x98] sm:$0xff]  ;;  %v848_v4 = vor.u32 %v846_v1, %v845_v0  ;;  %v7366_v61 = vld [vmem:[%s9169_s1 + $0x128] sm:$0xff]  ;;  %v7373_v1 = vld [vmem:[%s9169_s1 + $0x160] sm:$0xff] }
  0x31   : > { %768 = vmatpush.bf16.msrb.mxu1 %v7327_v5  ;;  %v862_v5 = vld [vmem:[#allocation2] sm:$0xf]  ;;  %v7363_v12 = vld [vmem:[%s9169_s1 + $0x110] sm:$0xff] }
  0x32   : > { %1072 = vmatpush.bf16.msrb.mxu2 %v7351_v48  ;;  %v863_v9 = vsel %vm7829_vm6, %v848_v4, %v862_v5  ;;  %v7330_v48 = vld [vmem:[%s9169_s1 + $0x8] sm:$0xff] }
  0x33   : > { %864 = vst [vmem:[#allocation2] sm:$0xf] %v863_v9  ;;  %v7372_v9 = vld [vmem:[%s9169_s1 + $0x158] sm:$0xff] }
  0x34   : > { %755 = vmatpush.bf16.msrb.mxu0 %v7318_v18  ;;  %1086 = vmatpush.bf16.msrb.mxu3 %v7359_v49  ;;  %v7340_v18 = vld [vmem:[%s9169_s1 + $0x58] sm:$0xff]  ;;  %v7338_v49 = vld [vmem:[%s9169_s1 + $0x48] sm:$0xff] }
  0x35   : > { %769 = vmatpush.bf16.msrb.mxu1 %v7326_v19  ;;  %v853_v19 = vrot.slane %v851_v16, 7 }
  0x36   : > { %1073 = vmatpush.bf16.msrb.mxu2 %v7350_v52 }
  0x37   : > { %v856_v27 = vor.u32 %v854_v20, %v853_v19 }
  0x38   : > { %756 = vmatpush.bf16.msrb.mxu0 %v7317_v22  ;;  %1087 = vmatpush.bf16.msrb.mxu3 %v7358_v53 }
  0x39   : > { %770 = vmatpush.bf16.msrb.mxu1 %v7325_v23  ;;  %v7346_v23 = vld [vmem:[%s9169_s1 + $0x88] sm:$0xff] }
  0x3a   : > { %1074 = vmatpush.bf16.msrb.mxu2 %v7349_v59 }
  0x3c   : > { %757 = vmatpush.bf16.msrb.mxu0 %v7316_v24  ;;  %1088 = vmatpush.bf16.msrb.mxu3 %v7357_v60  ;;  %v7354_v24 = vld [vmem:[%s9169_s1 + $0xc8] sm:$0xff] }
  0x3d   : > { %771 = vmatpush.bf16.msrb.mxu1 %v7324_v26  ;;  %v849_v26 = vrot.slane %v845_v0, 4  ;;  %v7365_v0 = vld [vmem:[%s9169_s1 + $0x120] sm:$0xff] }
  0x3e   : > { %1075 = vmatpush.bf16.msrb.mxu2 %v7348_v2 }
  0x40   : > { %758 = vmatpush.bf16.msrb.mxu0 %v7315_v28  ;;  %1089 = vmatpush.bf16.msrb.mxu3 %v7356_v3  ;;  %v858_v28 = vrot.slane %v853_v19, 4 }
  0x41   : > { %772 = vmatpush.bf16.msrb.mxu1 %v7323_v29  ;;  %v866_v29 = vld [vmem:[#allocation2 + $0x10] sm:$0x1] }
  0x42   : > { %1076 = vmatpush.bf16.msrb.mxu2 %v7347_v14 }
  0x44   : > { %759 = vmatpush.bf16.msrb.mxu0 %v7314_v34  ;;  %1090 = vmatpush.bf16.msrb.mxu3 %v7355_v15  ;;  %v857_v34 = vsel %vm7817_vm5, %v849_v26, %v856_v27  ;;  %v816_v27 = vld [vmem:[#allocation2 + $0x14] sm:$0x1] }
  0x45   : > { %773 = vmatpush.bf16.msrb.mxu1 %v7322_v35  ;;  %v867_v35 = vsel %vm7835_vm7, %v858_v28, %v866_v29  ;;  %865 = vst [vmem:[#allocation2 + $0x8] sm:$0xf] %v857_v34  ;;  %v7369_v34 = vld [vmem:[%s9169_s1 + $0x140] sm:$0xff] }
  0x46   : > { %1077 = vmatpush.bf16.msrb.mxu2 %v7346_v23  ;;  %868 = vst [vmem:[#allocation2 + $0x10] sm:$0x1] %v867_v35  ;;  %v7370_v23 = vld [vmem:[%s9169_s1 + $0x148] sm:$0xff] }
  0x48   : > { %760 = vmatpush.bf16.msrb.mxu0 %v7313_v38  ;;  %1091 = vmatpush.bf16.msrb.mxu3 %v7354_v24 }
  0x49   : > { %774 = vmatpush.bf16.msrb.mxu1 %v7321_v39 }
  0x4a   : > { %1078 = vmatpush.bf16.msrb.mxu2 %v7345_v42 }
  0x4b   : > { %761 = vmatmul.bf16.vlgmr.msrb.gmra.mxu0 %v651_v44 }
  0x4c   : > { %775 = vmatmul.bf16.vlgmr.msrb.gmra.mxu1 %v654_v45  ;;  %1197 = vmatpush.bf16.msra.mxu0 %v7336_v50  ;;  %v7368_v45 = vld [vmem:[%s9169_s1 + $0x138] sm:$0xff]  ;;  %v7367_v50 = vld [vmem:[%s9169_s1 + $0x130] sm:$0xff] }
  0x4d   : > { %1211 = vmatpush.bf16.msra.mxu1 %v7344_v51  ;;  %1092 = vmatpush.bf16.msrb.mxu3 %v7353_v43  ;;  %v7375_v51 = vld [vmem:[%s9169_s1 + $0x170] sm:$0xff] }
  0x4e   : > { %1367 = vmatpush.bf16.msra.mxu2 %v7368_v45 }
  0x50   : > { %1198 = vmatpush.bf16.msra.mxu0 %v7335_v56 }
  0x51   : > { %1212 = vmatpush.bf16.msra.mxu1 %v7343_v57  ;;  %1381 = vmatpush.bf16.msra.mxu3 %v7376_v46 }
  0x52   : > { %1368 = vmatpush.bf16.msra.mxu2 %v7367_v50 }
  0x54   : > { %1199 = vmatpush.bf16.msra.mxu0 %v7334_v62  ;;  %v7374_v62 = vld [vmem:[%s9169_s1 + $0x168] sm:$0xff] }
  0x55   : > { %1213 = vmatpush.bf16.msra.mxu1 %v7342_v63  ;;  %1382 = vmatpush.bf16.msra.mxu3 %v7375_v51 }
  0x56   : > { %1369 = vmatpush.bf16.msra.mxu2 %v7366_v61 }
  0x58   : > { %1200 = vmatpush.bf16.msra.mxu0 %v7333_v7 }
  0x59   : > { %1214 = vmatpush.bf16.msra.mxu1 %v7341_v8  ;;  %1383 = vmatpush.bf16.msra.mxu3 %v7374_v62  ;;  %v7364_v8 = vld [vmem:[%s9169_s1 + $0x118] sm:$0xff] }
  0x5a   : > { %1370 = vmatpush.bf16.msra.mxu2 %v7365_v0 }
  0x5c   : > { %1201 = vmatpush.bf16.msra.mxu0 %v7332_v17 }
  0x5d   : > { %1215 = vmatpush.bf16.msra.mxu1 %v7340_v18  ;;  %1384 = vmatpush.bf16.msra.mxu3 %v7373_v1 }
  0x5e   : > { %1371 = vmatpush.bf16.msra.mxu2 %v7364_v8 }
  0x60   : > { %1202 = vmatpush.bf16.msra.mxu0 %v7331_v31 }
  0x61   : > { %1216 = vmatpush.bf16.msra.mxu1 %v7339_v33  ;;  %1385 = vmatpush.bf16.msra.mxu3 %v7372_v9  ;;  %v7361_v33 = vld [vmem:[%s9169_s1 + $0x100] sm:$0xff] }
  0x62   : > { %1372 = vmatpush.bf16.msra.mxu2 %v7363_v12  ;;  %v7400_v12 = vld [vmem:[%s9169_s1 + $0xb8] sm:$0xff] }
  0x64   : > { %1203 = vmatpush.bf16.msra.mxu0 %v7330_v48 }
  0x65   : > { %1217 = vmatpush.bf16.msra.mxu1 %v7338_v49 }
  0xac   : > { %v464_v54 = vpop.f32.mrf.mxu0  ;;  %v478_v55 = vpop.f32.mrf.mxu1 }
  0xad   : > { %v479_v13 = vadd.f32 %v478_v55, %v464_v54  ;;  %v7329_v54 = vld [vmem:[%s9169_s1] sm:$0xff] }
  0xae   : > { %v7337_v55 = vld [vmem:[%s9169_s1 + $0x40] sm:$0xff]  ;;  %1204 = vmatpush.bf16.msra.mxu0 %v7329_v54 }
  0xaf   : > { %1218 = vmatpush.bf16.msra.mxu1 %v7337_v55 }
  0xb0   : > { %v590_v6 = vpop.f32.mrf.mxu2 }
  0xb1   : > { %v604_v21 = vpop.f32.mrf.mxu3  ;;  %v591_v22 = vadd.f32 %v590_v6, %v479_v13  ;;  %v7371_v13 = vld [vmem:[%s9169_s1 + $0x150] sm:$0xff] }
  0xb2   : > { %1386 = vmatpush.bf16.msra.mxu3 %v7371_v13  ;;  %v7408_v13 = vld [vmem:[%s9169_s1 + $0xf8] sm:$0xff]  ;;  %1682 = vmatpush.bf16.msrb.mxu0 %v7400_v12 }
  0xb3   : > { %v605_v38 = vadd.f32 %v604_v21, %v591_v22  ;;  %v7362_v22 = vld [vmem:[%s9169_s1 + $0x108] sm:$0xff]  ;;  %1696 = vmatpush.bf16.msrb.mxu1 %v7408_v13  ;;  %v7416_v13 = vld [vmem:[%s9169_s1 + $0x138] sm:$0xff] }
  0xb4   : > { %v466_v10 = vpop.f32.mrf.mxu0  ;;  %v480_v11 = vpop.f32.mrf.mxu1  ;;  %1373 = vmatpush.bf16.msra.mxu2 %v7362_v22 }
  0xb5   : > { %v481_v39 = vadd.f32 %v480_v11, %v466_v10  ;;  %v812_v10 = vld [vmem:[#allocation2 + $0x4] sm:$0xf] }
  0xb6   : > { %1387 = vmatpush.bf16.msra.mxu3 %v7370_v23 }
  0xb8   : > { %v592_v44 = vpop.f32.mrf.mxu2  ;;  %1374 = vmatpush.bf16.msra.mxu2 %v7361_v33  ;;  %v7382_v33 = vld [vmem:[%s9169_s1 + $0x28] sm:$0xff] }
  0xb9   : > { %v593_v52 = vadd.f32 %v592_v44, %v481_v39  ;;  %v606_v56 = vpop.f32.mrf.mxu3 }
  0xba   : > { %1388 = vmatpush.bf16.msra.mxu3 %v7369_v34  ;;  %v7390_v34 = vld [vmem:[%s9169_s1 + $0x68] sm:$0xff] }
  0xbb   : > { %v607_v59 = vadd.f32 %v606_v56, %v593_v52 }
  0xc8   : > { %v762_v36 = vpop.f32.mrf.mxu0 }
  0xc9   : > { %v776_v37 = vpop.f32.mrf.mxu1 }
  0xca   : > { %v777_v40 = vadd.f32 %v776_v37, %v762_v36 }
  0xcc   : > { %v781_v47 = vadd.f32 %v777_v40, %v605_v38 }
  0xce   : > { %v786_v53 = vadd.f32 %v8026_v41, %v781_v47 }
  0xd0   : > { %7675 = vtanh.f32 %v786_v53  ;;  %v764_v57 = vpop.f32.mrf.mxu0 }
  0xd1   : > { %v778_v58 = vpop.f32.mrf.mxu1 }
  0xd2   : > { %v779_v60 = vadd.f32 %v778_v58, %v764_v57 }
  0xd4   : > { %v782_v63 = vadd.f32 %v779_v60, %v607_v59 }
  0xd6   : > { %v7676_v2 = vpop.eup %7675  ;;  %v787_v3 = vadd.f32 %v8026_v41, %v782_v63 }
  0xd7   : > { %v790_v4 = vpack.c.bf16 %v7676_v2, %v7676_v2  ;;  %v829_v15 = vmul.f32 %v7676_v2, %v7676_v2 }
  0xd8   : > { %7677 = vtanh.f32 %v787_v3 }
  0xd9   : > { %v793_v5 = vshrl.u32 %v790_v4, 16  ;;  %v796_v7 = vshll.u32 %v790_v4, 16 }
  0xdb   : > { %v795_v6 = vrot.slane %v793_v5, 7 }
  0xdd   : > { %v798_v11 = vor.u32 %v796_v7, %v795_v6  ;;  %v799_v28 = vrot.slane %v795_v6, 4 }
  0xde   : > { %v7678_v14 = vpop.eup %7677 }
  0xdf   : > { %v813_v16 = vsel %vm7829_vm6, %v798_v11, %v812_v10  ;;  %v791_v17 = vpack.c.bf16 %v7678_v14, %v7678_v14  ;;  %v8086_v18 = vadd.f32 %v7678_v14, %v7676_v2  ;;  %v830_v19 = vmul.f32 %v7678_v14, %v7678_v14  ;;  %v7399_v14 = vld [vmem:[%s9169_s1 + $0xb0] sm:$0xff] }
  0xe0   : > { %814 = vst [vmem:[#allocation2 + $0x4] sm:$0xf] %v813_v16  ;;  %1683 = vmatpush.bf16.msrb.mxu0 %v7399_v14  ;;  %v7384_v16 = vld [vmem:[%s9169_s1 + $0x38] sm:$0xff] }
  0xe1   : > { %v801_v20 = vshrl.u32 %v791_v17, 16  ;;  %v8088_v21 = vadd.f32 %v830_v19, %v829_v15  ;;  %v804_v26 = vshll.u32 %v791_v17, 16  ;;  %v7407_v15 = vld [vmem:[%s9169_s1 + $0xf0] sm:$0xff]  ;;  %v7392_v17 = vld [vmem:[%s9169_s1 + $0x78] sm:$0xff]  ;;  %v7398_v19 = vld [vmem:[%s9169_s1 + $0xa8] sm:$0xff] }
  0xe2   : > { %1697 = vmatpush.bf16.msrb.mxu1 %v7407_v15  ;;  %v7424_v14 = vld [vmem:[%s9169_s1 + $0x178] sm:$0xff] }
  0xe3   : > { %v803_v24 = vrot.slane %v801_v20, 7  ;;  %v7406_v20 = vld [vmem:[%s9169_s1 + $0xe8] sm:$0xff] }
  0xe4   : > { %1684 = vmatpush.bf16.msrb.mxu0 %v7398_v19 }
  0xe5   : > { %v806_v29 = vor.u32 %v804_v26, %v803_v24  ;;  %v808_v31 = vrot.slane %v803_v24, 4  ;;  %v7383_v24 = vld [vmem:[%s9169_s1 + $0x30] sm:$0xff] }
  0xe6   : > { %1698 = vmatpush.bf16.msrb.mxu1 %v7406_v20  ;;  %v7391_v26 = vld [vmem:[%s9169_s1 + $0x70] sm:$0xff] }
  0xe7   : > { %v807_v35 = vsel %vm7817_vm5, %v799_v28, %v806_v29  ;;  %v817_v36 = vsel %vm7835_vm7, %v808_v31, %v816_v27  ;;  %v869_v37 = vld [vmem:[#allocation2] sm:$0xff]  ;;  %v5729_v27 = vld [vmem:[%s7793_s20 + $0x10] sm:$0xf] }
  0xe8   : > { %815 = vst [vmem:[#allocation2 + $0xc] sm:$0xf] %v807_v35  ;;  %v939_v39 = vunpack.c.l.b16 %v869_v37  ;;  %v940_v42 = vunpack.c.h.b16 %v869_v37  ;;  %v1225_v1 = vld [vmem:[#allocation2] sm:$0xee]  ;;  %v1454_v31 = vshrl.u32 %v5729_v27, 16  ;;  %v7396_v37 = vld [vmem:[%s9169_s1 + $0x98] sm:$0xff] }
  0xe9   : > { %818 = vst [vmem:[#allocation2 + $0x14] sm:$0x1] %v817_v36  ;;  %v1259_v2 = vunpack.c.l.b16 %v1225_v1  ;;  %v1260_v3 = vunpack.c.h.b16 %v1225_v1  ;;  %v7397_v28 = vld [vmem:[%s9169_s1 + $0xa0] sm:$0xff]  ;;  %v1457_v36 = vshll.u32 %v5729_v27, 16 }
  0xea   : > { %v7405_v29 = vld [vmem:[%s9169_s1 + $0xe0] sm:$0xff]  ;;  %1685 = vmatpush.bf16.msrb.mxu0 %v7397_v28  ;;  %v1456_v35 = vrot.slane %v1454_v31, 7 }
  0xeb   : > { %1699 = vmatpush.bf16.msrb.mxu1 %v7405_v29  ;;  %v7385_v27 = vld [vmem:[%s9169_s1 + $0x40] sm:$0xff] }
  0xee   : > { %1686 = vmatpush.bf16.msrb.mxu0 %v7396_v37 }
  0xef   : > { %v870_v38 = vld [vmem:[#allocation2 + $0x8] sm:$0xff] }
  0xf0   : > { %v941_v40 = vunpack.c.l.b16 %v870_v38  ;;  %v942_v43 = vunpack.c.h.b16 %v870_v38  ;;  %v903_v44 = vld [vmem:[#allocation2 + $0x10] sm:$0x11]  ;;  %v7404_v38 = vld [vmem:[%s9169_s1 + $0xd8] sm:$0xff] }
  0xf1   : > { %v943_v45 = vunpack.c.l.b16 %v903_v44  ;;  %v944_v46 = vunpack.c.h.b16 %v903_v44  ;;  %1700 = vmatpush.bf16.msrb.mxu1 %v7404_v38  ;;  %v7381_v44 = vld [vmem:[%s9169_s1 + $0x20] sm:$0xff]  ;;  %v822_v38 = vrot.slane %v8086_v18, 4 }
  0xf2   : > { %v945_v47 = vpack.c.b16 %v941_v40, %v939_v39  ;;  %v946_v48 = vpack.c.b16 %v942_v43, %v940_v42  ;;  %v1261_v4 = vpack.c.b16 %v941_v40, %v1259_v2  ;;  %v1262_v5 = vpack.c.b16 %v942_v43, %v1260_v3  ;;  %v1473_v40 = vld [vmem:[#allocation2] sm:$0xf]  ;;  %v7379_v3 = vld [vmem:[%s9169_s1 + $0x10] sm:$0xff] }
  0xf3   : > { %v947_v49 = vpack.c.b16 %v943_v45, %v943_v45  ;;  %v948_v50 = vpack.c.b16 %v944_v46, %v944_v46  ;;  %v1459_v39 = vor.u32 %v1457_v36, %v1456_v35  ;;  %v7389_v45 = vld [vmem:[%s9169_s1 + $0x60] sm:$0xff]  ;;  %v7422_v36 = vld [vmem:[%s9169_s1 + $0x168] sm:$0xff] }
  0xf4   : > { %1205 = vmatmul.bf16.vlgmr.msra.gmra.mxu0 %v945_v47  ;;  %1219 = vmatmul.bf16.vlgmr.msra.gmra.mxu1 %v946_v48  ;;  %v952_v51 = vshll.u32 %v945_v47, 16  ;;  %v964_v52 = vshll.u32 %v946_v48, 16  ;;  %v950_v55 = vshrl.u32 %v945_v47, 16  ;;  %v962_v57 = vshrl.u32 %v946_v48, 16  ;;  %v5730_v48 = vld [vmem:[%s7793_s20 + $0x14] sm:$0xf] }
  0xf5   : > { %v957_v53 = vshll.u32 %v947_v49, 16  ;;  %v969_v54 = vshll.u32 %v948_v50, 16  ;;  %v1263_v6 = vrot.slane %v1261_v4, 1  ;;  %v1264_v7 = vrot.slane %v947_v49, 1  ;;  %v7387_v4 = vld [vmem:[%s9169_s1 + $0x50] sm:$0xff] }
  0xf6   : > { %v954_v56 = vrot.slane %v952_v51, 1  ;;  %v966_v58 = vrot.slane %v964_v52, 1  ;;  %v1266_v8 = vrot.slane %v1262_v5, 1  ;;  %v1267_v9 = vrot.slane %v948_v50, 1  ;;  %v7395_v50 = vld [vmem:[%s9169_s1 + $0x90] sm:$0xff] }
  0xf7   : > { %v959_v60 = vrot.slane %v957_v53, 1  ;;  %v971_v62 = vrot.slane %v969_v54, 1  ;;  %v1265_v10 = vsel %vm648_vm9, %v1263_v6, %v1264_v7  ;;  %v1474_v46 = vsel %vm7829_vm6, %v1459_v39, %v1473_v40  ;;  %v7403_v51 = vld [vmem:[%s9169_s1 + $0xd0] sm:$0xff]  ;;  %1687 = vmatpush.bf16.msrb.mxu0 %v7395_v50  ;;  %v7380_v53 = vld [vmem:[%s9169_s1 + $0x18] sm:$0xff]  ;;  %v7413_v40 = vld [vmem:[%s9169_s1 + $0x120] sm:$0xff] }
  0xf8   : > { %v955_v59 = vor.u32 %v954_v56, %v950_v55  ;;  %v967_v61 = vor.u32 %v966_v58, %v962_v57  ;;  %v1268_v11 = vsel %vm648_vm9, %v1266_v8, %v1267_v9  ;;  %1475 = vst [vmem:[#allocation2] sm:$0xf] %v1474_v46  ;;  %v1462_v52 = vshrl.u32 %v5730_v48, 16  ;;  %1701 = vmatpush.bf16.msrb.mxu1 %v7403_v51  ;;  %v7388_v54 = vld [vmem:[%s9169_s1 + $0x58] sm:$0xff] }
  0xf9   : > { %v1465_v56 = vshll.u32 %v5730_v48, 16  ;;  %v823_v46 = vadd.f32 %v822_v38, %v8086_v18  ;;  %v7420_v50 = vld [vmem:[%s9169_s1 + $0x158] sm:$0xff]  ;;  %v7411_v18 = vld [vmem:[%s9169_s1 + $0x110] sm:$0xff] }
  0xfa   : > { %v960_v63 = vsel %vm332_vm8, %v955_v59, %v959_v60  ;;  %v972_v0 = vsel %vm332_vm8, %v967_v61, %v971_v62  ;;  %v1464_v55 = vrot.slane %v1462_v52, 7  ;;  %v7394_v59 = vld [vmem:[%s9169_s1 + $0x88] sm:$0xff]  ;;  %v1460_v61 = vrot.slane %v1456_v35, 4 }
  0xfb   : > { %1079 = vmatmul.bf16.vlgmr.msrb.gmra.mxu2 %v960_v63  ;;  %1093 = vmatmul.bf16.vlgmr.msrb.gmra.mxu3 %v972_v0  ;;  %v7402_v60 = vld [vmem:[%s9169_s1 + $0xc8] sm:$0xff]  ;;  %v1477_v0 = vld [vmem:[#allocation2 + $0x10] sm:$0x1] }
  0xfc   : > { %1808 = vmatpush.bf16.msrb.mxu2 %v7384_v16  ;;  %1822 = vmatpush.bf16.msrb.mxu3 %v7392_v17  ;;  %v1467_v62 = vor.u32 %v1465_v56, %v1464_v55  ;;  %v1469_v63 = vrot.slane %v1464_v55, 4  ;;  %v7378_v16 = vld [vmem:[%s9169_s1 + $0x8] sm:$0xff]  ;;  %v1423_v55 = vld [vmem:[#allocation2 + $0x4] sm:$0xf] }
  0xfd   : > { %1688 = vmatpush.bf16.msrb.mxu0 %v7394_v59  ;;  %1702 = vmatpush.bf16.msrb.mxu1 %v7402_v60  ;;  %v7386_v17 = vld [vmem:[%s9169_s1 + $0x48] sm:$0xff] }
  0xfe   : > { %v1468_v5 = vsel %vm7817_vm5, %v1460_v61, %v1467_v62  ;;  %v1478_v6 = vsel %vm7835_vm7, %v1469_v63, %v1477_v0  ;;  %v7414_v35 = vld [vmem:[%s9169_s1 + $0x128] sm:$0xff] }
  0xff   : > { %1476 = vst [vmem:[#allocation2 + $0x8] sm:$0xf] %v1468_v5 }
 0x100   : > { %1809 = vmatpush.bf16.msrb.mxu2 %v7383_v24  ;;  %1823 = vmatpush.bf16.msrb.mxu3 %v7391_v26  ;;  %1479 = vst [vmem:[#allocation2 + $0x10] sm:$0x1] %v1478_v6  ;;  %v7377_v24 = vld [vmem:[%s9169_s1] sm:$0xff] }
 0x104   : > { %1810 = vmatpush.bf16.msrb.mxu2 %v7382_v33  ;;  %1824 = vmatpush.bf16.msrb.mxu3 %v7390_v34 }
 0x108   : > { %1811 = vmatpush.bf16.msrb.mxu2 %v7381_v44  ;;  %1825 = vmatpush.bf16.msrb.mxu3 %v7389_v45  ;;  %v832_v44 = vrot.slane %v8088_v21, 4 }
 0x10a   : > { %v833_v51 = vadd.f32 %v832_v44, %v8088_v21 }
 0x10b   : > { %1375 = vmatmul.bf16.vlgmr.msra.gmra.mxu2 %v1265_v10  ;;  %1389 = vmatmul.bf16.vlgmr.msra.gmra.mxu3 %v1268_v11  ;;  %v7393_v10 = vld [vmem:[%s9169_s1 + $0x80] sm:$0xff] }
 0x10c   : > { %1812 = vmatpush.bf16.msrb.mxu2 %v7380_v53  ;;  %1826 = vmatpush.bf16.msrb.mxu3 %v7388_v54  ;;  %v7401_v11 = vld [vmem:[%s9169_s1 + $0xc0] sm:$0xff]  ;;  %v824_v54 = vrot.slane %v823_v46, 2  ;;  %v834_v61 = vrot.slane %v833_v51, 2 }
 0x10d   : > { %1689 = vmatpush.bf16.msrb.mxu0 %v7393_v10  ;;  %1703 = vmatpush.bf16.msrb.mxu1 %v7401_v11 }
 0x110   : > { %1813 = vmatpush.bf16.msrb.mxu2 %v7379_v3  ;;  %1827 = vmatpush.bf16.msrb.mxu3 %v7387_v4  ;;  %v7418_v3 = vld [vmem:[%s9169_s1 + $0x148] sm:$0xff] }
 0x111   : > { %1978 = vmatpush.bf16.msra.mxu0 %v7416_v13  ;;  %1992 = vmatpush.bf16.msra.mxu1 %v7424_v14 }
 0x114   : > { %1814 = vmatpush.bf16.msrb.mxu2 %v7378_v16  ;;  %1828 = vmatpush.bf16.msrb.mxu3 %v7386_v17  ;;  %v7409_v16 = vld [vmem:[%s9169_s1 + $0x100] sm:$0xff] }
 0x115   : > { %v7417_v17 = vld [vmem:[%s9169_s1 + $0x140] sm:$0xff] }
 0x118   : > { %1815 = vmatpush.bf16.msrb.mxu2 %v7377_v24  ;;  %1829 = vmatpush.bf16.msrb.mxu3 %v7385_v27 }
 0x171   : > { %v1206_v49 = vpop.f32.mrf.mxu0  ;;  %v1220_v57 = vpop.f32.mrf.mxu1 }
 0x179   : > { %v1208_v15 = vpop.f32.mrf.mxu0  ;;  %v1222_v26 = vpop.f32.mrf.mxu1 }
 0x17e   : > { %v1080_v22 = vpop.f32.mrf.mxu2  ;;  %v1094_v23 = vpop.f32.mrf.mxu3 }
 0x17f   : > { %v1095_v47 = vadd.f32 %v1094_v23, %v1080_v22  ;;  %v7415_v22 = vld [vmem:[%s9169_s1 + $0x130] sm:$0xff] }
 0x180   : > { %v7423_v23 = vld [vmem:[%s9169_s1 + $0x170] sm:$0xff]  ;;  %1979 = vmatpush.bf16.msra.mxu0 %v7415_v22 }
 0x181   : > { %v1207_v58 = vadd.f32 %v1206_v49, %v1095_v47  ;;  %1993 = vmatpush.bf16.msra.mxu1 %v7423_v23  ;;  %v7412_v49 = vld [vmem:[%s9169_s1 + $0x118] sm:$0xff] }
 0x183   : > { %v1221_v8 = vadd.f32 %v1220_v57, %v1207_v58  ;;  %v7419_v57 = vld [vmem:[%s9169_s1 + $0x150] sm:$0xff] }
 0x184   : > { %1980 = vmatpush.bf16.msra.mxu0 %v7414_v35 }
 0x185   : > { %1994 = vmatpush.bf16.msra.mxu1 %v7422_v36 }
 0x186   : > { %v1082_v42 = vpop.f32.mrf.mxu2  ;;  %v1096_v43 = vpop.f32.mrf.mxu3 }
 0x187   : > { %v1097_v7 = vadd.f32 %v1096_v43, %v1082_v42  ;;  %v7421_v42 = vld [vmem:[%s9169_s1 + $0x160] sm:$0xff] }
 0x188   : > { %1981 = vmatpush.bf16.msra.mxu0 %v7413_v40 }
 0x189   : > { %v1209_v19 = vadd.f32 %v1208_v15, %v1097_v7  ;;  %1995 = vmatpush.bf16.msra.mxu1 %v7421_v42  ;;  %v1427_v15 = vld [vmem:[#allocation2 + $0x14] sm:$0x1] }
 0x18b   : > { %v1223_v31 = vadd.f32 %v1222_v26, %v1209_v19 }
 0x18c   : > { %1982 = vmatpush.bf16.msra.mxu0 %v7412_v49 }
 0x18d   : > { %1996 = vmatpush.bf16.msra.mxu1 %v7420_v50 }
 0x18e   : > { %v1376_v1 = vpop.f32.mrf.mxu2  ;;  %v1390_v2 = vpop.f32.mrf.mxu3 }
 0x18f   : > { %v1391_v9 = vadd.f32 %v1390_v2, %v1376_v1  ;;  %v825_v1 = vadd.f32 %v824_v54, %v823_v46  ;;  %v7410_v2 = vld [vmem:[%s9169_s1 + $0x108] sm:$0xff] }
 0x190   : > { %1983 = vmatpush.bf16.msra.mxu0 %v7411_v18 }
 0x191   : > { %v1395_v12 = vadd.f32 %v1391_v9, %v1221_v8  ;;  %1997 = vmatpush.bf16.msra.mxu1 %v7419_v57  ;;  %v835_v8 = vadd.f32 %v834_v61, %v833_v51  ;;  %v826_v14 = vrot.slane %v825_v1, 1 }
 0x193   : > { %v1397_v20 = vadd.f32 %v8026_v41, %v1395_v12  ;;  %v836_v24 = vrot.slane %v835_v8, 1 }
 0x194   : > { %1984 = vmatpush.bf16.msra.mxu0 %v7410_v2 }
 0x195   : > { %7679 = vtanh.f32 %v1397_v20  ;;  %1998 = vmatpush.bf16.msra.mxu1 %v7418_v3 }
 0x196   : > { %v1378_v28 = vpop.f32.mrf.mxu2  ;;  %v1392_v29 = vpop.f32.mrf.mxu3 }
 0x197   : > { %v1393_v33 = vadd.f32 %v1392_v29, %v1378_v28  ;;  %v827_v28 = vadd.f32 %v826_v14, %v825_v1  ;;  %v7432_v14 = vld [vmem:[%s9169_s1 + $0x38] sm:$0xff] }
 0x198   : > { %1985 = vmatpush.bf16.msra.mxu0 %v7409_v16  ;;  %v7446_v16 = vld [vmem:[%s9169_s1 + $0xa8] sm:$0xff] }
 0x199   : > { %v1396_v34 = vadd.f32 %v1393_v33, %v1223_v31  ;;  %1999 = vmatpush.bf16.msra.mxu1 %v7417_v17  ;;  %v837_v33 = vadd.f32 %v836_v24, %v835_v8  ;;  %v7454_v17 = vld [vmem:[%s9169_s1 + $0xe8] sm:$0xff]  ;;  %v5987_v24 = vld [vmem:[%s7793_s20 + $0x18] sm:$0xf] }
 0x19b   : > { %v7680_v37 = vpop.eup %7679  ;;  %v1398_v39 = vadd.f32 %v8026_v41, %v1396_v34 }
 0x19c   : > { %v1401_v43 = vpack.c.bf16 %v7680_v37, %v7680_v37  ;;  %v1440_v56 = vmul.f32 %v7680_v37, %v7680_v37 }
 0x19d   : > { %7681 = vtanh.f32 %v1398_v39 }
 0x19e   : > { %v1404_v45 = vshrl.u32 %v1401_v43, 16  ;;  %v1407_v48 = vshll.u32 %v1401_v43, 16 }
 0x1a0   : > { %v1406_v47 = vrot.slane %v1404_v45, 7 }
 0x1a2   : > { %v1409_v52 = vor.u32 %v1407_v48, %v1406_v47  ;;  %v1410_v9 = vrot.slane %v1406_v47, 4 }
 0x1a3   : > { %v7682_v53 = vpop.eup %7681 }
 0x1a4   : > { %v1424_v58 = vsel %vm7829_vm6, %v1409_v52, %v1423_v55  ;;  %v1402_v59 = vpack.c.bf16 %v7682_v53, %v7682_v53  ;;  %v1432_v21 = vadd.f32 %v7682_v53, %v7680_v37  ;;  %v1441_v60 = vmul.f32 %v7682_v53, %v7682_v53 }
 0x1a5   : > { %1425 = vst [vmem:[#allocation2 + $0x4] sm:$0xf] %v1424_v58 }
 0x1a6   : > { %v1412_v62 = vshrl.u32 %v1402_v59, 16  ;;  %v1433_v63 = vrot.slane %v1432_v21, 4  ;;  %v1442_v0 = vadd.f32 %v1441_v60, %v1440_v56  ;;  %v1415_v5 = vshll.u32 %v1402_v59, 16 }
 0x1a8   : > { %v1414_v4 = vrot.slane %v1412_v62, 7  ;;  %v1434_v6 = vadd.f32 %v1433_v63, %v1432_v21  ;;  %v1443_v7 = vrot.slane %v1442_v0, 4 }
 0x1aa   : > { %v1417_v10 = vor.u32 %v1415_v5, %v1414_v4  ;;  %v1419_v11 = vrot.slane %v1414_v4, 4  ;;  %v1435_v12 = vrot.slane %v1434_v6, 2  ;;  %v1444_v13 = vadd.f32 %v1443_v7, %v1442_v0 }
 0x1ac   : > { %v1418_v19 = vsel %vm7817_vm5, %v1410_v9, %v1417_v10  ;;  %v1428_v20 = vsel %vm7835_vm7, %v1419_v11, %v1427_v15  ;;  %v1436_v22 = vadd.f32 %v1435_v12, %v1434_v6  ;;  %v1445_v23 = vrot.slane %v1444_v13, 2  ;;  %v1480_v36 = vld [vmem:[#allocation2] sm:$0xff]  ;;  %v7448_v10 = vld [vmem:[%s9169_s1 + $0xb8] sm:$0xff]  ;;  %v7447_v12 = vld [vmem:[%s9169_s1 + $0xb0] sm:$0xff] }
 0x1ad   : > { %1426 = vst [vmem:[#allocation2 + $0xc] sm:$0xf] %v1418_v19  ;;  %v1550_v39 = vunpack.c.l.b16 %v1480_v36  ;;  %v1551_v42 = vunpack.c.h.b16 %v1480_v36  ;;  %v1836_v63 = vld [vmem:[#allocation2] sm:$0xee]  ;;  %v7456_v11 = vld [vmem:[%s9169_s1 + $0xf8] sm:$0xff]  ;;  %2293 = vmatpush.bf16.msra.mxu2 %v7448_v10 }
 0x1ae   : > { %1429 = vst [vmem:[#allocation2 + $0x14] sm:$0x1] %v1428_v20  ;;  %v1437_v26 = vrot.slane %v1436_v22, 1  ;;  %v1446_v27 = vadd.f32 %v1445_v23, %v1444_v13  ;;  %v1870_v0 = vunpack.c.l.b16 %v1836_v63  ;;  %v1871_v1 = vunpack.c.h.b16 %v1836_v63  ;;  %2307 = vmatpush.bf16.msra.mxu3 %v7456_v11  ;;  %v7455_v13 = vld [vmem:[%s9169_s1 + $0xf0] sm:$0xff]  ;;  %v7440_v15 = vld [vmem:[%s9169_s1 + $0x78] sm:$0xff] }
 0x1af   : > { %v7439_v23 = vld [vmem:[%s9169_s1 + $0x70] sm:$0xff]  ;;  %v7444_v36 = vld [vmem:[%s9169_s1 + $0x98] sm:$0xff] }
 0x1b0   : > { %v1438_v29 = vadd.f32 %v1437_v26, %v1436_v22  ;;  %v1447_v31 = vrot.slane %v1446_v27, 1  ;;  %v7431_v22 = vld [vmem:[%s9169_s1 + $0x30] sm:$0xff]  ;;  %v7445_v26 = vld [vmem:[%s9169_s1 + $0xa0] sm:$0xff]  ;;  %v7464_v11 = vld [vmem:[%s9169_s1 + $0x138] sm:$0xff] }
 0x1b1   : > { %2294 = vmatpush.bf16.msra.mxu2 %v7447_v12  ;;  %v7472_v12 = vld [vmem:[%s9169_s1 + $0x178] sm:$0xff] }
 0x1b2   : > { %v8274_v34 = vadd.f32 %v1438_v29, %v827_v28  ;;  %v1448_v35 = vadd.f32 %v1447_v31, %v1446_v27  ;;  %2308 = vmatpush.bf16.msra.mxu3 %v7455_v13  ;;  %v7453_v27 = vld [vmem:[%s9169_s1 + $0xe0] sm:$0xff]  ;;  %v2065_v28 = vshrl.u32 %v5987_v24, 16  ;;  %v7430_v29 = vld [vmem:[%s9169_s1 + $0x28] sm:$0xff] }
 0x1b3   : > { %v7438_v31 = vld [vmem:[%s9169_s1 + $0x68] sm:$0xff] }
 0x1b4   : > { %v8276_v37 = vadd.f32 %v1448_v35, %v837_v33  ;;  %v1481_v38 = vld [vmem:[#allocation2 + $0x8] sm:$0xff]  ;;  %v2067_v33 = vrot.slane %v2065_v28, 7  ;;  %v2068_v35 = vshll.u32 %v5987_v24, 16  ;;  %v7433_v24 = vld [vmem:[%s9169_s1 + $0x40] sm:$0xff] }
 0x1b5   : > { %v1552_v40 = vunpack.c.l.b16 %v1481_v38  ;;  %v1553_v43 = vunpack.c.h.b16 %v1481_v38  ;;  %v1514_v44 = vld [vmem:[#allocation2 + $0x10] sm:$0x11]  ;;  %2295 = vmatpush.bf16.msra.mxu2 %v7446_v16  ;;  %v7452_v38 = vld [vmem:[%s9169_s1 + $0xd8] sm:$0xff] }
 0x1b6   : > { %v1554_v45 = vunpack.c.l.b16 %v1514_v44  ;;  %v1555_v46 = vunpack.c.h.b16 %v1514_v44  ;;  %2309 = vmatpush.bf16.msra.mxu3 %v7454_v17  ;;  %v7429_v44 = vld [vmem:[%s9169_s1 + $0x20] sm:$0xff] }
 0x1b7   : > { %v1556_v47 = vpack.c.b16 %v1552_v40, %v1550_v39  ;;  %v1557_v48 = vpack.c.b16 %v1553_v43, %v1551_v42  ;;  %v1872_v2 = vpack.c.b16 %v1552_v40, %v1870_v0  ;;  %v1873_v3 = vpack.c.b16 %v1553_v43, %v1871_v1  ;;  %v2084_v40 = vld [vmem:[#allocation2] sm:$0xf]  ;;  %v7427_v1 = vld [vmem:[%s9169_s1 + $0x10] sm:$0xff] }
 0x1b8   : > { %v1558_v49 = vpack.c.b16 %v1554_v45, %v1554_v45  ;;  %v1559_v50 = vpack.c.b16 %v1555_v46, %v1555_v46  ;;  %v2070_v39 = vor.u32 %v2068_v35, %v2067_v33  ;;  %v7437_v45 = vld [vmem:[%s9169_s1 + $0x60] sm:$0xff]  ;;  %v7470_v35 = vld [vmem:[%s9169_s1 + $0x168] sm:$0xff] }
 0x1b9   : > { %1816 = vmatmul.bf16.vlgmr.msrb.gmra.mxu2 %v1556_v47  ;;  %1830 = vmatmul.bf16.vlgmr.msrb.gmra.mxu3 %v1557_v48  ;;  %v1563_v51 = vshll.u32 %v1556_v47, 16  ;;  %v1575_v52 = vshll.u32 %v1557_v48, 16  ;;  %v1561_v55 = vshrl.u32 %v1556_v47, 16  ;;  %v1573_v18 = vshrl.u32 %v1557_v48, 16  ;;  %v5988_v48 = vld [vmem:[%s7793_s20 + $0x1c] sm:$0xf] }
 0x1ba   : > { %v1568_v53 = vshll.u32 %v1558_v49, 16  ;;  %v1580_v54 = vshll.u32 %v1559_v50, 16  ;;  %v1874_v4 = vrot.slane %v1872_v2, 1  ;;  %v1875_v5 = vrot.slane %v1558_v49, 1  ;;  %2296 = vmatpush.bf16.msra.mxu2 %v7445_v26  ;;  %2310 = vmatpush.bf16.msra.mxu3 %v7453_v27  ;;  %v7435_v2 = vld [vmem:[%s9169_s1 + $0x50] sm:$0xff] }
 0x1bb   : > { %v1565_v56 = vrot.slane %v1563_v51, 1  ;;  %v1577_v57 = vrot.slane %v1575_v52, 1  ;;  %v1877_v6 = vrot.slane %v1873_v3, 1  ;;  %v1878_v7 = vrot.slane %v1559_v50, 1  ;;  %v7443_v50 = vld [vmem:[%s9169_s1 + $0x90] sm:$0xff] }
 0x1bc   : > { %v1570_v59 = vrot.slane %v1568_v53, 1  ;;  %v1582_v60 = vrot.slane %v1580_v54, 1  ;;  %v1876_v8 = vsel %vm648_vm9, %v1874_v4, %v1875_v5  ;;  %v2085_v46 = vsel %vm7829_vm6, %v2070_v39, %v2084_v40  ;;  %v7451_v51 = vld [vmem:[%s9169_s1 + $0xd0] sm:$0xff]  ;;  %v7428_v53 = vld [vmem:[%s9169_s1 + $0x18] sm:$0xff]  ;;  %v7461_v39 = vld [vmem:[%s9169_s1 + $0x120] sm:$0xff] }
 0x1bd   : > { %v1566_v58 = vor.u32 %v1565_v56, %v1561_v55  ;;  %v1578_v21 = vor.u32 %v1577_v57, %v1573_v18  ;;  %v1879_v9 = vsel %vm648_vm9, %v1877_v6, %v1878_v7  ;;  %2086 = vst [vmem:[#allocation2] sm:$0xf] %v2085_v46  ;;  %v2073_v52 = vshrl.u32 %v5988_v48, 16  ;;  %v7436_v54 = vld [vmem:[%s9169_s1 + $0x58] sm:$0xff]  ;;  %v7469_v40 = vld [vmem:[%s9169_s1 + $0x160] sm:$0xff] }
 0x1be   : > { %2297 = vmatpush.bf16.msra.mxu2 %v7444_v36  ;;  %2311 = vmatpush.bf16.msra.mxu3 %v7452_v38  ;;  %v2076_v56 = vshll.u32 %v5988_v48, 16  ;;  %v7468_v46 = vld [vmem:[%s9169_s1 + $0x158] sm:$0xff] }
 0x1bf   : > { %v1571_v61 = vsel %vm332_vm8, %v1566_v58, %v1570_v59  ;;  %v1583_v62 = vsel %vm332_vm8, %v1578_v21, %v1582_v60  ;;  %v2075_v55 = vrot.slane %v2073_v52, 7  ;;  %v7442_v58 = vld [vmem:[%s9169_s1 + $0x88] sm:$0xff]  ;;  %v2071_v21 = vrot.slane %v2067_v33, 4  ;;  %v7467_v52 = vld [vmem:[%s9169_s1 + $0x150] sm:$0xff] }
 0x1c0   : > { %1690 = vmatmul.bf16.vlgmr.msrb.gmra.mxu0 %v1571_v61  ;;  %1704 = vmatmul.bf16.vlgmr.msrb.gmra.mxu1 %v1583_v62  ;;  %v7450_v59 = vld [vmem:[%s9169_s1 + $0xc8] sm:$0xff]  ;;  %v2088_v62 = vld [vmem:[#allocation2 + $0x10] sm:$0x1] }
 0x1c1   : > { %2419 = vmatpush.bf16.msrb.mxu0 %v7432_v14  ;;  %2433 = vmatpush.bf16.msrb.mxu1 %v7440_v15  ;;  %v2078_v60 = vor.u32 %v2076_v56, %v2075_v55  ;;  %v2080_v61 = vrot.slane %v2075_v55, 4  ;;  %v7426_v14 = vld [vmem:[%s9169_s1 + $0x8] sm:$0xff] }
 0x1c2   : > { %2298 = vmatpush.bf16.msra.mxu2 %v7443_v50  ;;  %2312 = vmatpush.bf16.msra.mxu3 %v7451_v51  ;;  %v7434_v15 = vld [vmem:[%s9169_s1 + $0x48] sm:$0xff]  ;;  %v7459_v51 = vld [vmem:[%s9169_s1 + $0x110] sm:$0xff] }
 0x1c3   : > { %v2079_v3 = vsel %vm7817_vm5, %v2071_v21, %v2078_v60  ;;  %v2089_v4 = vsel %vm7835_vm7, %v2080_v61, %v2088_v62  ;;  %v7462_v33 = vld [vmem:[%s9169_s1 + $0x128] sm:$0xff] }
 0x1c4   : > { %2087 = vst [vmem:[#allocation2 + $0x8] sm:$0xf] %v2079_v3  ;;  %v7466_v21 = vld [vmem:[%s9169_s1 + $0x148] sm:$0xff] }
 0x1c5   : > { %2420 = vmatpush.bf16.msrb.mxu0 %v7431_v22  ;;  %2434 = vmatpush.bf16.msrb.mxu1 %v7439_v23  ;;  %2090 = vst [vmem:[#allocation2 + $0x10] sm:$0x1] %v2089_v4  ;;  %v7425_v22 = vld [vmem:[%s9169_s1] sm:$0xff] }
 0x1c6   : > { %2299 = vmatpush.bf16.msra.mxu2 %v7442_v58  ;;  %2313 = vmatpush.bf16.msra.mxu3 %v7450_v59  ;;  %v7458_v59 = vld [vmem:[%s9169_s1 + $0x108] sm:$0xff] }
 0x1c9   : > { %2421 = vmatpush.bf16.msrb.mxu0 %v7430_v29  ;;  %2435 = vmatpush.bf16.msrb.mxu1 %v7438_v31 }
 0x1cd   : > { %2422 = vmatpush.bf16.msrb.mxu0 %v7429_v44  ;;  %2436 = vmatpush.bf16.msrb.mxu1 %v7437_v45 }
 0x1d0   : > { %1986 = vmatmul.bf16.vlgmr.msra.gmra.mxu0 %v1876_v8  ;;  %2000 = vmatmul.bf16.vlgmr.msra.gmra.mxu1 %v1879_v9  ;;  %v7441_v8 = vld [vmem:[%s9169_s1 + $0x80] sm:$0xff] }
 0x1d1   : > { %2423 = vmatpush.bf16.msrb.mxu0 %v7428_v53  ;;  %2437 = vmatpush.bf16.msrb.mxu1 %v7436_v54  ;;  %v7449_v9 = vld [vmem:[%s9169_s1 + $0xc0] sm:$0xff] }
 0x1d2   : > { %2300 = vmatpush.bf16.msra.mxu2 %v7441_v8  ;;  %2314 = vmatpush.bf16.msra.mxu3 %v7449_v9 }
 0x1d5   : > { %2424 = vmatpush.bf16.msrb.mxu0 %v7427_v1  ;;  %2438 = vmatpush.bf16.msrb.mxu1 %v7435_v2 }
 0x1d6   : > { %2589 = vmatpush.bf16.msrb.mxu2 %v7464_v11  ;;  %2603 = vmatpush.bf16.msrb.mxu3 %v7472_v12 }
 0x1d9   : > { %2425 = vmatpush.bf16.msrb.mxu0 %v7426_v14  ;;  %2439 = vmatpush.bf16.msrb.mxu1 %v7434_v15 }
 0x1dd   : > { %2426 = vmatpush.bf16.msrb.mxu0 %v7425_v22  ;;  %2440 = vmatpush.bf16.msrb.mxu1 %v7433_v24 }
 0x23c   : > { %v1817_v49 = vpop.f32.mrf.mxu2  ;;  %v1831_v18 = vpop.f32.mrf.mxu3 }
 0x23d   : > { %v1691_v19 = vpop.f32.mrf.mxu0  ;;  %v1705_v20 = vpop.f32.mrf.mxu1 }
 0x23e   : > { %v1706_v47 = vadd.f32 %v1705_v20, %v1691_v19  ;;  %v7463_v19 = vld [vmem:[%s9169_s1 + $0x130] sm:$0xff] }
 0x23f   : > { %v7471_v20 = vld [vmem:[%s9169_s1 + $0x170] sm:$0xff]  ;;  %2590 = vmatpush.bf16.msrb.mxu2 %v7463_v19 }
 0x240   : > { %v1818_v57 = vadd.f32 %v1817_v49, %v1706_v47  ;;  %2604 = vmatpush.bf16.msrb.mxu3 %v7471_v20  ;;  %v2034_v49 = vld [vmem:[#allocation2 + $0x4] sm:$0xf] }
 0x242   : > { %v1832_v6 = vadd.f32 %v1831_v18, %v1818_v57 }
 0x243   : > { %2591 = vmatpush.bf16.msrb.mxu2 %v7462_v33 }
 0x244   : > { %v1819_v13 = vpop.f32.mrf.mxu2  ;;  %v1833_v23 = vpop.f32.mrf.mxu3  ;;  %2605 = vmatpush.bf16.msrb.mxu3 %v7470_v35 }
 0x245   : > { %v1693_v42 = vpop.f32.mrf.mxu0  ;;  %v1707_v43 = vpop.f32.mrf.mxu1 }
 0x246   : > { %v1708_v5 = vadd.f32 %v1707_v43, %v1693_v42 }
 0x247   : > { %2592 = vmatpush.bf16.msrb.mxu2 %v7461_v39 }
 0x248   : > { %v1820_v16 = vadd.f32 %v1819_v13, %v1708_v5  ;;  %2606 = vmatpush.bf16.msrb.mxu3 %v7469_v40  ;;  %v2038_v5 = vld [vmem:[#allocation2 + $0x14] sm:$0x1] }
 0x24a   : > { %v1834_v28 = vadd.f32 %v1833_v23, %v1820_v16 }
 0x24c   : > { %2607 = vmatpush.bf16.msrb.mxu3 %v7468_v46 }
 0x24d   : > { %v1987_v63 = vpop.f32.mrf.mxu0  ;;  %v2001_v0 = vpop.f32.mrf.mxu1 }
 0x24e   : > { %v2002_v7 = vadd.f32 %v2001_v0, %v1987_v63 }
 0x250   : > { %v2006_v10 = vadd.f32 %v2002_v7, %v1832_v6  ;;  %2608 = vmatpush.bf16.msrb.mxu3 %v7467_v52  ;;  %v7457_v6 = vld [vmem:[%s9169_s1 + $0x100] sm:$0xff] }
 0x251   : > { %v7465_v7 = vld [vmem:[%s9169_s1 + $0x140] sm:$0xff] }
 0x252   : > { %v2008_v17 = vadd.f32 %v8026_v41, %v2006_v10 }
 0x254   : > { %7683 = vtanh.f32 %v2008_v17  ;;  %2609 = vmatpush.bf16.msrb.mxu3 %v7466_v21 }
 0x255   : > { %v1989_v26 = vpop.f32.mrf.mxu0  ;;  %v2003_v27 = vpop.f32.mrf.mxu1 }
 0x256   : > { %v2004_v29 = vadd.f32 %v2003_v27, %v1989_v26 }
 0x258   : > { %v2007_v31 = vadd.f32 %v2004_v29, %v1834_v28  ;;  %2610 = vmatpush.bf16.msrb.mxu3 %v7465_v7  ;;  %v7487_v7 = vld [vmem:[%s9169_s1 + $0x70] sm:$0xff] }
 0x25a   : > { %v7684_v36 = vpop.eup %7683  ;;  %v2009_v38 = vadd.f32 %v8026_v41, %v2007_v31  ;;  %v7460_v41 = vld [vmem:[%s9169_s1 + $0x118] sm:$0xff] }
 0x25b   : > { %v2012_v42 = vpack.c.bf16 %v7684_v36, %v7684_v36  ;;  %v2051_v50 = vmul.f32 %v7684_v36, %v7684_v36  ;;  %2593 = vmatpush.bf16.msrb.mxu2 %v7460_v41 }
 0x25c   : > { %7685 = vtanh.f32 %v2009_v38 }
 0x25d   : > { %v2015_v43 = vshrl.u32 %v2012_v42, 16  ;;  %v2018_v45 = vshll.u32 %v2012_v42, 16 }
 0x25f   : > { %v2017_v44 = vrot.slane %v2015_v43, 7  ;;  %2594 = vmatpush.bf16.msrb.mxu2 %v7459_v51 }
 0x261   : > { %v2020_v47 = vor.u32 %v2018_v45, %v2017_v44  ;;  %v2021_v0 = vrot.slane %v2017_v44, 4 }
 0x262   : > { %v7686_v48 = vpop.eup %7685 }
 0x263   : > { %v2035_v53 = vsel %vm7829_vm6, %v2020_v47, %v2034_v49  ;;  %v2013_v54 = vpack.c.bf16 %v7686_v48, %v7686_v48  ;;  %v2043_v55 = vadd.f32 %v7686_v48, %v7684_v36  ;;  %v2052_v56 = vmul.f32 %v7686_v48, %v7686_v48  ;;  %2595 = vmatpush.bf16.msrb.mxu2 %v7458_v59 }
 0x264   : > { %2036 = vst [vmem:[#allocation2 + $0x4] sm:$0xf] %v2035_v53 }
 0x265   : > { %v2023_v18 = vshrl.u32 %v2013_v54, 16  ;;  %v2044_v57 = vrot.slane %v2043_v55, 4  ;;  %v2053_v58 = vadd.f32 %v2052_v56, %v2051_v50  ;;  %v2026_v61 = vshll.u32 %v2013_v54, 16 }
 0x267   : > { %v2025_v60 = vrot.slane %v2023_v18, 7  ;;  %v2045_v62 = vadd.f32 %v2044_v57, %v2043_v55  ;;  %v2054_v63 = vrot.slane %v2053_v58, 4  ;;  %2596 = vmatpush.bf16.msrb.mxu2 %v7457_v6  ;;  %v7479_v6 = vld [vmem:[%s9169_s1 + $0x30] sm:$0xff] }
 0x269   : > { %v2028_v1 = vor.u32 %v2026_v61, %v2025_v60  ;;  %v2030_v2 = vrot.slane %v2025_v60, 4  ;;  %v2046_v3 = vrot.slane %v2045_v62, 2  ;;  %v2055_v4 = vadd.f32 %v2054_v63, %v2053_v58  ;;  %v7496_v60 = vld [vmem:[%s9169_s1 + $0xb8] sm:$0xff]  ;;  %v7503_v63 = vld [vmem:[%s9169_s1 + $0xf0] sm:$0xff] }
 0x26a   : > { %v7504_v61 = vld [vmem:[%s9169_s1 + $0xf8] sm:$0xff]  ;;  %2904 = vmatpush.bf16.msra.mxu0 %v7496_v60 }
 0x26b   : > { %v2029_v8 = vsel %vm7817_vm5, %v2021_v0, %v2028_v1  ;;  %v2039_v9 = vsel %vm7835_vm7, %v2030_v2, %v2038_v5  ;;  %v2047_v10 = vadd.f32 %v2046_v3, %v2045_v62  ;;  %v2056_v11 = vrot.slane %v2055_v4, 2  ;;  %v2091_v19 = vld [vmem:[#allocation2] sm:$0xff]  ;;  %2918 = vmatpush.bf16.msra.mxu1 %v7504_v61  ;;  %v7495_v62 = vld [vmem:[%s9169_s1 + $0xb0] sm:$0xff]  ;;  %v7480_v0 = vld [vmem:[%s9169_s1 + $0x38] sm:$0xff] }
 0x26c   : > { %2037 = vst [vmem:[#allocation2 + $0xc] sm:$0xf] %v2029_v8  ;;  %v2161_v23 = vunpack.c.l.b16 %v2091_v19  ;;  %v2162_v26 = vunpack.c.h.b16 %v2091_v19  ;;  %v2447_v51 = vld [vmem:[#allocation2] sm:$0xee]  ;;  %v7488_v1 = vld [vmem:[%s9169_s1 + $0x78] sm:$0xff]  ;;  %v7494_v2 = vld [vmem:[%s9169_s1 + $0xa8] sm:$0xff] }
 0x26d   : > { %2040 = vst [vmem:[#allocation2 + $0x14] sm:$0x1] %v2039_v9  ;;  %v2048_v12 = vrot.slane %v2047_v10, 1  ;;  %v2057_v13 = vadd.f32 %v2056_v11, %v2055_v4  ;;  %v2481_v52 = vunpack.c.l.b16 %v2447_v51  ;;  %v2482_v53 = vunpack.c.h.b16 %v2447_v51  ;;  %v7502_v3 = vld [vmem:[%s9169_s1 + $0xe8] sm:$0xff]  ;;  %v6245_v8 = vld [vmem:[%s7793_s20 + $0x20] sm:$0xf] }
 0x26e   : > { %2905 = vmatpush.bf16.msra.mxu0 %v7495_v62  ;;  %v7493_v9 = vld [vmem:[%s9169_s1 + $0xa0] sm:$0xff]  ;;  %v2676_v11 = vshrl.u32 %v6245_v8, 16  ;;  %v7500_v19 = vld [vmem:[%s9169_s1 + $0xd8] sm:$0xff] }
 0x26f   : > { %v2049_v14 = vadd.f32 %v2048_v12, %v2047_v10  ;;  %v2058_v15 = vrot.slane %v2057_v13, 1  ;;  %2919 = vmatpush.bf16.msra.mxu1 %v7503_v63  ;;  %v7501_v10 = vld [vmem:[%s9169_s1 + $0xe0] sm:$0xff]  ;;  %v7478_v12 = vld [vmem:[%s9169_s1 + $0x28] sm:$0xff]  ;;  %v7512_v60 = vld [vmem:[%s9169_s1 + $0x138] sm:$0xff] }
 0x270   : > { %v7520_v61 = vld [vmem:[%s9169_s1 + $0x178] sm:$0xff]  ;;  %v7474_v63 = vld [vmem:[%s9169_s1 + $0x8] sm:$0xff] }
 0x271   : > { %v8443_v16 = vadd.f32 %v2049_v14, %v8274_v34  ;;  %v2059_v17 = vadd.f32 %v2058_v15, %v2057_v13  ;;  %v7486_v13 = vld [vmem:[%s9169_s1 + $0x68] sm:$0xff]  ;;  %v2678_v14 = vrot.slane %v2676_v11, 7  ;;  %v2679_v15 = vshll.u32 %v6245_v8, 16  ;;  %v7481_v8 = vld [vmem:[%s9169_s1 + $0x40] sm:$0xff] }
 0x272   : > { %2906 = vmatpush.bf16.msra.mxu0 %v7494_v2  ;;  %v8559_v2 = vld [vmem:[%s9170_s2] ss:$0 sm:$0xff] }
 0x273   : > { %v8446_v20 = vadd.f32 %v2059_v17, %v8276_v37  ;;  %v2092_v22 = vld [vmem:[#allocation2 + $0x8] sm:$0xff]  ;;  %2920 = vmatpush.bf16.msra.mxu1 %v7502_v3  ;;  %v7492_v17 = vld [vmem:[%s9169_s1 + $0x98] sm:$0xff] }
 0x274   : > { %v2163_v24 = vunpack.c.l.b16 %v2092_v22  ;;  %v2164_v27 = vunpack.c.h.b16 %v2092_v22  ;;  %v2125_v28 = vld [vmem:[#allocation2 + $0x10] sm:$0x11]  ;;  %v2681_v22 = vor.u32 %v2679_v15, %v2678_v14  ;;  %v7518_v15 = vld [vmem:[%s9169_s1 + $0x168] sm:$0xff] }
 0x275   : > { %v2165_v29 = vunpack.c.l.b16 %v2125_v28  ;;  %v2166_v31 = vunpack.c.h.b16 %v2125_v28  ;;  %v7485_v28 = vld [vmem:[%s9169_s1 + $0x60] sm:$0xff] }
 0x276   : > { %v2167_v33 = vpack.c.b16 %v2163_v24, %v2161_v23  ;;  %v2168_v35 = vpack.c.b16 %v2164_v27, %v2162_v26  ;;  %v2483_v54 = vpack.c.b16 %v2163_v24, %v2481_v52  ;;  %v2484_v55 = vpack.c.b16 %v2164_v27, %v2482_v53  ;;  %2907 = vmatpush.bf16.msra.mxu0 %v7493_v9  ;;  %v2695_v23 = vld [vmem:[#allocation2] sm:$0xf]  ;;  %v7475_v52 = vld [vmem:[%s9169_s1 + $0x10] sm:$0xff] }
 0x277   : > { %v2169_v36 = vpack.c.b16 %v2165_v29, %v2165_v29  ;;  %v2170_v38 = vpack.c.b16 %v2166_v31, %v2166_v31  ;;  %2921 = vmatpush.bf16.msra.mxu1 %v7501_v10  ;;  %v7477_v27 = vld [vmem:[%s9169_s1 + $0x20] sm:$0xff]  ;;  %v2696_v29 = vsel %vm7829_vm6, %v2681_v22, %v2695_v23  ;;  %v7483_v53 = vld [vmem:[%s9169_s1 + $0x50] sm:$0xff]  ;;  %v6503_v23 = vld [vmem:[%s7793_s20 + $0x28] sm:$0xf] }
 0x278   : > { %2427 = vmatmul.bf16.vlgmr.msrb.gmra.mxu0 %v2167_v33  ;;  %2441 = vmatmul.bf16.vlgmr.msrb.gmra.mxu1 %v2168_v35  ;;  %v2174_v34 = vshll.u32 %v2167_v33, 16  ;;  %v2186_v39 = vshll.u32 %v2168_v35, 16  ;;  %v2172_v37 = vshrl.u32 %v2167_v33, 16  ;;  %v2184_v44 = vshrl.u32 %v2168_v35, 16  ;;  %v6246_v33 = vld [vmem:[%s7793_s20 + $0x24] sm:$0xf] }
 0x279   : > { %v2179_v40 = vshll.u32 %v2169_v36, 16  ;;  %v2191_v42 = vshll.u32 %v2170_v38, 16  ;;  %v2485_v56 = vrot.slane %v2483_v54, 1  ;;  %v2486_v18 = vrot.slane %v2169_v36, 1  ;;  %2697 = vst [vmem:[#allocation2] sm:$0xf] %v2696_v29 }
 0x27a   : > { %v2176_v43 = vrot.slane %v2174_v34, 1  ;;  %v2188_v45 = vrot.slane %v2186_v39, 1  ;;  %v2488_v57 = vrot.slane %v2484_v55, 1  ;;  %v2489_v58 = vrot.slane %v2170_v38, 1  ;;  %2908 = vmatpush.bf16.msra.mxu0 %v7492_v17  ;;  %v7491_v36 = vld [vmem:[%s9169_s1 + $0x90] sm:$0xff]  ;;  %v7476_v39 = vld [vmem:[%s9169_s1 + $0x18] sm:$0xff] }
 0x27b   : > { %v2181_v46 = vrot.slane %v2179_v40, 1  ;;  %v2193_v48 = vrot.slane %v2191_v42, 1  ;;  %v2487_v59 = vsel %vm648_vm9, %v2485_v56, %v2486_v18  ;;  %2922 = vmatpush.bf16.msra.mxu1 %v7500_v19  ;;  %v7499_v38 = vld [vmem:[%s9169_s1 + $0xd0] sm:$0xff]  ;;  %v2684_v34 = vshrl.u32 %v6246_v33, 16  ;;  %v7484_v40 = vld [vmem:[%s9169_s1 + $0x58] sm:$0xff] }
 0x27c   : > { %v2177_v41 = vor.u32 %v2176_v43, %v2172_v37  ;;  %v2189_v47 = vor.u32 %v2188_v45, %v2184_v44  ;;  %v2490_v21 = vsel %vm648_vm9, %v2488_v57, %v2489_v58  ;;  %v2687_v37 = vshll.u32 %v6246_v33, 16  ;;  %v7490_v45 = vld [vmem:[%s9169_s1 + $0x88] sm:$0xff]  ;;  %v7489_v58 = vld [vmem:[%s9169_s1 + $0x80] sm:$0xff]  ;;  %v7508_v33 = vld [vmem:[%s9169_s1 + $0x118] sm:$0xff] }
 0x27d   : > { %v2686_v42 = vrot.slane %v2684_v34, 7 }
 0x27e   : > { %v2182_v49 = vsel %vm332_vm8, %v2177_v41, %v2181_v46  ;;  %v2194_v50 = vsel %vm332_vm8, %v2189_v47, %v2193_v48  ;;  %2909 = vmatpush.bf16.msra.mxu0 %v7491_v36  ;;  %v7498_v41 = vld [vmem:[%s9169_s1 + $0xc8] sm:$0xff]  ;;  %v2682_v46 = vrot.slane %v2678_v14, 4 }
 0x27f   : > { %2301 = vmatmul.bf16.vlgmr.msra.gmra.mxu2 %v2182_v49  ;;  %2315 = vmatmul.bf16.vlgmr.msra.gmra.mxu3 %v2194_v50  ;;  %v2689_v47 = vor.u32 %v2687_v37, %v2686_v42  ;;  %v2691_v48 = vrot.slane %v2686_v42, 4  ;;  %v2699_v49 = vld [vmem:[#allocation2 + $0x10] sm:$0x1]  ;;  %v7510_v14 = vld [vmem:[%s9169_s1 + $0x128] sm:$0xff]  ;;  %v3290_v37 = vshll.u32 %v6503_v23, 16 }
 0x280   : > { %3030 = vmatpush.bf16.msra.mxu2 %v7480_v0  ;;  %3044 = vmatpush.bf16.msra.mxu3 %v7488_v1  ;;  %v7482_v0 = vld [vmem:[%s9169_s1 + $0x48] sm:$0xff] }
 0x281   : > { %2923 = vmatpush.bf16.msra.mxu1 %v7499_v38  ;;  %v2690_v54 = vsel %vm7817_vm5, %v2682_v46, %v2689_v47  ;;  %v2700_v55 = vsel %vm7835_vm7, %v2691_v48, %v2699_v49  ;;  %v6504_v38 = vld [vmem:[%s7793_s20 + $0x2c] sm:$0xf]  ;;  %v7507_v46 = vld [vmem:[%s9169_s1 + $0x110] sm:$0xff] }
 0x282   : > { %2910 = vmatpush.bf16.msra.mxu0 %v7490_v45  ;;  %2698 = vst [vmem:[#allocation2 + $0x8] sm:$0xf] %v2690_v54  ;;  %v3295_v47 = vshrl.u32 %v6504_v38, 16  ;;  %v7515_v48 = vld [vmem:[%s9169_s1 + $0x150] sm:$0xff] }
 0x283   : > { %2701 = vst [vmem:[#allocation2 + $0x10] sm:$0x1] %v2700_v55 }
 0x284   : > { %3031 = vmatpush.bf16.msra.mxu2 %v7479_v6  ;;  %3045 = vmatpush.bf16.msra.mxu3 %v7487_v7  ;;  %v7473_v6 = vld [vmem:[%s9169_s1] sm:$0xff] }
 0x285   : > { %2924 = vmatpush.bf16.msra.mxu1 %v7498_v41 }
 0x286   : > { %2911 = vmatpush.bf16.msra.mxu0 %v7489_v58 }
 0x288   : > { %3032 = vmatpush.bf16.msra.mxu2 %v7478_v12  ;;  %3046 = vmatpush.bf16.msra.mxu3 %v7486_v13 }
 0x28a   : > { %3200 = vmatpush.bf16.msrb.mxu0 %v7512_v60  ;;  %v7514_v60 = vld [vmem:[%s9169_s1 + $0x148] sm:$0xff] }
 0x28c   : > { %3033 = vmatpush.bf16.msra.mxu2 %v7477_v27  ;;  %3047 = vmatpush.bf16.msra.mxu3 %v7485_v28  ;;  %v3287_v28 = vshrl.u32 %v6503_v23, 16 }
 0x28e   : > { %v3289_v42 = vrot.slane %v3287_v28, 7 }
 0x28f   : > { %2597 = vmatmul.bf16.vlgmr.msrb.gmra.mxu2 %v2487_v59  ;;  %2611 = vmatmul.bf16.vlgmr.msrb.gmra.mxu3 %v2490_v21  ;;  %v7497_v59 = vld [vmem:[%s9169_s1 + $0xc0] sm:$0xff] }
 0x290   : > { %3034 = vmatpush.bf16.msra.mxu2 %v7476_v39  ;;  %3048 = vmatpush.bf16.msra.mxu3 %v7484_v40  ;;  %v2645_v39 = vld [vmem:[#allocation2 + $0x4] sm:$0xf] }
 0x291   : > { %2925 = vmatpush.bf16.msra.mxu1 %v7497_v59  ;;  %v8606_v59 = vrot.slane %v3295_v47, 7 }
 0x294   : > { %3035 = vmatpush.bf16.msra.mxu2 %v7475_v52  ;;  %3049 = vmatpush.bf16.msra.mxu3 %v7483_v53  ;;  %v3292_v52 = vor.u32 %v3290_v37, %v3289_v42 }
 0x295   : > { %3214 = vmatpush.bf16.msrb.mxu1 %v7520_v61 }
 0x298   : > { %3036 = vmatpush.bf16.msra.mxu2 %v7474_v63  ;;  %3050 = vmatpush.bf16.msra.mxu3 %v7482_v0 }
 0x29c   : > { %3037 = vmatpush.bf16.msra.mxu2 %v7473_v6  ;;  %3051 = vmatpush.bf16.msra.mxu3 %v7481_v8  ;;  %v7505_v8 = vld [vmem:[%s9169_s1 + $0x100] sm:$0xff] }
 0x2f5   : > { %v2428_v35 = vpop.f32.mrf.mxu0  ;;  %v2442_v43 = vpop.f32.mrf.mxu1 }
 0x2fd   : > { %v2430_v62 = vpop.f32.mrf.mxu0  ;;  %v2444_v7 = vpop.f32.mrf.mxu1 }
 0x302   : > { %v2302_v4 = vpop.f32.mrf.mxu2  ;;  %v2316_v5 = vpop.f32.mrf.mxu3 }
 0x303   : > { %v2317_v31 = vadd.f32 %v2316_v5, %v2302_v4  ;;  %v7511_v4 = vld [vmem:[%s9169_s1 + $0x130] sm:$0xff] }
 0x304   : > { %v7519_v5 = vld [vmem:[%s9169_s1 + $0x170] sm:$0xff]  ;;  %3201 = vmatpush.bf16.msrb.mxu0 %v7511_v4 }
 0x305   : > { %v2429_v44 = vadd.f32 %v2428_v35, %v2317_v31  ;;  %3215 = vmatpush.bf16.msrb.mxu1 %v7519_v5  ;;  %v7516_v35 = vld [vmem:[%s9169_s1 + $0x158] sm:$0xff] }
 0x307   : > { %v2443_v18 = vadd.f32 %v2442_v43, %v2429_v44 }
 0x308   : > { %3202 = vmatpush.bf16.msrb.mxu0 %v7510_v14 }
 0x309   : > { %3216 = vmatpush.bf16.msrb.mxu1 %v7518_v15 }
 0x30a   : > { %v2304_v24 = vpop.f32.mrf.mxu2  ;;  %v2318_v26 = vpop.f32.mrf.mxu3 }
 0x30b   : > { %v2319_v56 = vadd.f32 %v2318_v26, %v2304_v24  ;;  %v7509_v24 = vld [vmem:[%s9169_s1 + $0x120] sm:$0xff] }
 0x30c   : > { %v7517_v26 = vld [vmem:[%s9169_s1 + $0x160] sm:$0xff]  ;;  %3203 = vmatpush.bf16.msrb.mxu0 %v7509_v24 }
 0x30d   : > { %v2431_v1 = vadd.f32 %v2430_v62, %v2319_v56  ;;  %3217 = vmatpush.bf16.msrb.mxu1 %v7517_v26 }
 0x30f   : > { %v2445_v11 = vadd.f32 %v2444_v7, %v2431_v1  ;;  %v2649_v1 = vld [vmem:[#allocation2 + $0x14] sm:$0x1] }
 0x310   : > { %3204 = vmatpush.bf16.msrb.mxu0 %v7508_v33 }
 0x311   : > { %3218 = vmatpush.bf16.msrb.mxu1 %v7516_v35 }
 0x312   : > { %v2598_v50 = vpop.f32.mrf.mxu2  ;;  %v2612_v51 = vpop.f32.mrf.mxu3 }
 0x313   : > { %v2613_v57 = vadd.f32 %v2612_v51, %v2598_v50 }
 0x314   : > { %3205 = vmatpush.bf16.msrb.mxu0 %v7507_v46 }
 0x315   : > { %v2617_v21 = vadd.f32 %v2613_v57, %v2443_v18  ;;  %v3306_v18 = vld [vmem:[#allocation2] sm:$0xf]  ;;  %v7506_v57 = vld [vmem:[%s9169_s1 + $0x108] sm:$0xff]  ;;  %3219 = vmatpush.bf16.msrb.mxu1 %v7515_v48 }
 0x317   : > { %v2619_v3 = vadd.f32 %v8559_v2, %v2617_v21  ;;  %v3298_v21 = vshll.u32 %v6504_v38, 16 }
 0x318   : > { %3206 = vmatpush.bf16.msrb.mxu0 %v7506_v57 }
 0x319   : > { %7687 = vtanh.f32 %v2619_v3  ;;  %v3307_v3 = vsel %vm7829_vm6, %v3292_v52, %v3306_v18  ;;  %3220 = vmatpush.bf16.msrb.mxu1 %v7514_v60  ;;  %v3300_v14 = vor.u32 %v3298_v21, %v8606_v59 }
 0x31a   : > { %v2600_v9 = vpop.f32.mrf.mxu2  ;;  %v2614_v10 = vpop.f32.mrf.mxu3 }
 0x31b   : > { %v2615_v12 = vadd.f32 %v2614_v10, %v2600_v9  ;;  %v3293_v9 = vrot.slane %v3289_v42, 4  ;;  %v7513_v10 = vld [vmem:[%s9169_s1 + $0x140] sm:$0xff] }
 0x31c   : > { %3207 = vmatpush.bf16.msrb.mxu0 %v7505_v8 }
 0x31d   : > { %v2618_v13 = vadd.f32 %v2615_v12, %v2445_v11  ;;  %3221 = vmatpush.bf16.msrb.mxu1 %v7513_v10  ;;  %v3301_v24 = vsel %vm7817_vm5, %v3293_v9, %v3300_v14  ;;  %v7527_v9 = vld [vmem:[%s9169_s1 + $0x30] sm:$0xff]  ;;  %v7534_v14 = vld [vmem:[%s9169_s1 + $0x68] sm:$0xff] }
 0x31e   : > { %v7535_v10 = vld [vmem:[%s9169_s1 + $0x70] sm:$0xff] }
 0x31f   : > { %v7688_v17 = vpop.eup %7687  ;;  %v2620_v19 = vadd.f32 %v8559_v2, %v2618_v13 }
 0x320   : > { %v2623_v22 = vpack.c.bf16 %v7688_v17, %v7688_v17  ;;  %v2662_v40 = vmul.f32 %v7688_v17, %v7688_v17 }
 0x321   : > { %7689 = vtanh.f32 %v2620_v19 }
 0x322   : > { %v2626_v27 = vshrl.u32 %v2623_v22, 16  ;;  %v2629_v31 = vshll.u32 %v2623_v22, 16 }
 0x324   : > { %v2628_v29 = vrot.slane %v2626_v27, 7 }
 0x326   : > { %v2631_v36 = vor.u32 %v2629_v31, %v2628_v29  ;;  %v2632_v58 = vrot.slane %v2628_v29, 4 }
 0x327   : > { %v7690_v34 = vpop.eup %7689 }
 0x328   : > { %v2646_v43 = vsel %vm7829_vm6, %v2631_v36, %v2645_v39  ;;  %v2624_v44 = vpack.c.bf16 %v7690_v34, %v7690_v34  ;;  %v2654_v45 = vadd.f32 %v7690_v34, %v7688_v17  ;;  %v2663_v41 = vmul.f32 %v7690_v34, %v7690_v34 }
 0x329   : > { %2647 = vst [vmem:[#allocation2 + $0x4] sm:$0xf] %v2646_v43 }
 0x32a   : > { %v2634_v49 = vshrl.u32 %v2624_v44, 16  ;;  %v2655_v50 = vrot.slane %v2654_v45, 4  ;;  %v2664_v51 = vadd.f32 %v2663_v41, %v2662_v40  ;;  %v2637_v54 = vshll.u32 %v2624_v44, 16 }
 0x32c   : > { %v2636_v53 = vrot.slane %v2634_v49, 7  ;;  %v2656_v55 = vadd.f32 %v2655_v50, %v2654_v45  ;;  %v2665_v56 = vrot.slane %v2664_v51, 4 }
 0x32e   : > { %v2639_v61 = vor.u32 %v2637_v54, %v2636_v53  ;;  %v2641_v62 = vrot.slane %v2636_v53, 4  ;;  %v2657_v63 = vrot.slane %v2656_v55, 2  ;;  %v2666_v0 = vadd.f32 %v2665_v56, %v2664_v51 }
 0x330   : > { %v2640_v4 = vsel %vm7817_vm5, %v2632_v58, %v2639_v61  ;;  %v2650_v5 = vsel %vm7835_vm7, %v2641_v62, %v2649_v1  ;;  %v2658_v6 = vadd.f32 %v2657_v63, %v2656_v55  ;;  %v2667_v7 = vrot.slane %v2666_v0, 2  ;;  %v2702_v13 = vld [vmem:[#allocation2] sm:$0xff]  ;;  %v7544_v62 = vld [vmem:[%s9169_s1 + $0xb8] sm:$0xff]  ;;  %v7551_v1 = vld [vmem:[%s9169_s1 + $0xf0] sm:$0xff] }
 0x331   : > { %2648 = vst [vmem:[#allocation2 + $0xc] sm:$0xf] %v2640_v4  ;;  %v3058_v15 = vld [vmem:[#allocation2] sm:$0xee]  ;;  %v2772_v28 = vunpack.c.l.b16 %v2702_v13  ;;  %v2773_v31 = vunpack.c.h.b16 %v2702_v13  ;;  %v7552_v63 = vld [vmem:[%s9169_s1 + $0xf8] sm:$0xff]  ;;  %3515 = vmatpush.bf16.msrb.mxu2 %v7544_v62  ;;  %v7526_v13 = vld [vmem:[%s9169_s1 + $0x28] sm:$0xff] }
 0x332   : > { %v2659_v11 = vrot.slane %v2658_v6, 1  ;;  %v2668_v12 = vadd.f32 %v2667_v7, %v2666_v0  ;;  %2651 = vst [vmem:[#allocation2 + $0x14] sm:$0x1] %v2650_v5  ;;  %v3092_v53 = vunpack.c.l.b16 %v3058_v15  ;;  %v3093_v54 = vunpack.c.h.b16 %v3058_v15  ;;  %3529 = vmatpush.bf16.msrb.mxu3 %v7552_v63  ;;  %v7543_v0 = vld [vmem:[%s9169_s1 + $0xb0] sm:$0xff]  ;;  %v7536_v4 = vld [vmem:[%s9169_s1 + $0x78] sm:$0xff]  ;;  %v7542_v5 = vld [vmem:[%s9169_s1 + $0xa8] sm:$0xff] }
 0x333   : > { %3308 = vst [vmem:[#allocation2] sm:$0xf] %v3307_v3  ;;  %v7528_v3 = vld [vmem:[%s9169_s1 + $0x38] sm:$0xff] }
 0x334   : > { %v2660_v17 = vadd.f32 %v2659_v11, %v2658_v6  ;;  %v2669_v19 = vrot.slane %v2668_v12, 1  ;;  %v7550_v6 = vld [vmem:[%s9169_s1 + $0xe8] sm:$0xff]  ;;  %v7541_v11 = vld [vmem:[%s9169_s1 + $0xa0] sm:$0xff]  ;;  %v7540_v15 = vld [vmem:[%s9169_s1 + $0x98] sm:$0xff] }
 0x335   : > { %3516 = vmatpush.bf16.msrb.mxu2 %v7543_v0 }
 0x336   : > { %v8625_v22 = vadd.f32 %v2660_v17, %v8443_v16  ;;  %v2670_v23 = vadd.f32 %v2669_v19, %v2668_v12  ;;  %3530 = vmatpush.bf16.msrb.mxu3 %v7551_v1  ;;  %v7549_v12 = vld [vmem:[%s9169_s1 + $0xe0] sm:$0xff]  ;;  %v7548_v17 = vld [vmem:[%s9169_s1 + $0xd8] sm:$0xff] }
 0x338   : > { %v8630_v26 = vadd.f32 %v2670_v23, %v8446_v20  ;;  %v2703_v27 = vld [vmem:[#allocation2 + $0x8] sm:$0xff] }
 0x339   : > { %v2774_v29 = vunpack.c.l.b16 %v2703_v27  ;;  %3309 = vst [vmem:[#allocation2 + $0x8] sm:$0xf] %v3301_v24  ;;  %v2775_v33 = vunpack.c.h.b16 %v2703_v27  ;;  %v2736_v35 = vld [vmem:[#allocation2 + $0x10] sm:$0x11]  ;;  %3517 = vmatpush.bf16.msrb.mxu2 %v7542_v5  ;;  %v7525_v24 = vld [vmem:[%s9169_s1 + $0x20] sm:$0xff] }
 0x33a   : > { %v2776_v36 = vunpack.c.l.b16 %v2736_v35  ;;  %v2777_v38 = vunpack.c.h.b16 %v2736_v35  ;;  %3531 = vmatpush.bf16.msrb.mxu3 %v7550_v6  ;;  %v7533_v27 = vld [vmem:[%s9169_s1 + $0x60] sm:$0xff]  ;;  %v3302_v35 = vrot.slane %v8606_v59, 4  ;;  %v7546_v59 = vld [vmem:[%s9169_s1 + $0xc8] sm:$0xff] }
 0x33b   : > { %v2778_v34 = vpack.c.b16 %v2774_v29, %v2772_v28  ;;  %v2779_v39 = vpack.c.b16 %v2775_v33, %v2773_v31  ;;  %v3094_v55 = vpack.c.b16 %v2774_v29, %v3092_v53  ;;  %v3095_v56 = vpack.c.b16 %v2775_v33, %v3093_v54  ;;  %v7539_v31 = vld [vmem:[%s9169_s1 + $0x90] sm:$0xff]  ;;  %v7522_v53 = vld [vmem:[%s9169_s1 + $0x8] sm:$0xff] }
 0x33c   : > { %v2780_v16 = vpack.c.b16 %v2776_v36, %v2776_v36  ;;  %v2781_v40 = vpack.c.b16 %v2777_v38, %v2777_v38  ;;  %v7547_v33 = vld [vmem:[%s9169_s1 + $0xd0] sm:$0xff]  ;;  %v7524_v36 = vld [vmem:[%s9169_s1 + $0x18] sm:$0xff]  ;;  %v7530_v54 = vld [vmem:[%s9169_s1 + $0x48] sm:$0xff] }
 0x33d   : > { %3038 = vmatmul.bf16.vlgmr.msra.gmra.mxu2 %v2778_v34  ;;  %3052 = vmatmul.bf16.vlgmr.msra.gmra.mxu3 %v2779_v39  ;;  %v2785_v42 = vshll.u32 %v2778_v34, 16  ;;  %v2797_v37 = vshll.u32 %v2779_v39, 16  ;;  %v2783_v44 = vshrl.u32 %v2778_v34, 16  ;;  %v2795_v41 = vshrl.u32 %v2779_v39, 16  ;;  %v7532_v38 = vld [vmem:[%s9169_s1 + $0x58] sm:$0xff] }
 0x33e   : > { %v2790_v43 = vshll.u32 %v2780_v16, 16  ;;  %v2802_v20 = vshll.u32 %v2781_v40, 16  ;;  %v3096_v18 = vrot.slane %v3094_v55, 1  ;;  %v3097_v57 = vrot.slane %v2780_v16, 1  ;;  %3518 = vmatpush.bf16.msrb.mxu2 %v7541_v11  ;;  %3532 = vmatpush.bf16.msrb.mxu3 %v7549_v12  ;;  %v3310_v34 = vld [vmem:[#allocation2 + $0x10] sm:$0x1] }
 0x33f   : > { %v2787_v45 = vrot.slane %v2785_v42, 1  ;;  %v2799_v46 = vrot.slane %v2797_v37, 1  ;;  %v3099_v58 = vrot.slane %v3095_v56, 1  ;;  %v3100_v21 = vrot.slane %v2781_v40, 1  ;;  %v7538_v40 = vld [vmem:[%s9169_s1 + $0x88] sm:$0xff] }
 0x340   : > { %v2792_v48 = vrot.slane %v2790_v43, 1  ;;  %v2804_v50 = vrot.slane %v2802_v20, 1  ;;  %v3098_v60 = vsel %vm648_vm9, %v3096_v18, %v3097_v57  ;;  %v7523_v43 = vld [vmem:[%s9169_s1 + $0x10] sm:$0xff] }
 0x341   : > { %v2788_v47 = vor.u32 %v2787_v45, %v2783_v44  ;;  %v2800_v49 = vor.u32 %v2799_v46, %v2795_v41  ;;  %v3101_v61 = vsel %vm648_vm9, %v3099_v58, %v3100_v21  ;;  %v7531_v20 = vld [vmem:[%s9169_s1 + $0x50] sm:$0xff]  ;;  %v3311_v44 = vsel %vm7835_vm7, %v3302_v35, %v3310_v34  ;;  %v7521_v58 = vld [vmem:[%s9169_s1] sm:$0xff] }
 0x342   : > { %3519 = vmatpush.bf16.msrb.mxu2 %v7540_v15  ;;  %3533 = vmatpush.bf16.msrb.mxu3 %v7548_v17  ;;  %3312 = vst [vmem:[#allocation2 + $0x10] sm:$0x1] %v3311_v44  ;;  %v7559_v18 = vld [vmem:[%s9169_s1 + $0x130] sm:$0xff]  ;;  %v7556_v15 = vld [vmem:[%s9169_s1 + $0x118] sm:$0xff] }
 0x343   : > { %v2793_v51 = vsel %vm332_vm8, %v2788_v47, %v2792_v48  ;;  %v2805_v52 = vsel %vm332_vm8, %v2800_v49, %v2804_v50  ;;  %v7537_v47 = vld [vmem:[%s9169_s1 + $0x80] sm:$0xff]  ;;  %v7560_v50 = vld [vmem:[%s9169_s1 + $0x138] sm:$0xff]  ;;  %v7567_v57 = vld [vmem:[%s9169_s1 + $0x170] sm:$0xff] }
 0x344   : > { %2912 = vmatmul.bf16.vlgmr.msra.gmra.mxu0 %v2793_v51  ;;  %2926 = vmatmul.bf16.vlgmr.msra.gmra.mxu1 %v2805_v52  ;;  %v7545_v48 = vld [vmem:[%s9169_s1 + $0xc0] sm:$0xff]  ;;  %v7568_v51 = vld [vmem:[%s9169_s1 + $0x178] sm:$0xff]  ;;  %v7555_v34 = vld [vmem:[%s9169_s1 + $0x110] sm:$0xff] }
 0x345   : > { %3641 = vmatpush.bf16.msra.mxu0 %v7528_v3  ;;  %3655 = vmatpush.bf16.msra.mxu1 %v7536_v4  ;;  %v7558_v3 = vld [vmem:[%s9169_s1 + $0x128] sm:$0xff]  ;;  %v7564_v17 = vld [vmem:[%s9169_s1 + $0x158] sm:$0xff] }
 0x346   : > { %3520 = vmatpush.bf16.msrb.mxu2 %v7539_v31  ;;  %3534 = vmatpush.bf16.msrb.mxu3 %v7547_v33  ;;  %v7566_v4 = vld [vmem:[%s9169_s1 + $0x168] sm:$0xff] }
 0x349   : > { %3642 = vmatpush.bf16.msra.mxu0 %v7527_v9  ;;  %3656 = vmatpush.bf16.msra.mxu1 %v7535_v10  ;;  %v7557_v9 = vld [vmem:[%s9169_s1 + $0x120] sm:$0xff] }
 0x34a   : > { %3521 = vmatpush.bf16.msrb.mxu2 %v7538_v40  ;;  %3535 = vmatpush.bf16.msrb.mxu3 %v7546_v59  ;;  %v7565_v10 = vld [vmem:[%s9169_s1 + $0x160] sm:$0xff] }
 0x34d   : > { %3643 = vmatpush.bf16.msra.mxu0 %v7526_v13  ;;  %3657 = vmatpush.bf16.msra.mxu1 %v7534_v14 }
 0x34e   : > { %3522 = vmatpush.bf16.msrb.mxu2 %v7537_v47  ;;  %3536 = vmatpush.bf16.msrb.mxu3 %v7545_v48 }
 0x351   : > { %3644 = vmatpush.bf16.msra.mxu0 %v7525_v24  ;;  %3658 = vmatpush.bf16.msra.mxu1 %v7533_v27  ;;  %v3256_v27 = vld [vmem:[#allocation2 + $0x4] sm:$0xf] }
 0x352   : > { %3811 = vmatpush.bf16.msra.mxu2 %v7560_v50  ;;  %3825 = vmatpush.bf16.msra.mxu3 %v7568_v51  ;;  %v7562_v50 = vld [vmem:[%s9169_s1 + $0x148] sm:$0xff] }
 0x354   : > { %3208 = vmatmul.bf16.vlgmr.msrb.gmra.mxu0 %v3098_v60  ;;  %3222 = vmatmul.bf16.vlgmr.msrb.gmra.mxu1 %v3101_v61  ;;  %v7529_v60 = vld [vmem:[%s9169_s1 + $0x40] sm:$0xff] }
 0x355   : > { %3645 = vmatpush.bf16.msra.mxu0 %v7524_v36  ;;  %3659 = vmatpush.bf16.msra.mxu1 %v7532_v38 }
 0x356   : > { %3812 = vmatpush.bf16.msra.mxu2 %v7559_v18  ;;  %3826 = vmatpush.bf16.msra.mxu3 %v7567_v57 }
 0x359   : > { %3646 = vmatpush.bf16.msra.mxu0 %v7523_v43  ;;  %3660 = vmatpush.bf16.msra.mxu1 %v7531_v20 }
 0x35a   : > { %3813 = vmatpush.bf16.msra.mxu2 %v7558_v3  ;;  %3827 = vmatpush.bf16.msra.mxu3 %v7566_v4 }
 0x35d   : > { %3647 = vmatpush.bf16.msra.mxu0 %v7522_v53  ;;  %3661 = vmatpush.bf16.msra.mxu1 %v7530_v54 }
 0x35e   : > { %3814 = vmatpush.bf16.msra.mxu2 %v7557_v9  ;;  %3828 = vmatpush.bf16.msra.mxu3 %v7565_v10 }
 0x361   : > { %3648 = vmatpush.bf16.msra.mxu0 %v7521_v58  ;;  %3662 = vmatpush.bf16.msra.mxu1 %v7529_v60  ;;  %v7553_v60 = vld [vmem:[%s9169_s1 + $0x100] sm:$0xff] }
 0x362   : > { %3815 = vmatpush.bf16.msra.mxu2 %v7556_v15  ;;  %3829 = vmatpush.bf16.msra.mxu3 %v7564_v17 }
 0x366   : > { %3816 = vmatpush.bf16.msra.mxu2 %v7555_v34 }
 0x3c0   : > { %v3039_v29 = vpop.f32.mrf.mxu2  ;;  %v3053_v39 = vpop.f32.mrf.mxu3 }
 0x3c1   : > { %v2913_v7 = vpop.f32.mrf.mxu0  ;;  %v2927_v8 = vpop.f32.mrf.mxu1 }
 0x3c2   : > { %v2928_v28 = vadd.f32 %v2927_v8, %v2913_v7  ;;  %v6761_v8 = vld [vmem:[%s7793_s20 + $0x30] sm:$0xf] }
 0x3c3   : > { %v3898_v12 = vshrl.u32 %v6761_v8, 16  ;;  %v3901_v31 = vshll.u32 %v6761_v8, 16  ;;  %v3921_v8 = vld [vmem:[#allocation2 + $0x10] sm:$0x1] }
 0x3c4   : > { %v3040_v16 = vadd.f32 %v3039_v29, %v2928_v28 }
 0x3c5   : > { %v3900_v29 = vrot.slane %v3898_v12, 7 }
 0x3c6   : > { %v3054_v41 = vadd.f32 %v3053_v39, %v3040_v16  ;;  %v7563_v16 = vld [vmem:[%s9169_s1 + $0x150] sm:$0xff] }
 0x3c7   : > { %3830 = vmatpush.bf16.msra.mxu3 %v7563_v16 }
 0x3c8   : > { %v3041_v52 = vpop.f32.mrf.mxu2  ;;  %v3055_v21 = vpop.f32.mrf.mxu3 }
 0x3c9   : > { %v2915_v19 = vpop.f32.mrf.mxu0  ;;  %v2929_v23 = vpop.f32.mrf.mxu1 }
 0x3ca   : > { %v2930_v45 = vadd.f32 %v2929_v23, %v2915_v19  ;;  %v6762_v23 = vld [vmem:[%s7793_s20 + $0x34] sm:$0xf] }
 0x3cb   : > { %v3906_v39 = vshrl.u32 %v6762_v23, 16  ;;  %3831 = vmatpush.bf16.msra.mxu3 %v7562_v50 }
 0x3cc   : > { %v3042_v55 = vadd.f32 %v3041_v52, %v2930_v45 }
 0x3cd   : > { %v3908_v48 = vrot.slane %v3906_v39, 7 }
 0x3ce   : > { %v3056_v63 = vadd.f32 %v3055_v21, %v3042_v55  ;;  %v3260_v55 = vld [vmem:[#allocation2 + $0x14] sm:$0x1] }
 0x3d1   : > { %v3209_v42 = vpop.f32.mrf.mxu0  ;;  %v3223_v37 = vpop.f32.mrf.mxu1 }
 0x3d2   : > { %v3224_v46 = vadd.f32 %v3223_v37, %v3209_v42  ;;  %v3903_v37 = vor.u32 %v3901_v31, %v3900_v29 }
 0x3d4   : > { %v3228_v49 = vadd.f32 %v3224_v46, %v3054_v41  ;;  %v3917_v41 = vld [vmem:[#allocation2] sm:$0xf]  ;;  %v7554_v46 = vld [vmem:[%s9169_s1 + $0x108] sm:$0xff] }
 0x3d5   : > { %3817 = vmatpush.bf16.msra.mxu2 %v7554_v46 }
 0x3d6   : > { %v3230_v56 = vadd.f32 %v8559_v2, %v3228_v49  ;;  %v3909_v49 = vshll.u32 %v6762_v23, 16 }
 0x3d8   : > { %7691 = vtanh.f32 %v3230_v56  ;;  %v3918_v56 = vsel %vm7829_vm6, %v3903_v37, %v3917_v41  ;;  %v3911_v3 = vor.u32 %v3909_v49, %v3908_v48 }
 0x3d9   : > { %v3211_v61 = vpop.f32.mrf.mxu0  ;;  %v3225_v62 = vpop.f32.mrf.mxu1  ;;  %3818 = vmatpush.bf16.msra.mxu2 %v7553_v60  ;;  %v7598_v60 = vld [vmem:[%s9169_s1 + $0xe8] sm:$0xff] }
 0x3da   : > { %v3226_v0 = vadd.f32 %v3225_v62, %v3211_v61  ;;  %v3904_v61 = vrot.slane %v3900_v29, 4  ;;  %v7561_v62 = vld [vmem:[%s9169_s1 + $0x140] sm:$0xff] }
 0x3db   : > { %3832 = vmatpush.bf16.msra.mxu3 %v7561_v62 }
 0x3dc   : > { %v3229_v1 = vadd.f32 %v3226_v0, %v3056_v63 }
 0x3de   : > { %v7692_v5 = vpop.eup %7691  ;;  %v3231_v6 = vadd.f32 %v8559_v2, %v3229_v1 }
 0x3df   : > { %v3234_v7 = vpack.c.bf16 %v7692_v5, %v7692_v5  ;;  %v3273_v28 = vmul.f32 %v7692_v5, %v7692_v5 }
 0x3e0   : > { %7693 = vtanh.f32 %v3231_v6 }
 0x3e1   : > { %v3237_v11 = vshrl.u32 %v3234_v7, 16  ;;  %v3240_v14 = vshll.u32 %v3234_v7, 16 }
 0x3e3   : > { %v3239_v13 = vrot.slane %v3237_v11, 7  ;;  %v3912_v11 = vsel %vm7817_vm5, %v3904_v61, %v3911_v3  ;;  %v7597_v3 = vld [vmem:[%s9169_s1 + $0xe0] sm:$0xff] }
 0x3e5   : > { %v3242_v19 = vor.u32 %v3240_v14, %v3239_v13  ;;  %v3243_v47 = vrot.slane %v3239_v13, 4 }
 0x3e6   : > { %v7694_v24 = vpop.eup %7693 }
 0x3e7   : > { %v3257_v33 = vsel %vm7829_vm6, %v3242_v19, %v3256_v27  ;;  %v3235_v35 = vpack.c.bf16 %v7694_v24, %v7694_v24  ;;  %v3265_v36 = vadd.f32 %v7694_v24, %v7692_v5  ;;  %v3274_v38 = vmul.f32 %v7694_v24, %v7694_v24 }
 0x3e8   : > { %3258 = vst [vmem:[#allocation2 + $0x4] sm:$0xf] %v3257_v33  ;;  %v3913_v5 = vrot.slane %v3908_v48, 4 }
 0x3e9   : > { %v3245_v40 = vshrl.u32 %v3235_v35, 16  ;;  %v3266_v59 = vrot.slane %v3265_v36, 4  ;;  %v3275_v42 = vadd.f32 %v3274_v38, %v3273_v28  ;;  %v3248_v20 = vshll.u32 %v3235_v35, 16 }
 0x3ea   : > { %v3922_v12 = vsel %vm7835_vm7, %v3913_v5, %v3921_v8  ;;  %v7582_v5 = vld [vmem:[%s9169_s1 + $0x68] sm:$0xff] }
 0x3eb   : > { %v3247_v43 = vrot.slane %v3245_v40, 7  ;;  %v3267_v44 = vadd.f32 %v3266_v59, %v3265_v36  ;;  %v3276_v45 = vrot.slane %v3275_v42, 4 }
 0x3ed   : > { %v3250_v51 = vor.u32 %v3248_v20, %v3247_v43  ;;  %v3252_v52 = vrot.slane %v3247_v43, 4  ;;  %v3268_v53 = vrot.slane %v3267_v44, 2  ;;  %v3277_v54 = vadd.f32 %v3276_v45, %v3275_v42 }
 0x3ef   : > { %v3251_v18 = vsel %vm7817_vm5, %v3243_v47, %v3250_v51  ;;  %v3261_v57 = vsel %vm7835_vm7, %v3252_v52, %v3260_v55  ;;  %v3269_v58 = vadd.f32 %v3268_v53, %v3267_v44  ;;  %v3278_v21 = vrot.slane %v3277_v54, 2  ;;  %v3313_v1 = vld [vmem:[#allocation2] sm:$0xff]  ;;  %v7600_v55 = vld [vmem:[%s9169_s1 + $0xf8] sm:$0xff] }
 0x3f0   : > { %3259 = vst [vmem:[#allocation2 + $0xc] sm:$0xf] %v3251_v18  ;;  %v3669_v4 = vld [vmem:[#allocation2] sm:$0xee]  ;;  %v3383_v15 = vunpack.c.l.b16 %v3313_v1  ;;  %v3384_v19 = vunpack.c.h.b16 %v3313_v1  ;;  %4140 = vmatpush.bf16.msrb.mxu1 %v7600_v55  ;;  %v7599_v18 = vld [vmem:[%s9169_s1 + $0xf0] sm:$0xff]  ;;  %v7606_v55 = vld [vmem:[%s9169_s1 + $0x128] sm:$0xff] }
 0x3f1   : > { %v3270_v63 = vrot.slane %v3269_v58, 1  ;;  %v3279_v0 = vadd.f32 %v3278_v21, %v3277_v54  ;;  %3262 = vst [vmem:[#allocation2 + $0x14] sm:$0x1] %v3261_v57  ;;  %v3703_v45 = vunpack.c.l.b16 %v3669_v4  ;;  %v3704_v41 = vunpack.c.h.b16 %v3669_v4  ;;  %v7592_v54 = vld [vmem:[%s9169_s1 + $0xb8] sm:$0xff]  ;;  %v7590_v21 = vld [vmem:[%s9169_s1 + $0xa8] sm:$0xff]  ;;  %v7589_v1 = vld [vmem:[%s9169_s1 + $0xa0] sm:$0xff] }
 0x3f2   : > { %3919 = vst [vmem:[#allocation2] sm:$0xf] %v3918_v56  ;;  %4126 = vmatpush.bf16.msrb.mxu0 %v7592_v54  ;;  %v7591_v56 = vld [vmem:[%s9169_s1 + $0xb0] sm:$0xff]  ;;  %v7576_v57 = vld [vmem:[%s9169_s1 + $0x38] sm:$0xff]  ;;  %v7574_v4 = vld [vmem:[%s9169_s1 + $0x28] sm:$0xff] }
 0x3f3   : > { %v3271_v6 = vadd.f32 %v3270_v63, %v3269_v58  ;;  %v3280_v7 = vrot.slane %v3279_v0, 1  ;;  %v7584_v58 = vld [vmem:[%s9169_s1 + $0x78] sm:$0xff]  ;;  %v7575_v63 = vld [vmem:[%s9169_s1 + $0x30] sm:$0xff] }
 0x3f4   : > { %4141 = vmatpush.bf16.msrb.mxu1 %v7599_v18 }
 0x3f5   : > { %v8796_v9 = vadd.f32 %v3271_v6, %v8625_v22  ;;  %v3281_v10 = vadd.f32 %v3280_v7, %v3279_v0  ;;  %v7583_v0 = vld [vmem:[%s9169_s1 + $0x70] sm:$0xff]  ;;  %v7588_v6 = vld [vmem:[%s9169_s1 + $0x98] sm:$0xff] }
 0x3f6   : > { %4127 = vmatpush.bf16.msrb.mxu0 %v7591_v56  ;;  %v7596_v7 = vld [vmem:[%s9169_s1 + $0xd8] sm:$0xff]  ;;  %v7614_v56 = vld [vmem:[%s9169_s1 + $0x168] sm:$0xff] }
 0x3f7   : > { %v8803_v13 = vadd.f32 %v3281_v10, %v8630_v26  ;;  %v3314_v14 = vld [vmem:[#allocation2 + $0x8] sm:$0xff] }
 0x3f8   : > { %v3385_v17 = vunpack.c.l.b16 %v3314_v14  ;;  %3920 = vst [vmem:[#allocation2 + $0x8] sm:$0xf] %v3912_v11  ;;  %v3386_v23 = vunpack.c.h.b16 %v3314_v14  ;;  %v3347_v24 = vld [vmem:[#allocation2 + $0x10] sm:$0x11]  ;;  %4142 = vmatpush.bf16.msrb.mxu1 %v7598_v60  ;;  %v7573_v11 = vld [vmem:[%s9169_s1 + $0x20] sm:$0xff] }
 0x3f9   : > { %v3387_v27 = vunpack.c.l.b16 %v3347_v24  ;;  %3923 = vst [vmem:[#allocation2 + $0x10] sm:$0x1] %v3922_v12  ;;  %v3388_v22 = vunpack.c.h.b16 %v3347_v24  ;;  %v7581_v12 = vld [vmem:[%s9169_s1 + $0x60] sm:$0xff]  ;;  %v7580_v24 = vld [vmem:[%s9169_s1 + $0x58] sm:$0xff] }
 0x3fa   : > { %v3389_v28 = vpack.c.b16 %v3385_v17, %v3383_v15  ;;  %v3390_v29 = vpack.c.b16 %v3386_v23, %v3384_v19  ;;  %v3705_v46 = vpack.c.b16 %v3385_v17, %v3703_v45  ;;  %v3706_v47 = vpack.c.b16 %v3386_v23, %v3704_v41  ;;  %4128 = vmatpush.bf16.msrb.mxu0 %v7590_v21  ;;  %v7587_v17 = vld [vmem:[%s9169_s1 + $0x90] sm:$0xff]  ;;  %v7572_v23 = vld [vmem:[%s9169_s1 + $0x18] sm:$0xff]  ;;  %v7605_v60 = vld [vmem:[%s9169_s1 + $0x120] sm:$0xff] }
 0x3fb   : > { %v3391_v31 = vpack.c.b16 %v3387_v27, %v3387_v27  ;;  %v3392_v33 = vpack.c.b16 %v3388_v22, %v3388_v22  ;;  %v7595_v19 = vld [vmem:[%s9169_s1 + $0xd0] sm:$0xff]  ;;  %v7019_v21 = vld [vmem:[%s7793_s20 + $0x38] sm:$0xf] }
 0x3fc   : > { %3649 = vmatmul.bf16.vlgmr.msra.gmra.mxu0 %v3389_v28  ;;  %3663 = vmatmul.bf16.vlgmr.msra.gmra.mxu1 %v3390_v29  ;;  %v3396_v35 = vshll.u32 %v3389_v28, 16  ;;  %v3408_v36 = vshll.u32 %v3390_v29, 16  ;;  %v3394_v34 = vshrl.u32 %v3389_v28, 16  ;;  %v3406_v16 = vshrl.u32 %v3390_v29, 16  ;;  %v7586_v28 = vld [vmem:[%s9169_s1 + $0x88] sm:$0xff]  ;;  %v7607_v41 = vld [vmem:[%s9169_s1 + $0x130] sm:$0xff] }
 0x3fd   : > { %v3401_v26 = vshll.u32 %v3391_v31, 16  ;;  %v3413_v38 = vshll.u32 %v3392_v33, 16  ;;  %v3707_v48 = vrot.slane %v3705_v46, 1  ;;  %v3708_v49 = vrot.slane %v3391_v31, 1  ;;  %4143 = vmatpush.bf16.msrb.mxu1 %v7597_v3  ;;  %v7594_v29 = vld [vmem:[%s9169_s1 + $0xc8] sm:$0xff]  ;;  %v7615_v46 = vld [vmem:[%s9169_s1 + $0x170] sm:$0xff] }
 0x3fe   : > { %v3398_v39 = vrot.slane %v3396_v35, 1  ;;  %v3410_v40 = vrot.slane %v3408_v36, 1  ;;  %v3710_v50 = vrot.slane %v3706_v47, 1  ;;  %v3711_v51 = vrot.slane %v3392_v33, 1  ;;  %4129 = vmatpush.bf16.msrb.mxu0 %v7589_v1  ;;  %v7571_v35 = vld [vmem:[%s9169_s1 + $0x10] sm:$0xff]  ;;  %v7569_v47 = vld [vmem:[%s9169_s1] sm:$0xff] }
 0x3ff   : > { %v3403_v42 = vrot.slane %v3401_v26, 1  ;;  %v3415_v43 = vrot.slane %v3413_v38, 1  ;;  %v3709_v52 = vsel %vm648_vm9, %v3707_v48, %v3708_v49  ;;  %v7579_v36 = vld [vmem:[%s9169_s1 + $0x50] sm:$0xff]  ;;  %v7577_v49 = vld [vmem:[%s9169_s1 + $0x40] sm:$0xff]  ;;  %v7612_v3 = vld [vmem:[%s9169_s1 + $0x158] sm:$0xff] }
 0x400   : > { %v3399_v59 = vor.u32 %v3398_v39, %v3394_v34  ;;  %v3411_v37 = vor.u32 %v3410_v40, %v3406_v16  ;;  %v3712_v53 = vsel %vm648_vm9, %v3710_v50, %v3711_v51  ;;  %v7585_v39 = vld [vmem:[%s9169_s1 + $0x80] sm:$0xff] }
 0x401   : > { %4144 = vmatpush.bf16.msrb.mxu1 %v7596_v7  ;;  %v7593_v16 = vld [vmem:[%s9169_s1 + $0xc0] sm:$0xff] }
 0x402   : > { %v3404_v20 = vsel %vm332_vm8, %v3399_v59, %v3403_v42  ;;  %v3416_v44 = vsel %vm332_vm8, %v3411_v37, %v3415_v43  ;;  %4130 = vmatpush.bf16.msrb.mxu0 %v7588_v6  ;;  %v7608_v59 = vld [vmem:[%s9169_s1 + $0x138] sm:$0xff]  ;;  %v7570_v43 = vld [vmem:[%s9169_s1 + $0x8] sm:$0xff]  ;;  %v3867_v7 = vld [vmem:[#allocation2 + $0x4] sm:$0xf] }
 0x403   : > { %3523 = vmatmul.bf16.vlgmr.msrb.gmra.mxu2 %v3404_v20  ;;  %3537 = vmatmul.bf16.vlgmr.msrb.gmra.mxu3 %v3416_v44  ;;  %v7616_v42 = vld [vmem:[%s9169_s1 + $0x178] sm:$0xff]  ;;  %v7578_v20 = vld [vmem:[%s9169_s1 + $0x48] sm:$0xff] }
 0x404   : > { %4252 = vmatpush.bf16.msrb.mxu2 %v7576_v57  ;;  %4266 = vmatpush.bf16.msrb.mxu3 %v7584_v58 }
 0x405   : > { %4145 = vmatpush.bf16.msrb.mxu1 %v7595_v19  ;;  %v7603_v19 = vld [vmem:[%s9169_s1 + $0x110] sm:$0xff] }
 0x406   : > { %4131 = vmatpush.bf16.msrb.mxu0 %v7587_v17 }
 0x408   : > { %4253 = vmatpush.bf16.msrb.mxu2 %v7575_v63  ;;  %4267 = vmatpush.bf16.msrb.mxu3 %v7583_v0  ;;  %v4509_v63 = vshrl.u32 %v7019_v21, 16 }
 0x409   : > { %4146 = vmatpush.bf16.msrb.mxu1 %v7594_v29 }
 0x40a   : > { %4132 = vmatpush.bf16.msrb.mxu0 %v7586_v28 }
 0x40c   : > { %4254 = vmatpush.bf16.msrb.mxu2 %v7574_v4  ;;  %4268 = vmatpush.bf16.msrb.mxu3 %v7582_v5  ;;  %v7020_v5 = vld [vmem:[%s7793_s20 + $0x3c] sm:$0xf] }
 0x40d   : > { %4147 = vmatpush.bf16.msrb.mxu1 %v7593_v16  ;;  %v4520_v16 = vshll.u32 %v7020_v5, 16 }
 0x40e   : > { %4133 = vmatpush.bf16.msrb.mxu0 %v7585_v39 }
 0x410   : > { %4255 = vmatpush.bf16.msrb.mxu2 %v7573_v11  ;;  %4269 = vmatpush.bf16.msrb.mxu3 %v7581_v12  ;;  %v4512_v11 = vshll.u32 %v7019_v21, 16 }
 0x411   : > { %4436 = vmatpush.bf16.msra.mxu1 %v7616_v42 }
 0x412   : > { %4422 = vmatpush.bf16.msra.mxu0 %v7608_v59 }
 0x413   : > { %3819 = vmatmul.bf16.vlgmr.msra.gmra.mxu2 %v3709_v52  ;;  %3833 = vmatmul.bf16.vlgmr.msra.gmra.mxu3 %v3712_v53 }
 0x414   : > { %4256 = vmatpush.bf16.msrb.mxu2 %v7572_v23  ;;  %4270 = vmatpush.bf16.msrb.mxu3 %v7580_v24  ;;  %v4517_v23 = vshrl.u32 %v7020_v5, 16  ;;  %v7611_v24 = vld [vmem:[%s9169_s1 + $0x150] sm:$0xff] }
 0x415   : > { %4437 = vmatpush.bf16.msra.mxu1 %v7615_v46 }
 0x416   : > { %4423 = vmatpush.bf16.msra.mxu0 %v7607_v41  ;;  %v4519_v39 = vrot.slane %v4517_v23, 7 }
 0x418   : > { %4257 = vmatpush.bf16.msrb.mxu2 %v7571_v35  ;;  %4271 = vmatpush.bf16.msrb.mxu3 %v7579_v36 }
 0x419   : > { %4438 = vmatpush.bf16.msra.mxu1 %v7614_v56  ;;  %v4524_v56 = vrot.slane %v4519_v39, 4 }
 0x41a   : > { %4424 = vmatpush.bf16.msra.mxu0 %v7606_v55 }
 0x41c   : > { %4258 = vmatpush.bf16.msrb.mxu2 %v7570_v43  ;;  %4272 = vmatpush.bf16.msrb.mxu3 %v7578_v20  ;;  %v3871_v20 = vld [vmem:[#allocation2 + $0x14] sm:$0x1] }
 0x41e   : > { %4425 = vmatpush.bf16.msra.mxu0 %v7605_v60 }
 0x420   : > { %4259 = vmatpush.bf16.msrb.mxu2 %v7569_v47  ;;  %4273 = vmatpush.bf16.msrb.mxu3 %v7577_v49 }
 0x479   : > { %v3650_v15 = vpop.f32.mrf.mxu0  ;;  %v3664_v27 = vpop.f32.mrf.mxu1 }
 0x481   : > { %v3652_v37 = vpop.f32.mrf.mxu0  ;;  %v3666_v48 = vpop.f32.mrf.mxu1 }
 0x486   : > { %v3524_v61 = vpop.f32.mrf.mxu2  ;;  %v3538_v62 = vpop.f32.mrf.mxu3 }
 0x487   : > { %v3539_v14 = vadd.f32 %v3538_v62, %v3524_v61  ;;  %v7613_v61 = vld [vmem:[%s9169_s1 + $0x160] sm:$0xff] }
 0x488   : > { %4439 = vmatpush.bf16.msra.mxu1 %v7613_v61 }
 0x489   : > { %v3651_v22 = vadd.f32 %v3650_v15, %v3539_v14 }
 0x48b   : > { %v3665_v38 = vadd.f32 %v3664_v27, %v3651_v22 }
 0x48c   : > { %4440 = vmatpush.bf16.msra.mxu1 %v7612_v3 }
 0x48e   : > { %v3526_v8 = vpop.f32.mrf.mxu2  ;;  %v3540_v10 = vpop.f32.mrf.mxu3 }
 0x48f   : > { %v3541_v26 = vadd.f32 %v3540_v10, %v3526_v8  ;;  %v4511_v10 = vrot.slane %v4509_v63, 7 }
 0x490   : > { %4441 = vmatpush.bf16.msra.mxu1 %v7611_v24 }
 0x491   : > { %v3653_v44 = vadd.f32 %v3652_v37, %v3541_v26  ;;  %v4514_v29 = vor.u32 %v4512_v11, %v4511_v10  ;;  %v4528_v26 = vld [vmem:[#allocation2] sm:$0xf]  ;;  %v4515_v49 = vrot.slane %v4511_v10, 4 }
 0x493   : > { %v3667_v52 = vadd.f32 %v3666_v48, %v3653_v44  ;;  %v4529_v44 = vsel %vm7829_vm6, %v4514_v29, %v4528_v26  ;;  %v7601_v48 = vld [vmem:[%s9169_s1 + $0x100] sm:$0xff] }
 0x496   : > { %v3820_v31 = vpop.f32.mrf.mxu2  ;;  %v3834_v33 = vpop.f32.mrf.mxu3 }
 0x497   : > { %v3835_v34 = vadd.f32 %v3834_v33, %v3820_v31 }
 0x499   : > { %v3839_v40 = vadd.f32 %v3835_v34, %v3665_v38  ;;  %v7602_v38 = vld [vmem:[%s9169_s1 + $0x108] sm:$0xff] }
 0x49b   : > { %v3841_v45 = vadd.f32 %v8559_v2, %v3839_v40  ;;  %v7610_v40 = vld [vmem:[%s9169_s1 + $0x148] sm:$0xff] }
 0x49c   : > { %4442 = vmatpush.bf16.msra.mxu1 %v7610_v40 }
 0x49d   : > { %7695 = vtanh.f32 %v3841_v45 }
 0x49e   : > { %v3822_v50 = vpop.f32.mrf.mxu2  ;;  %v3836_v51 = vpop.f32.mrf.mxu3 }
 0x49f   : > { %v3837_v53 = vadd.f32 %v3836_v51, %v3822_v50  ;;  %v7609_v50 = vld [vmem:[%s9169_s1 + $0x140] sm:$0xff] }
 0x4a0   : > { %4443 = vmatpush.bf16.msra.mxu1 %v7609_v50  ;;  %v7623_v50 = vld [vmem:[%s9169_s1 + $0x30] sm:$0xff] }
 0x4a1   : > { %v3840_v54 = vadd.f32 %v3837_v53, %v3667_v52 }
 0x4a3   : > { %v7696_v18 = vpop.eup %7695  ;;  %v3842_v57 = vadd.f32 %v8559_v2, %v3840_v54  ;;  %v7604_v2 = vld [vmem:[%s9169_s1 + $0x118] sm:$0xff]  ;;  %v4522_v54 = vor.u32 %v4520_v16, %v4519_v39 }
 0x4a4   : > { %v3845_v58 = vpack.c.bf16 %v7696_v18, %v7696_v18  ;;  %v3884_v8 = vmul.f32 %v7696_v18, %v7696_v18  ;;  %4426 = vmatpush.bf16.msra.mxu0 %v7604_v2 }
 0x4a5   : > { %7697 = vtanh.f32 %v3842_v57  ;;  %v4523_v61 = vsel %vm7817_vm5, %v4515_v49, %v4522_v54  ;;  %v7622_v54 = vld [vmem:[%s9169_s1 + $0x28] sm:$0xff] }
 0x4a6   : > { %v3848_v62 = vshrl.u32 %v3845_v58, 16  ;;  %v3851_v1 = vshll.u32 %v3845_v58, 16  ;;  %v4532_v58 = vld [vmem:[#allocation2 + $0x10] sm:$0x1] }
 0x4a8   : > { %v3850_v0 = vrot.slane %v3848_v62, 7  ;;  %4427 = vmatpush.bf16.msra.mxu0 %v7603_v19  ;;  %v4533_v62 = vsel %vm7835_vm7, %v4524_v56, %v4532_v58  ;;  %v7636_v56 = vld [vmem:[%s9169_s1 + $0x98] sm:$0xff] }
 0x4aa   : > { %v3853_v4 = vor.u32 %v3851_v1, %v3850_v0  ;;  %v3854_v34 = vrot.slane %v3850_v0, 4 }
 0x4ab   : > { %v7698_v6 = vpop.eup %7697 }
 0x4ac   : > { %v3868_v12 = vsel %vm7829_vm6, %v3853_v4, %v3867_v7  ;;  %v3846_v14 = vpack.c.bf16 %v7698_v6, %v7698_v6  ;;  %v3876_v15 = vadd.f32 %v7698_v6, %v7696_v18  ;;  %v3885_v17 = vmul.f32 %v7698_v6, %v7698_v6  ;;  %4428 = vmatpush.bf16.msra.mxu0 %v7602_v38 }
 0x4ad   : > { %3869 = vst [vmem:[#allocation2 + $0x4] sm:$0xf] %v3868_v12 }
 0x4ae   : > { %v3856_v27 = vshrl.u32 %v3846_v14, 16  ;;  %v3877_v22 = vrot.slane %v3876_v15, 4  ;;  %v3886_v28 = vadd.f32 %v3885_v17, %v3884_v8  ;;  %v3859_v33 = vshll.u32 %v3846_v14, 16 }
 0x4b0   : > { %v3858_v31 = vrot.slane %v3856_v27, 7  ;;  %v3878_v35 = vadd.f32 %v3877_v22, %v3876_v15  ;;  %v3887_v36 = vrot.slane %v3886_v28, 4  ;;  %4429 = vmatpush.bf16.msra.mxu0 %v7601_v48 }
 0x4b2   : > { %v3861_v59 = vor.u32 %v3859_v33, %v3858_v31  ;;  %v3863_v42 = vrot.slane %v3858_v31, 4  ;;  %v3879_v37 = vrot.slane %v3878_v35, 2  ;;  %v3888_v43 = vadd.f32 %v3887_v36, %v3886_v28 }
 0x4b4   : > { %v3862_v45 = vsel %vm7817_vm5, %v3854_v34, %v3861_v59  ;;  %v3872_v41 = vsel %vm7835_vm7, %v3863_v42, %v3871_v20  ;;  %v3880_v46 = vadd.f32 %v3879_v37, %v3878_v35  ;;  %v3889_v47 = vrot.slane %v3888_v43, 2  ;;  %v3924_v53 = vld [vmem:[#allocation2] sm:$0xff]  ;;  %v7640_v37 = vld [vmem:[%s9169_s1 + $0xb8] sm:$0xff]  ;;  %v7639_v20 = vld [vmem:[%s9169_s1 + $0xb0] sm:$0xff] }
 0x4b5   : > { %3870 = vst [vmem:[#allocation2 + $0xc] sm:$0xf] %v3862_v45  ;;  %v4280_v55 = vld [vmem:[#allocation2] sm:$0xee]  ;;  %v3994_v1 = vunpack.c.l.b16 %v3924_v53  ;;  %v3995_v3 = vunpack.c.h.b16 %v3924_v53  ;;  %4737 = vmatpush.bf16.msra.mxu2 %v7640_v37  ;;  %v7624_v45 = vld [vmem:[%s9169_s1 + $0x38] sm:$0xff] }
 0x4b6   : > { %v3881_v51 = vrot.slane %v3880_v46, 1  ;;  %v3890_v52 = vadd.f32 %v3889_v47, %v3888_v43  ;;  %3873 = vst [vmem:[#allocation2 + $0x14] sm:$0x1] %v3872_v41  ;;  %v4314_v35 = vunpack.c.l.b16 %v4280_v55  ;;  %v4315_v36 = vunpack.c.h.b16 %v4280_v55  ;;  %v7648_v43 = vld [vmem:[%s9169_s1 + $0xf8] sm:$0xff]  ;;  %v7646_v47 = vld [vmem:[%s9169_s1 + $0xe8] sm:$0xff]  ;;  %v7645_v53 = vld [vmem:[%s9169_s1 + $0xe0] sm:$0xff] }
 0x4b7   : > { %4530 = vst [vmem:[#allocation2] sm:$0xf] %v4529_v44  ;;  %4751 = vmatpush.bf16.msra.mxu3 %v7648_v43  ;;  %v7647_v44 = vld [vmem:[%s9169_s1 + $0xf0] sm:$0xff]  ;;  %v7632_v41 = vld [vmem:[%s9169_s1 + $0x78] sm:$0xff]  ;;  %v7630_v55 = vld [vmem:[%s9169_s1 + $0x68] sm:$0xff] }
 0x4b8   : > { %v3882_v18 = vadd.f32 %v3881_v51, %v3880_v46  ;;  %v3891_v57 = vrot.slane %v3890_v52, 1  ;;  %v7638_v46 = vld [vmem:[%s9169_s1 + $0xa8] sm:$0xff]  ;;  %v7631_v51 = vld [vmem:[%s9169_s1 + $0x70] sm:$0xff] }
 0x4b9   : > { %4738 = vmatpush.bf16.msra.mxu2 %v7639_v20  ;;  %v7654_v43 = vld [vmem:[%s9169_s1 + $0x128] sm:$0xff] }
 0x4ba   : > { %v8966_v21 = vadd.f32 %v3882_v18, %v8796_v9  ;;  %v3892_v60 = vadd.f32 %v3891_v57, %v3890_v52  ;;  %v7637_v52 = vld [vmem:[%s9169_s1 + $0xa0] sm:$0xff]  ;;  %v7644_v18 = vld [vmem:[%s9169_s1 + $0xd8] sm:$0xff]  ;;  %v7662_v20 = vld [vmem:[%s9169_s1 + $0x168] sm:$0xff] }
 0x4bb   : > { %4752 = vmatpush.bf16.msra.mxu3 %v7647_v44 }
 0x4bc   : > { %v8973_v63 = vadd.f32 %v3892_v60, %v8803_v13  ;;  %v3925_v0 = vld [vmem:[#allocation2 + $0x8] sm:$0xff]  ;;  %v7621_v60 = vld [vmem:[%s9169_s1 + $0x20] sm:$0xff] }
 0x4bd   : > { %v3996_v2 = vunpack.c.l.b16 %v3925_v0  ;;  %4531 = vst [vmem:[#allocation2 + $0x8] sm:$0xf] %v4523_v61  ;;  %v3997_v4 = vunpack.c.h.b16 %v3925_v0  ;;  %v3958_v5 = vld [vmem:[#allocation2 + $0x10] sm:$0x11]  ;;  %4739 = vmatpush.bf16.msra.mxu2 %v7638_v46  ;;  %v7629_v61 = vld [vmem:[%s9169_s1 + $0x60] sm:$0xff] }
 0x4be   : > { %v3998_v6 = vunpack.c.l.b16 %v3958_v5  ;;  %4534 = vst [vmem:[#allocation2 + $0x10] sm:$0x1] %v4533_v62  ;;  %v3999_v9 = vunpack.c.h.b16 %v3958_v5  ;;  %v7661_v46 = vld [vmem:[%s9169_s1 + $0x160] sm:$0xff] }
 0x4bf   : > { %v4000_v7 = vpack.c.b16 %v3996_v2, %v3994_v1  ;;  %v4001_v8 = vpack.c.b16 %v3997_v4, %v3995_v3  ;;  %v4316_v26 = vpack.c.b16 %v3996_v2, %v4314_v35  ;;  %v4317_v38 = vpack.c.b16 %v3997_v4, %v4315_v36  ;;  %4753 = vmatpush.bf16.msra.mxu3 %v7646_v47  ;;  %v7635_v1 = vld [vmem:[%s9169_s1 + $0x90] sm:$0xff]  ;;  %v7620_v3 = vld [vmem:[%s9169_s1 + $0x18] sm:$0xff] }
 0x4c0   : > { %v4002_v10 = vpack.c.b16 %v3998_v6, %v3998_v6  ;;  %v4003_v11 = vpack.c.b16 %v3999_v9, %v3999_v9  ;;  %v7643_v2 = vld [vmem:[%s9169_s1 + $0xd0] sm:$0xff]  ;;  %v7628_v4 = vld [vmem:[%s9169_s1 + $0x58] sm:$0xff]  ;;  %v7634_v9 = vld [vmem:[%s9169_s1 + $0x88] sm:$0xff] }
 0x4c1   : > { %4260 = vmatmul.bf16.vlgmr.msrb.gmra.mxu2 %v4000_v7  ;;  %4274 = vmatmul.bf16.vlgmr.msrb.gmra.mxu3 %v4001_v8  ;;  %v4007_v12 = vshll.u32 %v4000_v7, 16  ;;  %v4019_v14 = vshll.u32 %v4001_v8, 16  ;;  %v4005_v17 = vshrl.u32 %v4000_v7, 16  ;;  %v4017_v23 = vshrl.u32 %v4001_v8, 16  ;;  %v7642_v7 = vld [vmem:[%s9169_s1 + $0xc8] sm:$0xff]  ;;  %v7655_v36 = vld [vmem:[%s9169_s1 + $0x130] sm:$0xff] }
 0x4c2   : > { %v4012_v13 = vshll.u32 %v4002_v10, 16  ;;  %v4024_v15 = vshll.u32 %v4003_v11, 16  ;;  %v4318_v34 = vrot.slane %v4316_v26, 1  ;;  %v4319_v39 = vrot.slane %v4002_v10, 1  ;;  %4740 = vmatpush.bf16.msra.mxu2 %v7637_v52  ;;  %v7663_v26 = vld [vmem:[%s9169_s1 + $0x170] sm:$0xff]  ;;  %v7660_v52 = vld [vmem:[%s9169_s1 + $0x158] sm:$0xff] }
 0x4c3   : > { %v4009_v19 = vrot.slane %v4007_v12, 1  ;;  %v4021_v24 = vrot.slane %v4019_v14, 1  ;;  %v4321_v16 = vrot.slane %v4317_v38, 1  ;;  %v4322_v40 = vrot.slane %v4003_v11, 1  ;;  %4754 = vmatpush.bf16.msra.mxu3 %v7645_v53  ;;  %v7619_v11 = vld [vmem:[%s9169_s1 + $0x10] sm:$0xff]  ;;  %v7617_v38 = vld [vmem:[%s9169_s1] sm:$0xff] }
 0x4c4   : > { %v4014_v22 = vrot.slane %v4012_v13, 1  ;;  %v4026_v29 = vrot.slane %v4024_v15, 1  ;;  %v4320_v59 = vsel %vm648_vm9, %v4318_v34, %v4319_v39  ;;  %v7627_v12 = vld [vmem:[%s9169_s1 + $0x50] sm:$0xff]  ;;  %v7625_v39 = vld [vmem:[%s9169_s1 + $0x40] sm:$0xff] }
 0x4c5   : > { %v4010_v27 = vor.u32 %v4009_v19, %v4005_v17  ;;  %v4022_v28 = vor.u32 %v4021_v24, %v4017_v23  ;;  %v4323_v42 = vsel %vm648_vm9, %v4321_v16, %v4322_v40  ;;  %v7633_v17 = vld [vmem:[%s9169_s1 + $0x80] sm:$0xff]  ;;  %v7656_v24 = vld [vmem:[%s9169_s1 + $0x138] sm:$0xff] }
 0x4c6   : > { %4741 = vmatpush.bf16.msra.mxu2 %v7636_v56  ;;  %v7641_v19 = vld [vmem:[%s9169_s1 + $0xc0] sm:$0xff] }
 0x4c7   : > { %v4015_v31 = vsel %vm332_vm8, %v4010_v27, %v4014_v22  ;;  %v4027_v33 = vsel %vm332_vm8, %v4022_v28, %v4026_v29  ;;  %4755 = vmatpush.bf16.msra.mxu3 %v7644_v18  ;;  %v7664_v27 = vld [vmem:[%s9169_s1 + $0x178] sm:$0xff]  ;;  %v7618_v28 = vld [vmem:[%s9169_s1 + $0x8] sm:$0xff]  ;;  %v7651_v18 = vld [vmem:[%s9169_s1 + $0x110] sm:$0xff] }
 0x4c8   : > { %4134 = vmatmul.bf16.vlgmr.msrb.gmra.mxu0 %v4015_v31  ;;  %4148 = vmatmul.bf16.vlgmr.msrb.gmra.mxu1 %v4027_v33  ;;  %v7626_v29 = vld [vmem:[%s9169_s1 + $0x48] sm:$0xff]  ;;  %v9078_v33 = vld [vmem:[%s9170_s2] ss:$0 sm:$0xff] }
 0x4c9   : > { %4863 = vmatpush.bf16.msrb.mxu0 %v7624_v45  ;;  %4877 = vmatpush.bf16.msrb.mxu1 %v7632_v41  ;;  %v7653_v41 = vld [vmem:[%s9169_s1 + $0x120] sm:$0xff] }
 0x4ca   : > { %4742 = vmatpush.bf16.msra.mxu2 %v7635_v1 }
 0x4cb   : > { %4756 = vmatpush.bf16.msra.mxu3 %v7643_v2 }
 0x4cd   : > { %4864 = vmatpush.bf16.msrb.mxu0 %v7623_v50  ;;  %4878 = vmatpush.bf16.msrb.mxu1 %v7631_v51  ;;  %v7652_v51 = vld [vmem:[%s9169_s1 + $0x118] sm:$0xff] }
 0x4ce   : > { %4743 = vmatpush.bf16.msra.mxu2 %v7634_v9 }
 0x4cf   : > { %4757 = vmatpush.bf16.msra.mxu3 %v7642_v7 }
 0x4d1   : > { %4865 = vmatpush.bf16.msrb.mxu0 %v7622_v54  ;;  %4879 = vmatpush.bf16.msrb.mxu1 %v7630_v55  ;;  %v4478_v55 = vld [vmem:[#allocation2 + $0x4] sm:$0xf] }
 0x4d2   : > { %4744 = vmatpush.bf16.msra.mxu2 %v7633_v17  ;;  %v7657_v17 = vld [vmem:[%s9169_s1 + $0x140] sm:$0xff] }
 0x4d3   : > { %4758 = vmatpush.bf16.msra.mxu3 %v7641_v19 }
 0x4d5   : > { %4866 = vmatpush.bf16.msrb.mxu0 %v7621_v60  ;;  %4880 = vmatpush.bf16.msrb.mxu1 %v7629_v61 }
 0x4d6   : > { %5033 = vmatpush.bf16.msrb.mxu2 %v7656_v24 }
 0x4d7   : > { %5047 = vmatpush.bf16.msrb.mxu3 %v7664_v27 }
 0x4d8   : > { %4430 = vmatmul.bf16.vlgmr.msra.gmra.mxu0 %v4320_v59  ;;  %4444 = vmatmul.bf16.vlgmr.msra.gmra.mxu1 %v4323_v42 }
 0x4d9   : > { %4867 = vmatpush.bf16.msrb.mxu0 %v7620_v3  ;;  %4881 = vmatpush.bf16.msrb.mxu1 %v7628_v4  ;;  %v7650_v3 = vld [vmem:[%s9169_s1 + $0x108] sm:$0xff] }
 0x4da   : > { %5034 = vmatpush.bf16.msrb.mxu2 %v7655_v36  ;;  %v7658_v4 = vld [vmem:[%s9169_s1 + $0x148] sm:$0xff] }
 0x4db   : > { %5048 = vmatpush.bf16.msrb.mxu3 %v7663_v26 }
 0x4dd   : > { %4868 = vmatpush.bf16.msrb.mxu0 %v7619_v11  ;;  %4882 = vmatpush.bf16.msrb.mxu1 %v7627_v12 }
 0x4de   : > { %5035 = vmatpush.bf16.msrb.mxu2 %v7654_v43 }
 0x4df   : > { %5049 = vmatpush.bf16.msrb.mxu3 %v7662_v20 }
 0x4e1   : > { %4869 = vmatpush.bf16.msrb.mxu0 %v7618_v28  ;;  %4883 = vmatpush.bf16.msrb.mxu1 %v7626_v29 }
 0x4e2   : > { %5036 = vmatpush.bf16.msrb.mxu2 %v7653_v41 }
 0x4e3   : > { %5050 = vmatpush.bf16.msrb.mxu3 %v7661_v46 }
 0x4e5   : > { %4870 = vmatpush.bf16.msrb.mxu0 %v7617_v38  ;;  %4884 = vmatpush.bf16.msrb.mxu1 %v7625_v39 }
 0x4e6   : > { %5037 = vmatpush.bf16.msrb.mxu2 %v7652_v51 }
 0x4e7   : > { %5051 = vmatpush.bf16.msrb.mxu3 %v7660_v52 }
 0x4ea   : > { %5038 = vmatpush.bf16.msrb.mxu2 %v7651_v18 }
 0x4ee   : > { %5039 = vmatpush.bf16.msrb.mxu2 %v7650_v3 }
 0x544   : > { %v4261_v0 = vpop.f32.mrf.mxu2  ;;  %v4275_v5 = vpop.f32.mrf.mxu3 }
 0x545   : > { %v4135_v48 = vpop.f32.mrf.mxu0  ;;  %v4149_v49 = vpop.f32.mrf.mxu1 }
 0x546   : > { %v4150_v62 = vadd.f32 %v4149_v49, %v4135_v48 }
 0x548   : > { %v4262_v6 = vadd.f32 %v4261_v0, %v4150_v62 }
 0x54a   : > { %v4276_v13 = vadd.f32 %v4275_v5, %v4262_v6 }
 0x54c   : > { %v4263_v22 = vpop.f32.mrf.mxu2  ;;  %v4277_v34 = vpop.f32.mrf.mxu3 }
 0x54d   : > { %v4137_v57 = vpop.f32.mrf.mxu0  ;;  %v4151_v58 = vpop.f32.mrf.mxu1 }
 0x54e   : > { %v4152_v14 = vadd.f32 %v4151_v58, %v4137_v57  ;;  %v7659_v57 = vld [vmem:[%s9169_s1 + $0x150] sm:$0xff] }
 0x54f   : > { %5052 = vmatpush.bf16.msrb.mxu3 %v7659_v57 }
 0x550   : > { %v4264_v31 = vadd.f32 %v4263_v22, %v4152_v14 }
 0x552   : > { %v4278_v59 = vadd.f32 %v4277_v34, %v4264_v31 }
 0x553   : > { %5053 = vmatpush.bf16.msrb.mxu3 %v7658_v4 }
 0x555   : > { %v4431_v8 = vpop.f32.mrf.mxu0  ;;  %v4445_v10 = vpop.f32.mrf.mxu1 }
 0x556   : > { %v4446_v15 = vadd.f32 %v4445_v10, %v4431_v8 }
 0x557   : > { %5054 = vmatpush.bf16.msrb.mxu3 %v7657_v17 }
 0x558   : > { %v4450_v23 = vadd.f32 %v4446_v15, %v4276_v13  ;;  %v4482_v13 = vld [vmem:[#allocation2 + $0x14] sm:$0x1]  ;;  %v7649_v15 = vld [vmem:[%s9169_s1 + $0x100] sm:$0xff] }
 0x559   : > { %5040 = vmatpush.bf16.msrb.mxu2 %v7649_v15 }
 0x55a   : > { %v4452_v35 = vadd.f32 %v9078_v33, %v4450_v23 }
 0x55c   : > { %7699 = vtanh.f32 %v4452_v35 }
 0x55d   : > { %v4433_v16 = vpop.f32.mrf.mxu0  ;;  %v4447_v40 = vpop.f32.mrf.mxu1 }
 0x55e   : > { %v4448_v42 = vadd.f32 %v4447_v40, %v4433_v16 }
 0x560   : > { %v4451_v37 = vadd.f32 %v4448_v42, %v4278_v59 }
 0x562   : > { %v7700_v44 = vpop.eup %7699  ;;  %v4453_v45 = vadd.f32 %v9078_v33, %v4451_v37 }
 0x563   : > { %v4456_v47 = vpack.c.bf16 %v7700_v44, %v7700_v44  ;;  %v4495_v56 = vmul.f32 %v7700_v44, %v7700_v44 }
 0x564   : > { %7701 = vtanh.f32 %v4453_v45 }
 0x565   : > { %v4459_v48 = vshrl.u32 %v4456_v47, 16  ;;  %v4462_v50 = vshll.u32 %v4456_v47, 16 }
 0x567   : > { %v4461_v49 = vrot.slane %v4459_v48, 7 }
 0x569   : > { %v4464_v53 = vor.u32 %v4462_v50, %v4461_v49  ;;  %v4465_v8 = vrot.slane %v4461_v49, 4 }
 0x56a   : > { %v7702_v54 = vpop.eup %7701 }
 0x56b   : > { %v4479_v58 = vsel %vm7829_vm6, %v4464_v53, %v4478_v55  ;;  %v4457_v60 = vpack.c.bf16 %v7702_v54, %v7702_v54  ;;  %v4487_v61 = vadd.f32 %v7702_v54, %v7700_v44  ;;  %v4496_v62 = vmul.f32 %v7702_v54, %v7702_v54 }
 0x56c   : > { %4480 = vst [vmem:[#allocation2 + $0x4] sm:$0xf] %v4479_v58 }
 0x56d   : > { %v4467_v0 = vshrl.u32 %v4457_v60, 16  ;;  %v4488_v1 = vrot.slane %v4487_v61, 4  ;;  %v4497_v2 = vadd.f32 %v4496_v62, %v4495_v56  ;;  %v4470_v6 = vshll.u32 %v4457_v60, 16 }
 0x56f   : > { %v4469_v5 = vrot.slane %v4467_v0, 7  ;;  %v4489_v9 = vadd.f32 %v4488_v1, %v4487_v61  ;;  %v4498_v7 = vrot.slane %v4497_v2, 4 }
 0x571   : > { %v4472_v10 = vor.u32 %v4470_v6, %v4469_v5  ;;  %v4474_v11 = vrot.slane %v4469_v5, 4  ;;  %v4490_v12 = vrot.slane %v4489_v9, 2  ;;  %v4499_v14 = vadd.f32 %v4498_v7, %v4497_v2 }
 0x573   : > { %v4473_v19 = vsel %vm7817_vm5, %v4465_v8, %v4472_v10  ;;  %v4483_v23 = vsel %vm7835_vm7, %v4474_v11, %v4482_v13  ;;  %v4491_v24 = vadd.f32 %v4490_v12, %v4489_v9  ;;  %v4500_v27 = vrot.slane %v4499_v14, 2  ;;  %v4535_v26 = vld [vmem:[#allocation2] sm:$0xff] }
 0x574   : > { %4481 = vst [vmem:[#allocation2 + $0xc] sm:$0xf] %v4473_v19  ;;  %v4605_v39 = vunpack.c.l.b16 %v4535_v26  ;;  %v4606_v40 = vunpack.c.h.b16 %v4535_v26  ;;  %v4891_v57 = vld [vmem:[#allocation2] sm:$0xee] }
 0x575   : > { %v4492_v22 = vrot.slane %v4491_v24, 1  ;;  %v4501_v28 = vadd.f32 %v4500_v27, %v4499_v14  ;;  %4484 = vst [vmem:[#allocation2 + $0x14] sm:$0x1] %v4483_v23  ;;  %v4925_v58 = vunpack.c.l.b16 %v4891_v57  ;;  %v4926_v60 = vunpack.c.h.b16 %v4891_v57 }
 0x577   : > { %v4493_v29 = vadd.f32 %v4492_v22, %v4491_v24  ;;  %v4502_v31 = vrot.slane %v4501_v28, 1 }
 0x579   : > { %v9137_v35 = vadd.f32 %v4493_v29, %v8966_v21  ;;  %v4503_v36 = vadd.f32 %v4502_v31, %v4501_v28 }
 0x57b   : > { %v9140_v38 = vadd.f32 %v4503_v36, %v8973_v63  ;;  %v4536_v34 = vld [vmem:[#allocation2 + $0x8] sm:$0xff] }
 0x57c   : > { %v4607_v16 = vunpack.c.l.b16 %v4536_v34  ;;  %v4608_v59 = vunpack.c.h.b16 %v4536_v34  ;;  %v4569_v42 = vld [vmem:[#allocation2 + $0x10] sm:$0x11] }
 0x57d   : > { %v4609_v37 = vunpack.c.l.b16 %v4569_v42  ;;  %v4610_v43 = vunpack.c.h.b16 %v4569_v42  ;;  %v5093_v30 = vld [vmem:[#allocation2 + $0x14] sm:$0x1] }
 0x57e   : > { %v4611_v20 = vpack.c.b16 %v4607_v16, %v4605_v39  ;;  %v4612_v44 = vpack.c.b16 %v4608_v59, %v4606_v40  ;;  %v4927_v61 = vpack.c.b16 %v4607_v16, %v4925_v58  ;;  %v4928_v62 = vpack.c.b16 %v4608_v59, %v4926_v60 }
 0x57f   : > { %v4613_v45 = vpack.c.b16 %v4609_v37, %v4609_v37  ;;  %v4614_v41 = vpack.c.b16 %v4610_v43, %v4610_v43 }
 0x580   : > { %4871 = vmatmul.bf16.vlgmr.msrb.gmra.mxu0 %v4611_v20  ;;  %4885 = vmatmul.bf16.vlgmr.msrb.gmra.mxu1 %v4612_v44  ;;  %v4618_v21 = vshll.u32 %v4611_v20, 16  ;;  %v4630_v46 = vshll.u32 %v4612_v44, 16  ;;  %v4616_v63 = vshrl.u32 %v4611_v20, 16  ;;  %v4628_v50 = vshrl.u32 %v4612_v44, 16 }
 0x581   : > { %v4623_v47 = vshll.u32 %v4613_v45, 16  ;;  %v4635_v48 = vshll.u32 %v4614_v41, 16  ;;  %v4929_v0 = vrot.slane %v4927_v61, 1  ;;  %v4930_v1 = vrot.slane %v4613_v45, 1  ;;  %v5089_v45 = vld [vmem:[#allocation2 + $0x4] sm:$0xf] }
 0x582   : > { %v4620_v49 = vrot.slane %v4618_v21, 1  ;;  %v4632_v51 = vrot.slane %v4630_v46, 1  ;;  %v4932_v2 = vrot.slane %v4928_v62, 1  ;;  %v4933_v3 = vrot.slane %v4614_v41, 1 }
 0x583   : > { %v4625_v53 = vrot.slane %v4623_v47, 1  ;;  %v4637_v55 = vrot.slane %v4635_v48, 1  ;;  %v4931_v4 = vsel %vm648_vm9, %v4929_v0, %v4930_v1 }
 0x584   : > { %v4621_v52 = vor.u32 %v4620_v49, %v4616_v63  ;;  %v4633_v54 = vor.u32 %v4632_v51, %v4628_v50  ;;  %v4934_v5 = vsel %vm648_vm9, %v4932_v2, %v4933_v3 }
 0x586   : > { %v4626_v56 = vsel %vm332_vm8, %v4621_v52, %v4625_v53  ;;  %v4638_v18 = vsel %vm332_vm8, %v4633_v54, %v4637_v55 }
 0x587   : > { %4745 = vmatmul.bf16.vlgmr.msra.gmra.mxu2 %v4626_v56  ;;  %4759 = vmatmul.bf16.vlgmr.msra.gmra.mxu3 %v4638_v18 }
 0x597   : > { %5041 = vmatmul.bf16.vlgmr.msrb.gmra.mxu2 %v4931_v4  ;;  %5055 = vmatmul.bf16.vlgmr.msrb.gmra.mxu3 %v4934_v5 }
 0x5fd   : > { %v4872_v11 = vpop.f32.mrf.mxu0  ;;  %v4886_v12 = vpop.f32.mrf.mxu1 }
 0x605   : > { %v4874_v27 = vpop.f32.mrf.mxu0  ;;  %v4888_v29 = vpop.f32.mrf.mxu1 }
 0x60a   : > { %v4746_v6 = vpop.f32.mrf.mxu2  ;;  %v4760_v9 = vpop.f32.mrf.mxu3 }
 0x60b   : > { %v4761_v10 = vadd.f32 %v4760_v9, %v4746_v6 }
 0x60d   : > { %v4873_v14 = vadd.f32 %v4872_v11, %v4761_v10 }
 0x60f   : > { %v4887_v19 = vadd.f32 %v4886_v12, %v4873_v14 }
 0x612   : > { %v4748_v7 = vpop.f32.mrf.mxu2  ;;  %v4762_v8 = vpop.f32.mrf.mxu3 }
 0x613   : > { %v4763_v17 = vadd.f32 %v4762_v8, %v4748_v7 }
 0x615   : > { %v4875_v22 = vadd.f32 %v4874_v27, %v4763_v17 }
 0x617   : > { %v4889_v26 = vadd.f32 %v4888_v29, %v4875_v22 }
 0x61a   : > { %v5042_v13 = vpop.f32.mrf.mxu2  ;;  %v5056_v15 = vpop.f32.mrf.mxu3 }
 0x61b   : > { %v5057_v23 = vadd.f32 %v5056_v15, %v5042_v13 }
 0x61d   : > { %v5061_v24 = vadd.f32 %v5057_v23, %v4887_v19 }
 0x61f   : > { %v5063_v28 = vadd.f32 %v9078_v33, %v5061_v24 }
 0x621   : > { %7703 = vtanh.f32 %v5063_v28 }
 0x622   : > { %v5044_v31 = vpop.f32.mrf.mxu2  ;;  %v5058_v36 = vpop.f32.mrf.mxu3 }
 0x623   : > { %v5059_v34 = vadd.f32 %v5058_v36, %v5044_v31 }
 0x625   : > { %v5062_v39 = vadd.f32 %v5059_v34, %v4889_v26 }
 0x627   : > { %v7704_v16 = vpop.eup %7703  ;;  %v5064_v40 = vadd.f32 %v9078_v33, %v5062_v39 }
 0x628   : > { %v5067_v59 = vpack.c.bf16 %v7704_v16, %v7704_v16  ;;  %5096 = vst [vmem:[%s204_s7] sm:$0xff] %v7704_v16  ;;  %v5106_v41 = vmul.f32 %v7704_v16, %v7704_v16 }
 0x629   : > { %7705 = vtanh.f32 %v5064_v40 }
 0x62a   : > { %v5070_v42 = vshrl.u32 %v5067_v59, 16  ;;  %v5073_v43 = vshll.u32 %v5067_v59, 16 }
 0x62c   : > { %v5072_v37 = vrot.slane %v5070_v42, 7 }
 0x62e   : > { %v5075_v20 = vor.u32 %v5073_v43, %v5072_v37  ;;  %v5076_v54 = vrot.slane %v5072_v37, 4 }
 0x62f   : > { %v7706_v44 = vpop.eup %7705 }
 0x630   : > { %v5090_v21 = vsel %vm7829_vm6, %v5075_v20, %v5089_v45  ;;  %v5068_v46 = vpack.c.bf16 %v7706_v44, %v7706_v44  ;;  %5097 = vst [vmem:[%s204_s7 + $0x8] sm:$0xff] %v7706_v44  ;;  %v5098_v47 = vadd.f32 %v7706_v44, %v7704_v16  ;;  %v5107_v48 = vmul.f32 %v7706_v44, %v7706_v44 }
 0x631   : > { %5091 = vst [vmem:[#allocation2 + $0x4] sm:$0xf] %v5090_v21 }
 0x632   : > { %v5078_v63 = vshrl.u32 %v5068_v46, 16  ;;  %v5099_v33 = vrot.slane %v5098_v47, 4  ;;  %v5108_v49 = vadd.f32 %v5107_v48, %v5106_v41  ;;  %v5081_v51 = vshll.u32 %v5068_v46, 16 }
 0x634   : > { %v5080_v50 = vrot.slane %v5078_v63, 7  ;;  %v5100_v52 = vadd.f32 %v5099_v33, %v5098_v47  ;;  %v5109_v53 = vrot.slane %v5108_v49, 4 }
 0x636   : > { %v5083_v55 = vor.u32 %v5081_v51, %v5080_v50  ;;  %v5085_v56 = vrot.slane %v5080_v50, 4  ;;  %v5101_v18 = vrot.slane %v5100_v52, 2  ;;  %v5110_v57 = vadd.f32 %v5109_v53, %v5108_v49 }
 0x638   : > { %v5084_v58 = vsel %vm7817_vm5, %v5076_v54, %v5083_v55  ;;  %v5094_v60 = vsel %vm7835_vm7, %v5085_v56, %v5093_v30  ;;  %v5102_v61 = vadd.f32 %v5101_v18, %v5100_v52  ;;  %v5111_v62 = vrot.slane %v5110_v57, 2 }
 0x639   : > { %5092 = vst [vmem:[#allocation2 + $0xc] sm:$0xf] %v5084_v58 }
 0x63a   : > { %5095 = vst [vmem:[#allocation2 + $0x14] sm:$0x1] %v5094_v60  ;;  %v5103_v0 = vrot.slane %v5102_v61, 1  ;;  %v5112_v1 = vadd.f32 %v5111_v62, %v5110_v57 }
 0x63c   : > { %v5104_v2 = vadd.f32 %v5103_v0, %v5102_v61  ;;  %v5113_v3 = vrot.slane %v5112_v1, 1 }
 0x63e   : > { %v5114_v4 = vadd.f32 %v5113_v3, %v5112_v1  ;;  %v5105_v25 = vadd.f32 %v5104_v2, %v9137_v35 }
 0x640   : > { %v5115_v5 = vadd.f32 %v5114_v4, %v9140_v38 }
 0x642   : > { %v5117_v32 = vsel %vm246_vm4, %v5105_v25, %v5115_v5 }
 0x643   : > { %5118 = vst [vmem:[%s208_s11] sm:$0x3] %v5117_v32 }
 0x644 PF: > { %s15_s15 = sadd.s32 1, %s7715_s15  }
 0x645   : > { %p12_p4 = scmp.ge.s32.totalorder %s15_s15, 4  }
 0x647   :  { %14 = sbr.rel (!%p12_p4) target bundleno = 1 (0x1), region = 83 }

// kernel: tile.38
= control target key start
LH: loop header
LB: loop body
LE: loop exit
PB: predicated region body
PF: predicated region fallthrough
CT: control target
= control target key end

     0   :  { %s28_s0 = inlined_call_operand.vmem [shape: f32[4], index: 0, kind: input, shape index: {}]   ;;  %s29_s1 = inlined_call_operand.vmem [shape: f32[16,4], index: 1, kind: output, shape index: {}]  }
   0x1   :  { %v4_v0 = vld [vmem:[%s28_s0] ss:$0 sm:$0xff] }
   0x2   :  { %5 = vst [vmem:[%s29_s1] sm:$0xff] %v4_v0 }
   0x3   :  { %8 = vst [vmem:[%s29_s1 + $0x8] sm:$0xff] %v4_v0 }

// kernel: tile.39
= control target key start
LH: loop header
LB: loop body
LE: loop exit
PB: predicated region body
PF: predicated region fallthrough
CT: control target
= control target key end

     0   :  { %s131_s10 = smov 60   ;;  %s132_s11 = smov 52   ;;  %vm3_vm0 = vcmask 31744   ;;  %vm9_vm1 = vcmask 523744   ;;  %vm15_vm2 = vcmask 490944   ;;  %vm21_vm3 = vcmask 458144   ;;  %s207_s0 = inlined_call_operand.vmem [shape: f32[16,4], index: 0, kind: input, shape index: {}]   ;;  %s208_s1 = inlined_call_operand.vmem [shape: f32[1,64], index: 1, kind: output, shape index: {}]  }
   0x1   :  { %v101_v0 = vld [vmem:[%s207_s0 + $0xf] sm:$0x1]   ;;  %v103_v1 = vld [vmem:[%s207_s0 + $0xd] sm:$0x1]   ;;  %v105_v2 = vld [vmem:[%s207_s0 + $0xb] sm:$0x1]  }
   0x2   :  { %7 = vrot.lane.b32.xlu0 %v101_v0, %s131_s10  ;;  %19 = vrot.lane.b32.xlu1 %v103_v1, %s132_s11  ;;  %s133_s14 = smov 44   ;;  %v102_v3 = vld [vmem:[%s207_s0 + $0xe] sm:$0x1]   ;;  %v104_v4 = vld [vmem:[%s207_s0 + $0xc] sm:$0x1]   ;;  %s134_s19 = smov 56  }
   0x3   :  { %31 = vrot.lane.b32.xlu2 %v105_v2, %s133_s14  ;;  %s135_s20 = smov 48   ;;  %v106_v5 = vld [vmem:[%s207_s0 + $0xa] sm:$0x1]   ;;  %s136_s23 = smov 40   ;;  %v107_v6 = vld [vmem:[%s207_s0 + $0x9] sm:$0x1]  }
   0x4   :  { %v108_v7 = vld [vmem:[%s207_s0 + $0x8] sm:$0x1]   ;;  %s137_s28 = smov 36   ;;  %s138_s29 = smov 32   ;;  %v109_v8 = vld [vmem:[%s207_s0 + $0x7] sm:$0x1]  }
   0x5   :  { %s139_s3 = smov 28   ;;  %v110_v9 = vld [vmem:[%s207_s0 + $0x6] sm:$0x1]   ;;  %v111_v10 = vld [vmem:[%s207_s0 + $0x5] sm:$0x1]   ;;  %s140_s8 = smov 24  }
   0x6   :  { %s141_s9 = smov 20   ;;  %v112_v11 = vld [vmem:[%s207_s0 + $0x4] sm:$0x1]   ;;  %s142_s12 = smov 16   ;;  %v113_v12 = vld [vmem:[%s207_s0 + $0x3] sm:$0x1]  }
   0x7   :  { %v114_v13 = vld [vmem:[%s207_s0 + $0x2] sm:$0x1]   ;;  %s143_s17 = smov 12   ;;  %s144_s18 = smov 8   ;;  %v115_v14 = vld [vmem:[%s207_s0 + $0x1] sm:$0x1]  }
   0x8   :  { %s145_s21 = smov 4   ;;  %v2_v15 = vld [vmem:[%s207_s0] sm:$0x1]   ;;  %vm27_vm4 = vcmask 425344   ;;  %vm33_vm5 = vcmask 392544   ;;  %vm39_vm6 = vcmask 359744  }
   0x9   :  { %4 = vst.msk [vmem:[#allocation0] sm:$0x1] %vm3_vm0, %v2_v15   ;;  %vm45_vm7 = vcmask 326944   ;;  %vm51_vm8 = vcmask 294144   ;;  %vm57_vm9 = vcmask 261344   ;;  %vm63_vm10 = vcmask 228544  }
   0xa   :  { %13 = vrot.lane.b32.xlu0 %v102_v3, %s134_s19  ;;  %25 = vrot.lane.b32.xlu1 %v104_v4, %s135_s20  ;;  %vm69_vm11 = vcmask 195744   ;;  %vm75_vm12 = vcmask 162944   ;;  %vm81_vm13 = vcmask 130144   ;;  %vm87_vm14 = vcmask 97344  }
   0xb   :  { %37 = vrot.lane.b32.xlu2 %v106_v5, %s136_s23  ;;  %vm93_vm15 = vcmask 64544  }
  0x12   :  { %43 = vrot.lane.b32.xlu0 %v107_v6, %s137_s28  ;;  %49 = vrot.lane.b32.xlu1 %v108_v7, %s138_s29 }
  0x13   :  { %55 = vrot.lane.b32.xlu2 %v109_v8, %s139_s3 }
  0x1a   :  { %61 = vrot.lane.b32.xlu0 %v110_v9, %s140_s8  ;;  %67 = vrot.lane.b32.xlu1 %v111_v10, %s141_s9 }
  0x1b   :  { %73 = vrot.lane.b32.xlu2 %v112_v11, %s142_s12 }
  0x22   :  { %79 = vrot.lane.b32.xlu0 %v113_v12, %s143_s17  ;;  %85 = vrot.lane.b32.xlu1 %v114_v13, %s144_s18 }
  0x23   :  { %91 = vrot.lane.b32.xlu2 %v115_v14, %s145_s21 }
  0x5d   :  { %v32_v16 = vpop.permute.xlu2 %31  }
  0x65   :  { %v38_v17 = vpop.permute.xlu2 %37  }
  0x6d   :  { %v56_v18 = vpop.permute.xlu2 %55  }
  0x74   :  { %v8_v19 = vpop.permute.xlu0 %7   ;;  %v20_v20 = vpop.permute.xlu1 %19  }
  0x75   :  { %10 = vst.msk [vmem:[#allocation0] sm:$0x1] %vm9_vm1, %v8_v19   ;;  %v74_v21 = vpop.permute.xlu2 %73  }
  0x7c   :  { %v14_v22 = vpop.permute.xlu0 %13   ;;  %v26_v23 = vpop.permute.xlu1 %25  }
  0x7d   :  { %16 = vst.msk [vmem:[#allocation0] sm:$0x1] %vm15_vm2, %v14_v22   ;;  %v92_v24 = vpop.permute.xlu2 %91  }
  0x7e   :  { %22 = vst.msk [vmem:[#allocation0] sm:$0x1] %vm21_vm3, %v20_v20  }
  0x7f   :  { %28 = vst.msk [vmem:[#allocation0] sm:$0x1] %vm27_vm4, %v26_v23  }
  0x80   :  { %34 = vst.msk [vmem:[#allocation0] sm:$0x1] %vm33_vm5, %v32_v16  }
  0x81   :  { %40 = vst.msk [vmem:[#allocation0] sm:$0x1] %vm39_vm6, %v38_v17  }
  0x84   :  { %v44_v25 = vpop.permute.xlu0 %43   ;;  %v50_v26 = vpop.permute.xlu1 %49  }
  0x85   :  { %46 = vst.msk [vmem:[#allocation0] sm:$0x1] %vm45_vm7, %v44_v25  }
  0x86   :  { %52 = vst.msk [vmem:[#allocation0] sm:$0x1] %vm51_vm8, %v50_v26  }
  0x87   :  { %58 = vst.msk [vmem:[#allocation0] sm:$0x1] %vm57_vm9, %v56_v18  }
  0x8c   :  { %v62_v27 = vpop.permute.xlu0 %61   ;;  %v68_v28 = vpop.permute.xlu1 %67  }
  0x8d   :  { %64 = vst.msk [vmem:[#allocation0] sm:$0x1] %vm63_vm10, %v62_v27  }
  0x8e   :  { %70 = vst.msk [vmem:[#allocation0] sm:$0x1] %vm69_vm11, %v68_v28  }
  0x8f   :  { %76 = vst.msk [vmem:[#allocation0] sm:$0x1] %vm75_vm12, %v74_v21  }
  0x94   :  { %v80_v29 = vpop.permute.xlu0 %79   ;;  %v86_v30 = vpop.permute.xlu1 %85  }
  0x95   :  { %82 = vst.msk [vmem:[#allocation0] sm:$0x1] %vm81_vm13, %v80_v29  }
  0x96   :  { %88 = vst.msk [vmem:[#allocation0] sm:$0x1] %vm87_vm14, %v86_v30  }
  0x97   :  { %94 = vst.msk [vmem:[#allocation0] sm:$0x1] %vm93_vm15, %v92_v24  }
  0x9e   :  { %v97_v31 = vld [vmem:[#allocation0] sm:$0x1] }
  0x9f   :  { %100 = vst [vmem:[%s208_s1] sm:$0x1] %v97_v31 }

// kernel: latent2nextframe_forward.3
= control target key start
LH: loop header
LB: loop body
LE: loop exit
PB: predicated region body
PF: predicated region fallthrough
CT: control target
= control target key end

     0   :  { %s890_s18 = smov 0   ;;  %s1015_s0 = inlined_call_operand.vmem [shape: f32[2,16,128], index: 0, kind: input, shape index: {}]   ;;  %s1016_s1 = inlined_call_operand.vmem [shape: f32[1,128], index: 1, kind: input, shape index: {}]   ;;  %s1017_s2 = inlined_call_operand.vmem [shape: f32[1,128], index: 2, kind: input, shape index: {}]   ;;  %s1018_s3 = inlined_call_operand.vmem [shape: bf16[3,128,64], index: 3, kind: input, shape index: {}]   ;;  %s1019_s4 = inlined_call_operand.vmem [shape: f32[1,64], index: 4, kind: input, shape index: {}]   ;;  %s1020_s5 = inlined_call_operand.vmem [shape: f32[2,16,64], index: 5, kind: output, shape index: {}]  }
   0x1 LB: > { %s659_s19 = sadd.s32 4294967295, %s858_s18   ;;  %p663_p0 = scmp.ge.s32.totalorder %s858_s18, 1  ;;  %s858_s18 = sphi %s890_s18, %s15_s18  }
   0x2   : > { %p187_p1 = scmp.lt.s32.totalorder %s858_s18, 3 }
   0x4   : > { %p188_p2 = pnand %p663_p0, %p187_p1 }
   0x5   : > { %p215_p3 = scmp.lt.s32.totalorder (!%p188_p2), %s659_s19, 1 }
   0x6   : > { %191 = sbr.rel (%p188_p2) target bundleno = 223 (0xdf), region = 40 }
   0xb   : > { %v809_v0 = vld [vmem:[%s1018_s3 + $0x38] sm:$0xff]  ;;  %v808_v3 = vld [vmem:[%s1018_s3 + $0x30] sm:$0xff]  ;;  %s1026_s19 = smov (!%p215_p3, %s659_s19), 1  ;;  %vm227_vm0 = vsmask.f32 256  ;;  %v807_v6 = vld [vmem:[%s1018_s3 + $0x28] sm:$0xff] }
   0xc   : > { %v825_v1 = vld [vmem:[%s1018_s3 + $0xb8] sm:$0xff]  ;;  %453 = vmatpush.bf16.msra.mxu1 %v809_v0  ;;  %v824_v4 = vld [vmem:[%s1018_s3 + $0xb0] sm:$0xff]  ;;  %s800_s7 = sshll.u32 %s1026_s19, 4  ;;  %v823_v7 = vld [vmem:[%s1018_s3 + $0xa8] sm:$0xff]  ;;  %vm226_vm1 = vcmask 1040384   ;;  %vm275_vm6 = vcmask 1043456  }
   0xd   : > { %v817_v2 = vld [vmem:[%s1018_s3 + $0x78] sm:$0xff]  ;;  %541 = vmatpush.bf16.msra.mxu2 %v825_v1  ;;  %v816_v5 = vld [vmem:[%s1018_s3 + $0x70] sm:$0xff]  ;;  %vm232_vm2 = vsmask.f32 7938  ;;  %v815_v8 = vld [vmem:[%s1018_s3 + $0x68] sm:$0xff]  ;;  %s219_s16 = scalar_lea.vmem %s1015_s0, %s800_s7  ;;  %vm488_vm9 = vcmask 1046528   ;;  %s224_s11 = scalar_lea.vmem %s1020_s5, %s800_s7 }
   0xe   : > { %390 = vmatpush.bf16.msra.mxu0 %v817_v2  ;;  %v806_v9 = vld [vmem:[%s1018_s3 + $0x20] sm:$0xff]  ;;  %vm940_vm3 = vmand %vm226_vm1, %vm227_vm0  ;;  %v234_v13 = vld [vmem:[#allocation2 + $0x8] sm:$0x1]  ;;  %vm253_vm5 = vsmask.f32 4368  ;;  %vm601_vm14 = vcmask 523264  }
   0xf   : > { %v822_v10 = vld [vmem:[%s1018_s3 + $0xa0] sm:$0xff]  ;;  %vm233_vm4 = vmand %vm226_vm1, %vm232_vm2  ;;  %v238_v18 = vld [vmem:[%s219_s16 + $0x8] sm:$0xff]  ;;  %vm328_vm10 = vsmask.f32 7424 }
  0x10   : > { %454 = vmatpush.bf16.msra.mxu1 %v808_v3  ;;  %v229_v12 = vld [vmem:[#allocation2] sm:$0x1]  ;;  %v235_v17 = vsel %vm233_vm4, 0, %v234_v13  ;;  %v805_v23 = vld [vmem:[%s1018_s3 + $0x18] sm:$0xff]  ;;  %v804_v30 = vld [vmem:[%s1018_s3 + $0x10] sm:$0xff] }
  0x11   : > { %542 = vmatpush.bf16.msra.mxu2 %v824_v4  ;;  %v814_v14 = vld [vmem:[%s1018_s3 + $0x60] sm:$0xff]  ;;  %v230_v15 = vsel %vm940_vm3, 0, %v229_v12  ;;  %236 = vst [vmem:[#allocation2 + $0x8] sm:$0x1] %v235_v17  ;;  %v821_v24 = vld [vmem:[%s1018_s3 + $0x98] sm:$0xff]  ;;  %v820_v31 = vld [vmem:[%s1018_s3 + $0x90] sm:$0xff] }
  0x12   : > { %391 = vmatpush.bf16.msra.mxu0 %v816_v5  ;;  %v237_v16 = vld [vmem:[%s219_s16] sm:$0xff]  ;;  %231 = vst [vmem:[#allocation2] sm:$0x1] %v230_v15  ;;  %v813_v25 = vld [vmem:[%s1018_s3 + $0x58] sm:$0xff]  ;;  %v812_v32 = vld [vmem:[%s1018_s3 + $0x50] sm:$0xff] }
  0x13   : > { %v841_v19 = vld [vmem:[%s1016_s1] ss:$0 sm:$0xff]  ;;  %v803_v37 = vld [vmem:[%s1018_s3 + $0x8] sm:$0xff]  ;;  %vm254_vm7 = vmor %vm227_vm0, %vm253_vm5 }
  0x14   : > { %455 = vmatpush.bf16.msra.mxu1 %v807_v6  ;;  %v842_v20 = vld [vmem:[%s1017_s2] ss:$0 sm:$0xff]  ;;  %v243_v21 = vmul.f32 %v841_v19, %v237_v16  ;;  %v244_v22 = vmul.f32 %v841_v19, %v238_v18  ;;  %v819_v38 = vld [vmem:[%s1018_s3 + $0x88] sm:$0xff]  ;;  %vm982_vm8 = vmand %vm275_vm6, %vm232_vm2 }
  0x15   : > { %543 = vmatpush.bf16.msra.mxu2 %v823_v7  ;;  %v811_v44 = vld [vmem:[%s1018_s3 + $0x48] sm:$0xff]  ;;  %v802_v52 = vld [vmem:[%s1018_s3] sm:$0xff] }
  0x16   : > { %392 = vmatpush.bf16.msra.mxu0 %v815_v8  ;;  %v249_v26 = vadd.f32 %v842_v20, %v243_v21  ;;  %v250_v27 = vadd.f32 %v842_v20, %v244_v22  ;;  %v818_v53 = vld [vmem:[%s1018_s3 + $0x80] sm:$0xff] }
  0x17   : > { %v810_v54 = vld [vmem:[%s1018_s3 + $0x40] sm:$0xff] }
  0x18   : > { %456 = vmatpush.bf16.msra.mxu1 %v806_v9  ;;  %v251_v28 = vpack.c.bf16 %v249_v26, %v249_v26  ;;  %v252_v29 = vpack.c.bf16 %v250_v27, %v250_v27  ;;  %v281_v43 = vld [vmem:[#allocation2 + $0x8] sm:$0x1]  ;;  %v843_v11 = vld [vmem:[%s1019_s4] ss:$0 sm:$0xff] }
  0x19   : > { %544 = vmatpush.bf16.msra.mxu2 %v822_v10  ;;  %v277_v42 = vld [vmem:[#allocation2] sm:$0xf] }
  0x1a   : > { %393 = vmatpush.bf16.msra.mxu0 %v814_v14  ;;  %v256_v33 = vshrl.u32 %v251_v28, 16  ;;  %v259_v34 = vshll.u32 %v251_v28, 16  ;;  %v264_v35 = vshrl.u32 %v252_v29, 16  ;;  %v267_v36 = vshll.u32 %v252_v29, 16 }
  0x1c   : > { %457 = vmatpush.bf16.msra.mxu1 %v805_v23  ;;  %v258_v39 = vrot.slane %v256_v33, 7  ;;  %v266_v40 = vrot.slane %v264_v35, 7 }
  0x1d   : > { %545 = vmatpush.bf16.msra.mxu2 %v821_v24 }
  0x1e   : > { %394 = vmatpush.bf16.msra.mxu0 %v813_v25  ;;  %v261_v45 = vor.u32 %v259_v34, %v258_v39  ;;  %v262_v46 = vrot.slane %v258_v39, 4  ;;  %v269_v47 = vor.u32 %v267_v36, %v266_v40  ;;  %v271_v48 = vrot.slane %v266_v40, 4 }
  0x20   : > { %458 = vmatpush.bf16.msra.mxu1 %v804_v30  ;;  %v270_v49 = vsel %vm254_vm7, %v262_v46, %v269_v47  ;;  %v278_v50 = vsel %vm982_vm8, %v261_v45, %v277_v42  ;;  %v282_v51 = vsel %vm940_vm3, %v271_v48, %v281_v43 }
  0x21   : > { %546 = vmatpush.bf16.msra.mxu2 %v820_v31  ;;  %279 = vst [vmem:[#allocation2] sm:$0xf] %v278_v50 }
  0x22   : > { %395 = vmatpush.bf16.msra.mxu0 %v812_v32  ;;  %280 = vst [vmem:[#allocation2 + $0x4] sm:$0xf] %v270_v49 }
  0x23   : > { %283 = vst [vmem:[#allocation2 + $0x8] sm:$0x1] %v282_v51 }
  0x24   : > { %459 = vmatpush.bf16.msra.mxu1 %v803_v37 }
  0x25   : > { %547 = vmatpush.bf16.msra.mxu2 %v819_v38 }
  0x26   : > { %396 = vmatpush.bf16.msra.mxu0 %v811_v44 }
  0x28   : > { %460 = vmatpush.bf16.msra.mxu1 %v802_v52  ;;  %v831_v55 = vld [vmem:[#allocation2] sm:$0xe] }
  0x29   : > { %548 = vmatpush.bf16.msra.mxu2 %v818_v53  ;;  %v827_v56 = vld [vmem:[#allocation2] sm:$0xff]  }
  0x2a   : > { %397 = vmatpush.bf16.msra.mxu0 %v810_v54  ;;  %v830_v57 = vld [vmem:[#allocation2] sm:$0xf0]  ;;  %v332_v58 = vshll.u32 %v827_v56, 16  ;;  %v302_v59 = vld [vmem:[#allocation2 + $0x8] sm:$0x1]  ;;  %v330_v61 = vshrl.u32 %v827_v56, 16 }
  0x2b   : > { %461 = vmatmul.bf16.vlgmr.msra.gmra.mxu1 %v827_v56  ;;  %v832_v60 = vor.u32 %v831_v55, %v830_v57  ;;  %v325_v62 = vunpack.c.l.b16 %v302_v59 }
  0x2c   : > { %v334_v63 = vrot.slane %v332_v58, 1 }
  0x2d   : > { %v327_v0 = vpack.c.b16 %v325_v62, %v325_v62  ;;  %v489_v1 = vrot.slane %v832_v60, 1 }
  0x2e   : > { %v335_v3 = vor.u32 %v334_v63, %v330_v61 }
  0x2f   : > { %v490_v2 = vrot.slane %v327_v0, 1  ;;  %v337_v4 = vshll.u32 %v327_v0, 16 }
  0x31   : > { %v491_v5 = vsel %vm488_vm9, %v489_v1, %v490_v2  ;;  %v339_v6 = vrot.slane %v337_v4, 1 }
  0x32   : > { %549 = vmatmul.bf16.vlgmr.msra.gmra.mxu2 %v491_v5 }
  0x33   : > { %v340_v7 = vsel %vm328_vm10, %v335_v3, %v339_v6 }
  0x34   : > { %398 = vmatmul.bf16.vlgmr.msra.gmra.mxu0 %v340_v7 }
  0xa8   : > { %v462_v8 = vpop.f32.mrf.mxu1 }
  0xb0   : > { %v464_v17 = vpop.f32.mrf.mxu1 }
  0xb1   : > { %v399_v9 = vpop.f32.mrf.mxu0 }
  0xb2   : > { %v463_v10 = vadd.f32 %v462_v8, %v399_v9 }
  0xb5   : > { %v550_v12 = vpop.f32.mrf.mxu2 }
  0xb6   : > { %v555_v13 = vadd.f32 %v550_v12, %v463_v10 }
  0xb8   : > { %v561_v14 = vadd.f32 %v843_v11, %v555_v13 }
  0xb9   : > { %v401_v15 = vpop.f32.mrf.mxu0 }
  0xba   : > { %v796_v16 = vmul.f32 -1.442695, %v561_v14  ;;  %v465_v18 = vadd.f32 %v464_v17, %v401_v15 }
  0xbc   : > { %844 = vpow2.f32 %v796_v16 }
  0xbd   : > { %v552_v19 = vpop.f32.mrf.mxu2 }
  0xbe   : > { %v556_v20 = vadd.f32 %v552_v19, %v465_v18 }
  0xc0   : > { %v562_v21 = vadd.f32 %v843_v11, %v556_v20 }
  0xc2   : > { %v845_v22 = vpop.eup %844  ;;  %v797_v23 = vmul.f32 -1.442695, %v562_v21 }
  0xc3   : > { %v569_v24 = vadd.f32 1.0, %v845_v22 }
  0xc4   : > { %846 = vpow2.f32 %v797_v23 }
  0xc5   : > { %848 = vrcp.f32 %v569_v24  ;;  %v582_v30 = vand.u32 2147483648, %v569_v24  ;;  %v580_v32 = vand.u32 2147483647, %v569_v24  ;;  %vm576_vm12 = vweird.f32 %v569_v24 }
  0xc7   : > { %v583_v35 = vor.u32 1.1754944e-38, %v582_v30  ;;  %vm581_vm15 = vcmp.eq.f32.partialorder %v580_v32, 8.507059e+37 }
  0xca   : > { %v847_v25 = vpop.eup %846 }
  0xcb   : > { %v849_v26 = vpop.eup %848  ;;  %v570_v27 = vadd.f32 1.0, %v847_v25 }
  0xcc   : > { %v572_v28 = vmul.f32 %v849_v26, %v569_v24  ;;  %vm577_vm11 = vweird.f32 %v849_v26 }
  0xcd   : > { %850 = vrcp.f32 %v570_v27  ;;  %vm578_vm13 = vmor %vm576_vm12, %vm577_vm11  ;;  %v597_v40 = vand.u32 2147483648, %v570_v27  ;;  %v595_v42 = vand.u32 2147483647, %v570_v27  ;;  %vm591_vm1 = vweird.f32 %v570_v27 }
  0xce   : > { %v573_v29 = vsub.f32 1.0, %v572_v28 }
  0xcf   : > { %v598_v44 = vor.u32 1.1754944e-38, %v597_v40  ;;  %vm596_vm3 = vcmp.eq.f32.partialorder %v595_v42, 8.507059e+37 }
  0xd0   : > { %v574_v31 = vmul.f32 %v849_v26, %v573_v29 }
  0xd2   : > { %v575_v33 = vadd.f32 %v849_v26, %v574_v31 }
  0xd3   : > { %v851_v34 = vpop.eup %850 }
  0xd4   : > { %v579_v36 = vsel %vm578_vm13, %v849_v26, %v575_v33  ;;  %v587_v37 = vmul.f32 %v851_v34, %v570_v27  ;;  %vm592_vm0 = vweird.f32 %v851_v34 }
  0xd5   : > { %v584_v38 = vsel %vm581_vm15, %v583_v35, %v579_v36  ;;  %vm593_vm2 = vmor %vm591_vm1, %vm592_vm0 }
  0xd6   : > { %602 = vst.msk [vmem:[%s224_s11] sm:$0xff] %vm601_vm14, %v584_v38  ;;  %v588_v39 = vsub.f32 1.0, %v587_v37 }
  0xd8   : > { %v589_v41 = vmul.f32 %v851_v34, %v588_v39 }
  0xda   : > { %v590_v43 = vadd.f32 %v851_v34, %v589_v41 }
  0xdc   : > { %v594_v45 = vsel %vm593_vm2, %v851_v34, %v590_v43 }
  0xdd   : > { %v599_v46 = vsel %vm596_vm3, %v598_v44, %v594_v45 }
  0xde   : > { %603 = vst.msk [vmem:[%s224_s11 + $0x8] sm:$0xff] %vm601_vm14, %v599_v46 }
  0xdf PF: > { %s15_s18 = sadd.s32 1, %s858_s18  }
  0xe0   : > { %p12_p4 = scmp.ge.s32.totalorder %s15_s18, 4  }
  0xe2   :  { %14 = sbr.rel (!%p12_p4) target bundleno = 1 (0x1), region = 72 }

</bundles_post_ra>
